<compile_context>
chip_gen: v6e
topology: v6e:2x2x1
jax: 0.10.0
libtpu: 0.0.40
codegen_flags: <defaults>
</compile_context>

<pallas_src>
import functools

import jax
import jax.numpy as jnp
import numpy as np
from jax import lax
from jax.experimental import pallas as pl
from jax.experimental.pallas import tpu as pltpu

BN_EPS = 1e-5


def _round_up(x, m):
    return (x + m - 1) // m * m


def _make_fused_kernel(inv_p, use_y_cache):
    """Fused stats + BN-fold + apply kernel.  grid = (phase, tile)."""

    def kernel(x_ref, r_ref, gb_ref, w1_ref, w2_ref, o_ref, *scratch):
        if use_y_cache:
            sum_ref, sumsq_ref, s_ref, b_ref, y_cache = scratch
        else:
            sum_ref, sumsq_ref, s_ref, b_ref = scratch

        phase = pl.program_id(0)
        i = pl.program_id(1)

        # ---------------- phase 0: per-channel batch statistics -------------
        @pl.when(phase == 0)
        def _stats_phase():
            @pl.when(i == 0)
            def _init():
                sum_ref[...] = jnp.zeros_like(sum_ref)
                sumsq_ref[...] = jnp.zeros_like(sumsq_ref)

            y = jnp.dot(x_ref[...], w1_ref[...],
                        preferred_element_type=jnp.float32)
            if use_y_cache:
                y_cache[i] = y.astype(jnp.bfloat16)
            sum_ref[...] += jnp.sum(y, axis=0, keepdims=True)
            sumsq_ref[...] += jnp.sum(y * y, axis=0, keepdims=True)

        # ---------------- phase 1: fold BN, apply, second matmul ------------
        @pl.when(phase == 1)
        def _apply_phase():
            @pl.when(i == 0)
            def _fold_bn():
                # Training-mode BN (biased variance, divide by true P).
                mean = sum_ref[...] * inv_p
                var = jnp.maximum(sumsq_ref[...] * inv_p - mean * mean, 0.0)
                inv_std = lax.rsqrt(var + BN_EPS)
                s = gb_ref[0:1, :] * inv_std          # gamma * inv_std
                s_ref[...] = s
                b_ref[...] = gb_ref[1:2, :] - mean * s  # beta - mean * s

            if use_y_cache:
                y = y_cache[i].astype(jnp.float32)
            else:
                # Fallback: recompute y = x @ w1 when the cache doesn't fit.
                y = jnp.dot(x_ref[...], w1_ref[...],
                            preferred_element_type=jnp.float32)

            # Folded BN + residual (f32) + ReLU: one FMA + add + max.
            z = jnp.maximum(y * s_ref[...] + b_ref[...] + r_ref[...], 0.0)
            # Second 1x1 conv.
            o_ref[...] = jnp.dot(z.astype(jnp.bfloat16), w2_ref[...],
                                 preferred_element_type=jnp.float32)

    return kernel


@functools.partial(jax.jit,
                   static_argnames=("max_tile_p", "y_cache_limit_bytes"))
def fused_block(x236, x230, w1, gamma, beta, w2, *,
                max_tile_p=2048,
                y_cache_limit_bytes=16 * 1024 * 1024):
    """x236: (N, C_in, H, W), x230: (N, C_mid, H, W)  (NCHW, like PyTorch).

    w1: (C_mid, C_in) = conv2d72.weight[:, :, 0, 0]
    w2: (C_in, C_mid) = conv2d73.weight[:, :, 0, 0]
    Returns (N, C_in, H, W) float32.
    """
    n, c_in, h, w = x236.shape
    c_mid = x230.shape[1]
    p = n * h * w

    tile_p = min(max_tile_p, _round_up(p, 128))
    p_pad = _round_up(p, tile_p)
    n_tiles = p_pad // tile_p

    # NCHW -> channels-last (P, C) flatten.  Interface-only.
    x_flat = jnp.transpose(x236, (0, 2, 3, 1)).reshape(p, c_in)
    r_flat = jnp.transpose(x230, (0, 2, 3, 1)).reshape(p, c_mid)
    if p_pad != p:
        pad = p_pad - p
        x_flat = jnp.pad(x_flat, ((0, pad), (0, 0)))
        r_flat = jnp.pad(r_flat, ((0, pad), (0, 0)))

    x_bf = x_flat.astype(jnp.bfloat16)                   # MXU operand
    r_f32 = r_flat.astype(jnp.float32)                   # residual stays f32
    w1_bf = jnp.transpose(w1).astype(jnp.bfloat16)       # (C_in, C_mid)
    w2_bf = jnp.transpose(w2).astype(jnp.bfloat16)       # (C_mid, C_in)
    gb = jnp.stack([gamma.astype(jnp.float32),
                    beta.astype(jnp.float32)], axis=0)   # (2, C_mid)

    y_cache_bytes = p_pad * c_mid * 2
    use_y_cache = y_cache_bytes <= y_cache_limit_bytes
    # TODO(synk): when the y cache does not fit (very large P), replace the
    # phase-0 stats with Gram accumulation (G += x^T x, colsum += 1^T x) to
    # also cut the recompute flops; plain recompute is the fallback here.
    # TODO(synk): on v7x, per-core partial stats ("parallel" tile axis + (2,C)
    # accumulators) would use both TensorCores for phase 0.

    vmem_est = (2 * tile_p * c_in * 2          # x tiles (bf16, dbl-buffered)
                + 2 * tile_p * c_mid * 4       # residual tiles (f32)
                + 2 * tile_p * c_in * 4        # output tiles (f32)
                + 2 * 2 * c_in * c_mid * 2     # w1, w2 (bf16)
                + 16 * c_mid * 4               # gb + small scratch
                + (y_cache_bytes if use_y_cache else 0))
    vmem_limit = max(32 * 1024 * 1024,
                     min(int(vmem_est * 1.3), 48 * 1024 * 1024))

    if use_y_cache:
        x_map = lambda ph, i: (i * (1 - ph), 0)   # x only consumed in phase 0
    else:
        x_map = lambda ph, i: (i, 0)              # phase 1 recomputes y
    r_map = lambda ph, i: (i * ph, 0)             # residual only in phase 1
    o_map = lambda ph, i: (i * ph, 0)             # output only in phase 1

    scratch_shapes = [pltpu.VMEM((1, c_mid), jnp.float32)] * 4  # sum,sumsq,s,b
    if use_y_cache:
        scratch_shapes = scratch_shapes + [
            pltpu.VMEM((n_tiles, tile_p, c_mid), jnp.bfloat16)]

    out_flat = pl.pallas_call(
        _make_fused_kernel(1.0 / p, use_y_cache),
        out_shape=jax.ShapeDtypeStruct((p_pad, c_in), jnp.float32),
        grid=(2, n_tiles),
        in_specs=[
            pl.BlockSpec((tile_p, c_in), x_map),
            pl.BlockSpec((tile_p, c_mid), r_map),
            pl.BlockSpec((2, c_mid), lambda ph, i: (0, 0)),
            pl.BlockSpec((c_in, c_mid), lambda ph, i: (0, 0)),
            pl.BlockSpec((c_mid, c_in), lambda ph, i: (0, 0)),
        ],
        out_specs=pl.BlockSpec((tile_p, c_in), o_map),
        scratch_shapes=scratch_shapes,
        compiler_params=pltpu.CompilerParams(
            dimension_semantics=("arbitrary", "arbitrary"),
            vmem_limit_bytes=vmem_limit),
        cost_estimate=pl.CostEstimate(
            flops=(4 if use_y_cache else 6) * p_pad * c_in * c_mid,
            transcendentals=0,
            bytes_accessed=(x_bf.size * 2 + r_f32.size * 4
                            + 2 * 2 * c_in * c_mid + p_pad * c_in * 4)),
    )(x_bf, r_f32, gb, w1_bf, w2_bf)

    out_flat = out_flat[:p]
    # channels-last -> NCHW (module interface).
    return jnp.transpose(out_flat.reshape(n, h, w, c_in), (0, 3, 1, 2))


def _reference(x236, x230, w1, gamma, beta, w2):
    """Pure-JAX f32 reference matching PyTorch training-mode forward."""
    y = jnp.einsum("nchw,oc->nohw", x236, w1)
    mean = jnp.mean(y, axis=(0, 2, 3), keepdims=True)
    var = jnp.mean((y - mean) ** 2, axis=(0, 2, 3), keepdims=True)
    z = (y - mean) / jnp.sqrt(var + BN_EPS)
    z = z * gamma[None, :, None, None] + beta[None, :, None, None]
    z = jnp.maximum(z + x230, 0.0)
    return jnp.einsum("nchw,oc->nohw", z, w2)


if __name__ == "__main__":
    # Small shapes consistent with the module structure
    # (original: C_in=256, C_mid=1024, H=W=14, N=1).
    N, C_IN, C_MID, H, W = 2, 128, 256, 15, 15   # P = 450 (exercises padding)

    key = jax.random.PRNGKey(0)
    k1, k2, k3, k4, k5, k6 = jax.random.split(key, 6)

    x236 = jax.random.normal(k1, (N, C_IN, H, W), dtype=jnp.float32)
    x230 = jax.random.normal(k2, (N, C_MID, H, W), dtype=jnp.float32)

    # Deterministic synthetic parameters (no checkpoint load).
    w1 = jax.random.normal(k3, (C_MID, C_IN), dtype=jnp.float32) * 0.05  # conv2d72
    w2 = jax.random.normal(k4, (C_IN, C_MID), dtype=jnp.float32) * 0.05  # conv2d73
    gamma = 1.0 + 0.1 * jax.random.normal(k5, (C_MID,), dtype=jnp.float32)
    beta = 0.1 * jax.random.normal(k6, (C_MID,), dtype=jnp.float32)

    ref = np.asarray(_reference(x236, x230, w1, gamma, beta, w2))

    # 1) Default config: single tile, y cached in VMEM across phases.
    out = jax.block_until_ready(fused_block(x236, x230, w1, gamma, beta, w2))
    np.testing.assert_allclose(np.asarray(out), ref, rtol=3e-2, atol=6e-2)

    # 2) Multi-tile config (grid=(2, 4)) with the VMEM y cache.
    out = jax.block_until_ready(
        fused_block(x236, x230, w1, gamma, beta, w2, max_tile_p=128))
    np.testing.assert_allclose(np.asarray(out), ref, rtol=3e-2, atol=6e-2)

    # 3) Multi-tile config with the cache disabled (recompute fallback path).
    out = jax.block_until_ready(
        fused_block(x236, x230, w1, gamma, beta, w2, max_tile_p=128,
                    y_cache_limit_bytes=0))
    np.testing.assert_allclose(np.asarray(out), ref, rtol=3e-2, atol=6e-2)

    print("KERNEL_OK")
</pallas_src>

<mosaic_0001>
module attributes {stable_mosaic.version = 11 : i64} {
  func.func @kernel(%arg0: i32, %arg1: i32, %arg2: memref<512x128xbf16, #tpu.memory_space<vmem>>, %arg3: memref<512x256xf32, #tpu.memory_space<vmem>>, %arg4: memref<2x256xf32, #tpu.memory_space<vmem>>, %arg5: memref<128x256xbf16, #tpu.memory_space<vmem>>, %arg6: memref<256x128xbf16, #tpu.memory_space<vmem>>, %arg7: memref<512x128xf32, #tpu.memory_space<vmem>>, %arg8: memref<1x256xf32, #tpu.memory_space<vmem>>, %arg9: memref<1x256xf32, #tpu.memory_space<vmem>>, %arg10: memref<1x256xf32, #tpu.memory_space<vmem>>, %arg11: memref<1x256xf32, #tpu.memory_space<vmem>>, %arg12: memref<1x512x256xbf16, #tpu.memory_space<vmem>>) attributes {dimension_semantics = [#tpu.dimension_semantics<arbitrary>, #tpu.dimension_semantics<arbitrary>], iteration_bounds = array<i64: 2, 1>, scalar_prefetch = 0 : i64, scratch_operands = 5 : i64, tpu.core_type = #tpu.core_type<tc>, window_params = [{transform_indices = @transform_0, window_bounds = array<i64: 512, 128>}, {transform_indices = @transform_1, window_bounds = array<i64: 512, 256>}, {pipeline_mode = #tpu.pipeline_mode<synchronous>, transform_indices = @transform_2, window_bounds = array<i64: 2, 256>}, {pipeline_mode = #tpu.pipeline_mode<synchronous>, transform_indices = @transform_3, window_bounds = array<i64: 128, 256>}, {pipeline_mode = #tpu.pipeline_mode<synchronous>, transform_indices = @transform_4, window_bounds = array<i64: 256, 128>}, {transform_indices = @transform_5, window_bounds = array<i64: 512, 128>}]} {
    %c0_i32 = arith.constant 0 : i32
    %0 = arith.cmpi eq, %arg0, %c0_i32 : i32
    %1 = arith.extui %0 : i1 to i32
    %c0_i32_0 = arith.constant 0 : i32
    %2 = arith.cmpi ne, %1, %c0_i32_0 : i32
    scf.if %2 {
      %c0_i32_2 = arith.constant 0 : i32
      %6 = arith.cmpi eq, %arg1, %c0_i32_2 : i32
      %7 = arith.extui %6 : i1 to i32
      %c0_i32_3 = arith.constant 0 : i32
      %8 = arith.cmpi ne, %7, %c0_i32_3 : i32
      scf.if %8 {
        %cst_19 = arith.constant 0.000000e+00 : f32
        %28 = vector.broadcast %cst_19 : f32 to vector<1x256xf32>
        %c0_20 = arith.constant 0 : index
        %c0_21 = arith.constant 0 : index
        %29 = vector.load %arg8[%c0_20, %c0_21] : memref<1x256xf32, #tpu.memory_space<vmem>>, vector<1x256xf32>
        tpu.vector_store %arg8[%c0_20, %c0_21], %28 {strides = array<i32>} : memref<1x256xf32, #tpu.memory_space<vmem>>, vector<1x256xf32>,
        %cst_22 = arith.constant 0.000000e+00 : f32
        %30 = vector.broadcast %cst_22 : f32 to vector<1x256xf32>
        %c0_23 = arith.constant 0 : index
        %c0_24 = arith.constant 0 : index
        %31 = vector.load %arg9[%c0_23, %c0_24] : memref<1x256xf32, #tpu.memory_space<vmem>>, vector<1x256xf32>
        tpu.vector_store %arg9[%c0_23, %c0_24], %30 {strides = array<i32>} : memref<1x256xf32, #tpu.memory_space<vmem>>, vector<1x256xf32>,
      } else {
      }
      %c0 = arith.constant 0 : index
      %c0_4 = arith.constant 0 : index
      %9 = vector.load %arg2[%c0, %c0_4] : memref<512x128xbf16, #tpu.memory_space<vmem>>, vector<512x128xbf16>
      %c0_5 = arith.constant 0 : index
      %c0_6 = arith.constant 0 : index
      %10 = vector.load %arg5[%c0_5, %c0_6] : memref<128x256xbf16, #tpu.memory_space<vmem>>, vector<128x256xbf16>
      %cst = arith.constant dense<0.000000e+00> : vector<512x256xf32>
      %11 = tpu.matmul %9, %10, %cst {dimension_numbers = #tpu.dot_dimension_numbers<[1], [0], [0], [1], [0, 0, 1, 1], [], []>} : vector<512x128xbf16>, vector<128x256xbf16>, vector<512x256xf32> -> vector<512x256xf32>
      %12 = arith.truncf %11 : vector<512x256xf32> to vector<512x256xbf16>
      %13 = arith.index_cast %arg1 : i32 to index
      %c0_7 = arith.constant 0 : index
      %c0_8 = arith.constant 0 : index
      %14 = vector.load %arg12[%13, %c0_7, %c0_8] : memref<1x512x256xbf16, #tpu.memory_space<vmem>>, vector<1x512x256xbf16>
      %15 = vector.shape_cast %14 : vector<1x512x256xbf16> to vector<512x256xbf16>
      %16 = vector.shape_cast %12 : vector<512x256xbf16> to vector<1x512x256xbf16>
      tpu.vector_store %arg12[%13, %c0_7, %c0_8], %16 {strides = array<i32>} : memref<1x512x256xbf16, #tpu.memory_space<vmem>>, vector<1x512x256xbf16>,
      %c0_9 = arith.constant 0 : index
      %c0_10 = arith.constant 0 : index
      %17 = vector.load %arg8[%c0_9, %c0_10] : memref<1x256xf32, #tpu.memory_space<vmem>>, vector<1x256xf32>
      %cst_11 = arith.constant dense<0.000000e+00> : vector<256xf32>
      %18 = vector.multi_reduction <add>, %11, %cst_11 [0] : vector<512x256xf32> to vector<256xf32>
      %19 = vector.shape_cast %18 : vector<256xf32> to vector<1x256xf32>
      %20 = arith.addf %17, %19 : vector<1x256xf32>
      %c0_12 = arith.constant 0 : index
      %c0_13 = arith.constant 0 : index
      %21 = vector.load %arg8[%c0_12, %c0_13] : memref<1x256xf32, #tpu.memory_space<vmem>>, vector<1x256xf32>
      tpu.vector_store %arg8[%c0_12, %c0_13], %20 {strides = array<i32>} : memref<1x256xf32, #tpu.memory_space<vmem>>, vector<1x256xf32>,
      %c0_14 = arith.constant 0 : index
      %c0_15 = arith.constant 0 : index
      %22 = vector.load %arg9[%c0_14, %c0_15] : memref<1x256xf32, #tpu.memory_space<vmem>>, vector<1x256xf32>
      %23 = arith.mulf %11, %11 : vector<512x256xf32>
      %cst_16 = arith.constant dense<0.000000e+00> : vector<256xf32>
      %24 = vector.multi_reduction <add>, %23, %cst_16 [0] : vector<512x256xf32> to vector<256xf32>
      %25 = vector.shape_cast %24 : vector<256xf32> to vector<1x256xf32>
      %26 = arith.addf %22, %25 : vector<1x256xf32>
      %c0_17 = arith.constant 0 : index
      %c0_18 = arith.constant 0 : index
      %27 = vector.load %arg9[%c0_17, %c0_18] : memref<1x256xf32, #tpu.memory_space<vmem>>, vector<1x256xf32>
      tpu.vector_store %arg9[%c0_17, %c0_18], %26 {strides = array<i32>} : memref<1x256xf32, #tpu.memory_space<vmem>>, vector<1x256xf32>,
    } else {
    }
    %c1_i32 = arith.constant 1 : i32
    %3 = arith.cmpi eq, %arg0, %c1_i32 : i32
    %4 = arith.extui %3 : i1 to i32
    %c0_i32_1 = arith.constant 0 : i32
    %5 = arith.cmpi ne, %4, %c0_i32_1 : i32
    scf.if %5 {
      %c0_i32_2 = arith.constant 0 : i32
      %6 = arith.cmpi eq, %arg1, %c0_i32_2 : i32
      %7 = arith.extui %6 : i1 to i32
      %c0_i32_3 = arith.constant 0 : i32
      %8 = arith.cmpi ne, %7, %c0_i32_3 : i32
      scf.if %8 {
        %c0_16 = arith.constant 0 : index
        %c0_17 = arith.constant 0 : index
        %27 = vector.load %arg8[%c0_16, %c0_17] : memref<1x256xf32, #tpu.memory_space<vmem>>, vector<1x256xf32>
        %cst_18 = arith.constant 0.00222222228 : f32
        %28 = vector.broadcast %cst_18 : f32 to vector<1x256xf32>
        %29 = arith.mulf %27, %28 : vector<1x256xf32>
        %c0_19 = arith.constant 0 : index
        %c0_20 = arith.constant 0 : index
        %30 = vector.load %arg9[%c0_19, %c0_20] : memref<1x256xf32, #tpu.memory_space<vmem>>, vector<1x256xf32>
        %cst_21 = arith.constant 0.00222222228 : f32
        %31 = vector.broadcast %cst_21 : f32 to vector<1x256xf32>
        %32 = arith.mulf %30, %31 : vector<1x256xf32>
        %33 = arith.mulf %29, %29 : vector<1x256xf32>
        %34 = arith.subf %32, %33 : vector<1x256xf32>
        %cst_22 = arith.constant 0.000000e+00 : f32
        %35 = vector.broadcast %cst_22 : f32 to vector<1x256xf32>
        %36 = arith.maximumf %34, %35 : vector<1x256xf32>
        %cst_23 = arith.constant 9.99999974E-6 : f32
        %37 = vector.broadcast %cst_23 : f32 to vector<1x256xf32>
        %38 = arith.addf %36, %37 : vector<1x256xf32>
        %39 = math.rsqrt %38 : vector<1x256xf32>
        %c0_24 = arith.constant 0 : index
        %c0_25 = arith.constant 0 : index
        %40 = vector.load %arg4[%c0_24, %c0_25] : memref<2x256xf32, #tpu.memory_space<vmem>>, vector<1x256xf32>
        %41 = arith.mulf %40, %39 : vector<1x256xf32>
        %c0_26 = arith.constant 0 : index
        %c0_27 = arith.constant 0 : index
        %42 = vector.load %arg10[%c0_26, %c0_27] : memref<1x256xf32, #tpu.memory_space<vmem>>, vector<1x256xf32>
        tpu.vector_store %arg10[%c0_26, %c0_27], %41 {strides = array<i32>} : memref<1x256xf32, #tpu.memory_space<vmem>>, vector<1x256xf32>,
        %c1 = arith.constant 1 : index
        %c0_28 = arith.constant 0 : index
        %43 = vector.load %arg4[%c1, %c0_28] : memref<2x256xf32, #tpu.memory_space<vmem>>, vector<1x256xf32>
        %44 = arith.mulf %29, %41 : vector<1x256xf32>
        %45 = arith.subf %43, %44 : vector<1x256xf32>
        %c0_29 = arith.constant 0 : index
        %c0_30 = arith.constant 0 : index
        %46 = vector.load %arg11[%c0_29, %c0_30] : memref<1x256xf32, #tpu.memory_space<vmem>>, vector<1x256xf32>
        tpu.vector_store %arg11[%c0_29, %c0_30], %45 {strides = array<i32>} : memref<1x256xf32, #tpu.memory_space<vmem>>, vector<1x256xf32>,
      } else {
      }
      %9 = arith.index_cast %arg1 : i32 to index
      %c0 = arith.constant 0 : index
      %c0_4 = arith.constant 0 : index
      %10 = vector.load %arg12[%9, %c0, %c0_4] : memref<1x512x256xbf16, #tpu.memory_space<vmem>>, vector<1x512x256xbf16>
      %11 = vector.shape_cast %10 : vector<1x512x256xbf16> to vector<512x256xbf16>
      %12 = arith.extf %11 : vector<512x256xbf16> to vector<512x256xf32>
      %c0_5 = arith.constant 0 : index
      %c0_6 = arith.constant 0 : index
      %13 = vector.load %arg10[%c0_5, %c0_6] : memref<1x256xf32, #tpu.memory_space<vmem>>, vector<1x256xf32>
      %14 = vector.broadcast %13 : vector<1x256xf32> to vector<512x256xf32>
      %15 = arith.mulf %12, %14 : vector<512x256xf32>
      %c0_7 = arith.constant 0 : index
      %c0_8 = arith.constant 0 : index
      %16 = vector.load %arg11[%c0_7, %c0_8] : memref<1x256xf32, #tpu.memory_space<vmem>>, vector<1x256xf32>
      %17 = vector.broadcast %16 : vector<1x256xf32> to vector<512x256xf32>
      %18 = arith.addf %15, %17 : vector<512x256xf32>
      %c0_9 = arith.constant 0 : index
      %c0_10 = arith.constant 0 : index
      %19 = vector.load %arg3[%c0_9, %c0_10] : memref<512x256xf32, #tpu.memory_space<vmem>>, vector<512x256xf32>
      %20 = arith.addf %18, %19 : vector<512x256xf32>
      %cst = arith.constant 0.000000e+00 : f32
      %21 = vector.broadcast %cst : f32 to vector<512x256xf32>
      %22 = arith.maximumf %20, %21 : vector<512x256xf32>
      %23 = arith.truncf %22 : vector<512x256xf32> to vector<512x256xbf16>
      %c0_11 = arith.constant 0 : index
      %c0_12 = arith.constant 0 : index
      %24 = vector.load %arg6[%c0_11, %c0_12] : memref<256x128xbf16, #tpu.memory_space<vmem>>, vector<256x128xbf16>
      %cst_13 = arith.constant dense<0.000000e+00> : vector<512x128xf32>
      %25 = tpu.matmul %23, %24, %cst_13 {dimension_numbers = #tpu.dot_dimension_numbers<[1], [0], [0], [1], [0, 0, 1, 1], [], []>} : vector<512x256xbf16>, vector<256x128xbf16>, vector<512x128xf32> -> vector<512x128xf32>
      %c0_14 = arith.constant 0 : index
      %c0_15 = arith.constant 0 : index
      %26 = vector.load %arg7[%c0_14, %c0_15] : memref<512x128xf32, #tpu.memory_space<vmem>>, vector<512x128xf32>
      tpu.vector_store %arg7[%c0_14, %c0_15], %25 {strides = array<i32>} : memref<512x128xf32, #tpu.memory_space<vmem>>, vector<512x128xf32>,
    } else {
    }
    return
  }
  func.func @transform_0(%arg0: i32, %arg1: i32) -> (i32, i32) {
    %c1_i32 = arith.constant 1 : i32
    %0 = arith.subi %c1_i32, %arg0 : i32
    %1 = arith.muli %arg1, %0 : i32
    %c0_i32 = arith.constant 0 : i32
    %c0_i32_0 = arith.constant 0 : i32
    return %1, %c0_i32 : i32, i32
  }
  func.func @transform_1(%arg0: i32, %arg1: i32) -> (i32, i32) {
    %0 = arith.muli %arg1, %arg0 : i32
    %c0_i32 = arith.constant 0 : i32
    %c0_i32_0 = arith.constant 0 : i32
    return %0, %c0_i32 : i32, i32
  }
  func.func @transform_2(%arg0: i32, %arg1: i32) -> (i32, i32) {
    %c0_i32 = arith.constant 0 : i32
    %c0_i32_0 = arith.constant 0 : i32
    %c0_i32_1 = arith.constant 0 : i32
    return %c0_i32, %c0_i32_0 : i32, i32
  }
  func.func @transform_3(%arg0: i32, %arg1: i32) -> (i32, i32) {
    %c0_i32 = arith.constant 0 : i32
    %c0_i32_0 = arith.constant 0 : i32
    %c0_i32_1 = arith.constant 0 : i32
    return %c0_i32, %c0_i32_0 : i32, i32
  }
  func.func @transform_4(%arg0: i32, %arg1: i32) -> (i32, i32) {
    %c0_i32 = arith.constant 0 : i32
    %c0_i32_0 = arith.constant 0 : i32
    %c0_i32_1 = arith.constant 0 : i32
    return %c0_i32, %c0_i32_0 : i32, i32
  }
  func.func @transform_5(%arg0: i32, %arg1: i32) -> (i32, i32) {
    %0 = arith.muli %arg1, %arg0 : i32
    %c0_i32 = arith.constant 0 : i32
    %c0_i32_0 = arith.constant 0 : i32
    return %0, %c0_i32 : i32, i32
  }
}

</mosaic_0001>

<bundles_post_ra>
// kernel: fused_block.1
= control target key start
LH: loop header
LB: loop body
LE: loop exit
PB: predicated region body
PF: predicated region fallthrough
CT: control target
= control target key end

     0   :  { %s3843_s18 = smov 0   ;;  %s3845_s19 = smov 0   ;;  %s6005_s0 = inlined_call_operand.vmem [shape: bf16[512,128], index: 0, kind: input, shape index: {}]   ;;  %s6006_s1 = inlined_call_operand.vmem [shape: f32[512,256], index: 1, kind: input, shape index: {}]   ;;  %s6007_s2 = inlined_call_operand.vmem [shape: f32[2,256], index: 2, kind: input, shape index: {}]   ;;  %s6008_s3 = inlined_call_operand.vmem [shape: bf16[128,256], index: 3, kind: input, shape index: {}]   ;;  %s6009_s4 = inlined_call_operand.vmem [shape: bf16[256,128], index: 4, kind: input, shape index: {}]   ;;  %s6010_s5 = inlined_call_operand.vmem [shape: f32[512,128], index: 5, kind: output, shape index: {}]  }
   0x1   :  { %s3847_s20 = smov 0  }
   0x2 LB: > { %s27_s21 = sadd.s32 1, %s3803_s19  ;;  %p3435_p0 = scmp.ge.s32.totalorder %s3807_s20, 1  ;;  %s3807_s20 = sphi %s3847_s20, %s15_s20   ;;  %s3803_s19 = sphi %s3845_s19, %s6219_s19   ;;  %s3799_s18 = sphi %s3843_s18, %s6218_s18  }
   0x3   : > { %p29_p1 = scmp.ge.s32.totalorder %s27_s21, 2  ;;  %p226_p2 = scmp.lt.s32.totalorder %s3807_s20, 3 }
   0x5   : > { %s6221_s21 = smov (%p29_p1, %s27_s21), 0  ;;  %p227_p3 = pnand %p3435_p0, %p226_p2 }
   0x6   : > { %p3436_p4 = scmp.ne.s32.totalorder (!%p227_p3), %s3799_s18, 0 }
   0x7   : > { %230 = sbr.rel (%p227_p3) target bundleno = 899 (0x383), region = 40 }
   0xc   : > { %295 = sbr.rel (%p3436_p4) target bundleno = 460 (0x1cc), region = 44 }
  0x11   : > { %v3711_v0 = vld [vmem:[%s6008_s3 + $0x74] ss:$8 sps:$4 sm:$0xff]   ;;  %v3713_v1 = vld [vmem:[%s6008_s3 + $0x70] ss:$8 sps:$4 sm:$0xff]   ;;  %v3809_v2 = vmov 0   ;;  %v3735_v17 = vld [vmem:[%s6005_s0] sm:$0xff]  }
  0x12   : > { %690 = vmatprep.mubr.bf16.mxu0 %v3809_v2  ;;  %850 = vmatprep.mubr.bf16.mxu1 %v3809_v2  ;;  %v3714_v3 = vld [vmem:[%s6008_s3 + $0x64] ss:$8 sps:$4 sm:$0xff]   ;;  %v3716_v4 = vld [vmem:[%s6008_s3 + $0x60] ss:$8 sps:$4 sm:$0xff]   ;;  %v3717_v5 = vld [vmem:[%s6008_s3 + $0x54] ss:$8 sps:$4 sm:$0xff]  }
  0x13   : > { %658 = vmatprep.subr.bf16.mxu0 %v3711_v0  ;;  %3635 = vmatprep.subr.bf16.mxu1 %v3711_v0  ;;  %v3719_v6 = vld [vmem:[%s6008_s3 + $0x50] ss:$8 sps:$4 sm:$0xff]   ;;  %v3720_v7 = vld [vmem:[%s6008_s3 + $0x44] ss:$8 sps:$4 sm:$0xff]   ;;  %v3722_v8 = vld [vmem:[%s6008_s3 + $0x40] ss:$8 sps:$4 sm:$0xff]  }
  0x14   : > { %659 = vmatpush1.bf16.msra.mxu0 %v3713_v1  ;;  %3643 = vmatpush1.bf16.msra.mxu1 %v3713_v1  ;;  %v3723_v9 = vld [vmem:[%s6008_s3 + $0x34] ss:$8 sps:$4 sm:$0xff]   ;;  %v3725_v10 = vld [vmem:[%s6008_s3 + $0x30] ss:$8 sps:$4 sm:$0xff]   ;;  %v3726_v11 = vld [vmem:[%s6008_s3 + $0x24] ss:$8 sps:$4 sm:$0xff]  }
  0x15   : > { %660 = vmatprep.subr.bf16.mxu0 %v3714_v3  ;;  %3636 = vmatprep.subr.bf16.mxu1 %v3714_v3  ;;  %v3728_v12 = vld [vmem:[%s6008_s3 + $0x20] ss:$8 sps:$4 sm:$0xff]   ;;  %v3729_v13 = vld [vmem:[%s6008_s3 + $0x14] ss:$8 sps:$4 sm:$0xff]   ;;  %v3731_v14 = vld [vmem:[%s6008_s3 + $0x10] ss:$8 sps:$4 sm:$0xff]  }
  0x16   : > { %v3732_v15 = vld [vmem:[%s6008_s3 + $0x4] ss:$8 sps:$4 sm:$0xff]   ;;  %v3734_v16 = vld [vmem:[%s6008_s3] ss:$8 sps:$4 sm:$0xff]   ;;  %v3737_v21 = vld [vmem:[%s6005_s0 + $0x10] sm:$0xff]  }
  0x17   : > { %v3743_v18 = vld [vmem:[%s6005_s0 + $0x80] sm:$0xff]   ;;  %v3736_v19 = vld [vmem:[%s6005_s0 + $0x8] sm:$0xff]   ;;  %v3747_v22 = vld [vmem:[%s6005_s0 + $0x90] sm:$0xff]  }
  0x18   : > { %661 = vmatpush1.bf16.msra.mxu0 %v3716_v4  ;;  %3644 = vmatpush1.bf16.msra.mxu1 %v3716_v4  ;;  %v3745_v20 = vld [vmem:[%s6005_s0 + $0x88] sm:$0xff]   ;;  %v3738_v23 = vld [vmem:[%s6005_s0 + $0x18] sm:$0xff]   ;;  %v3739_v25 = vld [vmem:[%s6005_s0 + $0x20] sm:$0xff]  }
  0x19   : > { %662 = vmatprep.subr.bf16.mxu0 %v3717_v5  ;;  %3637 = vmatprep.subr.bf16.mxu1 %v3717_v5  ;;  %v3749_v24 = vld [vmem:[%s6005_s0 + $0x98] sm:$0xff]   ;;  %v3751_v26 = vld [vmem:[%s6005_s0 + $0xa0] sm:$0xff]   ;;  %v3740_v27 = vld [vmem:[%s6005_s0 + $0x28] sm:$0xff]  }
  0x1a   : > { %v3753_v28 = vld [vmem:[%s6005_s0 + $0xa8] sm:$0xff]   ;;  %v3741_v29 = vld [vmem:[%s6005_s0 + $0x30] sm:$0xff]   ;;  %v3742_v31 = vld [vmem:[%s6005_s0 + $0x38] sm:$0xff]  }
  0x1b   : > { %v3755_v30 = vld [vmem:[%s6005_s0 + $0xb0] sm:$0xff]   ;;  %v3757_v32 = vld [vmem:[%s6005_s0 + $0xb8] sm:$0xff]   ;;  %v3744_v33 = vld [vmem:[%s6005_s0 + $0x40] sm:$0xff]  }
  0x1c   : > { %663 = vmatpush1.bf16.msra.mxu0 %v3719_v6  ;;  %3645 = vmatpush1.bf16.msra.mxu1 %v3719_v6  ;;  %v3759_v34 = vld [vmem:[%s6005_s0 + $0xc0] sm:$0xff]   ;;  %v3746_v35 = vld [vmem:[%s6005_s0 + $0x48] sm:$0xff]   ;;  %v3748_v37 = vld [vmem:[%s6005_s0 + $0x50] sm:$0xff]  }
  0x1d   : > { %664 = vmatprep.subr.bf16.mxu0 %v3720_v7  ;;  %3638 = vmatprep.subr.bf16.mxu1 %v3720_v7  ;;  %v3760_v36 = vld [vmem:[%s6005_s0 + $0xc8] sm:$0xff]   ;;  %v3761_v38 = vld [vmem:[%s6005_s0 + $0xd0] sm:$0xff]   ;;  %v3750_v39 = vld [vmem:[%s6005_s0 + $0x58] sm:$0xff]  }
  0x1e   : > { %v3762_v40 = vld [vmem:[%s6005_s0 + $0xd8] sm:$0xff]   ;;  %v3752_v41 = vld [vmem:[%s6005_s0 + $0x60] sm:$0xff]   ;;  %v3754_v43 = vld [vmem:[%s6005_s0 + $0x68] sm:$0xff]  }
  0x1f   : > { %v3763_v42 = vld [vmem:[%s6005_s0 + $0xe0] sm:$0xff]   ;;  %v3764_v44 = vld [vmem:[%s6005_s0 + $0xe8] sm:$0xff]   ;;  %v3756_v45 = vld [vmem:[%s6005_s0 + $0x70] sm:$0xff]  }
  0x20   : > { %665 = vmatpush1.bf16.msra.mxu0 %v3722_v8  ;;  %3646 = vmatpush1.bf16.msra.mxu1 %v3722_v8  ;;  %v3765_v46 = vld [vmem:[%s6005_s0 + $0xf0] sm:$0xff]   ;;  %v3758_v47 = vld [vmem:[%s6005_s0 + $0x78] sm:$0xff]  }
  0x21   : > { %666 = vmatprep.subr.bf16.mxu0 %v3723_v9  ;;  %3639 = vmatprep.subr.bf16.mxu1 %v3723_v9  ;;  %v3766_v48 = vld [vmem:[%s6005_s0 + $0xf8] sm:$0xff]  }
  0x24   : > { %667 = vmatpush1.bf16.msra.mxu0 %v3725_v10  ;;  %3647 = vmatpush1.bf16.msra.mxu1 %v3725_v10 }
  0x25   : > { %668 = vmatprep.subr.bf16.mxu0 %v3726_v11  ;;  %3640 = vmatprep.subr.bf16.mxu1 %v3726_v11 }
  0x28   : > { %669 = vmatpush1.bf16.msra.mxu0 %v3728_v12  ;;  %3648 = vmatpush1.bf16.msra.mxu1 %v3728_v12 }
  0x29   : > { %670 = vmatprep.subr.bf16.mxu0 %v3729_v13  ;;  %3641 = vmatprep.subr.bf16.mxu1 %v3729_v13 }
  0x2c   : > { %671 = vmatpush1.bf16.msra.mxu0 %v3731_v14  ;;  %3649 = vmatpush1.bf16.msra.mxu1 %v3731_v14 }
  0x2d   : > { %672 = vmatprep.subr.bf16.mxu0 %v3732_v15  ;;  %3642 = vmatprep.subr.bf16.mxu1 %v3732_v15 }
  0x30   : > { %673 = vmatpush1.bf16.msra.mxu0 %v3734_v16  ;;  %3650 = vmatpush1.bf16.msra.mxu1 %v3734_v16 }
  0x33   : > { %691 = vmatmul.mubr.bf16.vlgmr.msra.gmra.mxu0 %v3735_v17  ;;  %851 = vmatmul.mubr.bf16.vlgmr.msra.gmra.mxu1 %v3743_v18 }
  0x34   : > { %700 = vmatprep.mubr.bf16.mxu0 %v3809_v2  ;;  %860 = vmatprep.mubr.bf16.mxu1 %v3809_v2 }
  0x3b   : > { %701 = vmatmul.mubr.bf16.gmra.mxu0 %v3736_v19  ;;  %861 = vmatmul.mubr.bf16.gmra.mxu1 %v3745_v20 }
  0x3c   : > { %710 = vmatprep.mubr.bf16.mxu0 %v3809_v2  ;;  %870 = vmatprep.mubr.bf16.mxu1 %v3809_v2 }
  0x43   : > { %711 = vmatmul.mubr.bf16.gmra.mxu0 %v3737_v21  ;;  %871 = vmatmul.mubr.bf16.gmra.mxu1 %v3747_v22 }
  0x44   : > { %720 = vmatprep.mubr.bf16.mxu0 %v3809_v2  ;;  %880 = vmatprep.mubr.bf16.mxu1 %v3809_v2 }
  0x4b   : > { %721 = vmatmul.mubr.bf16.gmra.mxu0 %v3738_v23  ;;  %881 = vmatmul.mubr.bf16.gmra.mxu1 %v3749_v24 }
  0x4c   : > { %730 = vmatprep.mubr.bf16.mxu0 %v3809_v2  ;;  %890 = vmatprep.mubr.bf16.mxu1 %v3809_v2 }
  0x53   : > { %731 = vmatmul.mubr.bf16.gmra.mxu0 %v3739_v25  ;;  %891 = vmatmul.mubr.bf16.gmra.mxu1 %v3751_v26 }
  0x54   : > { %740 = vmatprep.mubr.bf16.mxu0 %v3809_v2  ;;  %900 = vmatprep.mubr.bf16.mxu1 %v3809_v2 }
  0x5b   : > { %741 = vmatmul.mubr.bf16.gmra.mxu0 %v3740_v27  ;;  %901 = vmatmul.mubr.bf16.gmra.mxu1 %v3753_v28 }
  0x5c   : > { %750 = vmatprep.mubr.bf16.mxu0 %v3809_v2  ;;  %910 = vmatprep.mubr.bf16.mxu1 %v3809_v2 }
  0x63   : > { %751 = vmatmul.mubr.bf16.gmra.mxu0 %v3741_v29  ;;  %911 = vmatmul.mubr.bf16.gmra.mxu1 %v3755_v30 }
  0x64   : > { %760 = vmatprep.mubr.bf16.mxu0 %v3809_v2  ;;  %920 = vmatprep.mubr.bf16.mxu1 %v3809_v2 }
  0x6b   : > { %761 = vmatmul.mubr.bf16.gmra.mxu0 %v3742_v31  ;;  %921 = vmatmul.mubr.bf16.gmra.mxu1 %v3757_v32 }
  0x6c   : > { %770 = vmatprep.mubr.bf16.mxu0 %v3809_v2  ;;  %930 = vmatprep.mubr.bf16.mxu1 %v3809_v2 }
  0x73   : > { %771 = vmatmul.mubr.bf16.gmra.mxu0 %v3744_v33  ;;  %931 = vmatmul.mubr.bf16.gmra.mxu1 %v3759_v34 }
  0x74   : > { %780 = vmatprep.mubr.bf16.mxu0 %v3809_v2  ;;  %940 = vmatprep.mubr.bf16.mxu1 %v3809_v2 }
  0x7b   : > { %781 = vmatmul.mubr.bf16.gmra.mxu0 %v3746_v35  ;;  %941 = vmatmul.mubr.bf16.gmra.mxu1 %v3760_v36 }
  0x7c   : > { %790 = vmatprep.mubr.bf16.mxu0 %v3809_v2  ;;  %950 = vmatprep.mubr.bf16.mxu1 %v3809_v2 }
  0x83   : > { %791 = vmatmul.mubr.bf16.gmra.mxu0 %v3748_v37  ;;  %951 = vmatmul.mubr.bf16.gmra.mxu1 %v3761_v38 }
  0x84   : > { %800 = vmatprep.mubr.bf16.mxu0 %v3809_v2  ;;  %960 = vmatprep.mubr.bf16.mxu1 %v3809_v2 }
  0x8b   : > { %801 = vmatmul.mubr.bf16.gmra.mxu0 %v3750_v39  ;;  %961 = vmatmul.mubr.bf16.gmra.mxu1 %v3762_v40 }
  0x8c   : > { %810 = vmatprep.mubr.bf16.mxu0 %v3809_v2  ;;  %970 = vmatprep.mubr.bf16.mxu1 %v3809_v2 }
  0x93   : > { %811 = vmatmul.mubr.bf16.gmra.mxu0 %v3752_v41  ;;  %971 = vmatmul.mubr.bf16.gmra.mxu1 %v3763_v42 }
  0x94   : > { %820 = vmatprep.mubr.bf16.mxu0 %v3809_v2  ;;  %980 = vmatprep.mubr.bf16.mxu1 %v3809_v2 }
  0x9b   : > { %821 = vmatmul.mubr.bf16.gmra.mxu0 %v3754_v43  ;;  %981 = vmatmul.mubr.bf16.gmra.mxu1 %v3764_v44 }
  0x9c   : > { %830 = vmatprep.mubr.bf16.mxu0 %v3809_v2  ;;  %990 = vmatprep.mubr.bf16.mxu1 %v3809_v2 }
  0xa3   : > { %831 = vmatmul.mubr.bf16.gmra.mxu0 %v3756_v45  ;;  %991 = vmatmul.mubr.bf16.gmra.mxu1 %v3765_v46 }
  0xa4   : > { %840 = vmatprep.mubr.bf16.mxu0 %v3809_v2  ;;  %1000 = vmatprep.mubr.bf16.mxu1 %v3809_v2 }
  0xab   : > { %841 = vmatmul.mubr.bf16.gmra.mxu0 %v3758_v47  ;;  %1001 = vmatmul.mubr.bf16.gmra.mxu1 %v3766_v48 }
  0xf3   : > { %v4040_v49 = vpop.f32.mrf.mxu0  ;;  %v4042_v50 = vpop.f32.mrf.mxu1 }
  0xf5   : > { %v4044_v51 = vpop.f32.mrf.mxu0  ;;  %v4046_v52 = vpop.f32.mrf.mxu1 }
  0xf6   : > { %v3571_v53 = vpack.c.bf16 %v4044_v51, %v4040_v49  ;;  %v3603_v54 = vpack.c.bf16 %v4046_v52, %v4042_v50 }
  0xf7   : > { %v4052_v55 = vpop.f32.mrf.mxu0  ;;  %v4054_v56 = vpop.f32.mrf.mxu1 }
  0xf8   : > { %1398 = vst [vmem:[#allocation6 + $0xb0] sm:$0xff] %v3571_v53  ;;  %1430 = vst [vmem:[#allocation6 + $0x148] sm:$0xff] %v3603_v54 }
  0xf9   : > { %v4056_v57 = vpop.f32.mrf.mxu0  ;;  %v4058_v58 = vpop.f32.mrf.mxu1 }
  0xfa   : > { %v3572_v59 = vpack.c.bf16 %v4056_v57, %v4052_v55  ;;  %v3604_v61 = vpack.c.bf16 %v4058_v58, %v4054_v56 }
  0xfb   : > { %v4062_v60 = vpop.f32.mrf.mxu0  ;;  %v4066_v62 = vpop.f32.mrf.mxu1 }
  0xfc   : > { %1399 = vst [vmem:[#allocation6 + $0x1b0] sm:$0xff] %v3572_v59  ;;  %1431 = vst [vmem:[#allocation6 + $0x1d0] sm:$0xff] %v3604_v61 }
  0xfd   : > { %v4068_v63 = vpop.f32.mrf.mxu0  ;;  %v4070_v0 = vpop.f32.mrf.mxu1 }
  0xfe   : > { %v3573_v1 = vpack.c.bf16 %v4068_v63, %v4062_v60  ;;  %v3605_v3 = vpack.c.bf16 %v4070_v0, %v4066_v62 }
  0xff   : > { %v4074_v2 = vpop.f32.mrf.mxu0  ;;  %v4078_v4 = vpop.f32.mrf.mxu1 }
 0x100   : > { %1400 = vst [vmem:[#allocation6 + $0xd8] sm:$0xff] %v3573_v1  ;;  %1432 = vst [vmem:[#allocation6 + $0x100] sm:$0xff] %v3605_v3 }
 0x101   : > { %v4080_v5 = vpop.f32.mrf.mxu0  ;;  %v4082_v6 = vpop.f32.mrf.mxu1 }
 0x102   : > { %v3574_v7 = vpack.c.bf16 %v4080_v5, %v4074_v2  ;;  %v3606_v9 = vpack.c.bf16 %v4082_v6, %v4078_v4 }
 0x103   : > { %v4086_v8 = vpop.f32.mrf.mxu0  ;;  %v4090_v10 = vpop.f32.mrf.mxu1 }
 0x104   : > { %1401 = vst [vmem:[#allocation6 + $0x18] sm:$0xff] %v3574_v7  ;;  %1433 = vst [vmem:[#allocation6 + $0xc8] sm:$0xff] %v3606_v9 }
 0x105   : > { %v4092_v11 = vpop.f32.mrf.mxu0  ;;  %v4094_v12 = vpop.f32.mrf.mxu1 }
 0x106   : > { %v3575_v13 = vpack.c.bf16 %v4092_v11, %v4086_v8  ;;  %v3607_v15 = vpack.c.bf16 %v4094_v12, %v4090_v10 }
 0x107   : > { %v4098_v14 = vpop.f32.mrf.mxu0  ;;  %v4102_v16 = vpop.f32.mrf.mxu1 }
 0x108   : > { %1402 = vst [vmem:[#allocation6 + $0x50] sm:$0xff] %v3575_v13  ;;  %1434 = vst [vmem:[#allocation6 + $0x40] sm:$0xff] %v3607_v15 }
 0x109   : > { %v4104_v17 = vpop.f32.mrf.mxu0  ;;  %v4106_v18 = vpop.f32.mrf.mxu1 }
 0x10a   : > { %v3576_v19 = vpack.c.bf16 %v4104_v17, %v4098_v14  ;;  %v3608_v21 = vpack.c.bf16 %v4106_v18, %v4102_v16 }
 0x10b   : > { %v4110_v20 = vpop.f32.mrf.mxu0  ;;  %v4114_v22 = vpop.f32.mrf.mxu1 }
 0x10c   : > { %1403 = vst [vmem:[#allocation6 + $0x168] sm:$0xff] %v3576_v19  ;;  %1435 = vst [vmem:[#allocation6 + $0x1f8] sm:$0xff] %v3608_v21 }
 0x10d   : > { %v4116_v23 = vpop.f32.mrf.mxu0  ;;  %v4118_v24 = vpop.f32.mrf.mxu1 }
 0x10e   : > { %6082 = vst [vmem:[#allocation7_spill] sm:$0xff] %v4118_v24  ;;  %v3577_v25 = vpack.c.bf16 %v4116_v23, %v4110_v20  ;;  %v3609_v27 = vpack.c.bf16 %v4118_v24, %v4114_v22 }
 0x10f   : > { %v4122_v26 = vpop.f32.mrf.mxu0  ;;  %v4126_v28 = vpop.f32.mrf.mxu1 }
 0x110   : > { %1404 = vst [vmem:[#allocation6 + $0x130] sm:$0xff] %v3577_v25  ;;  %1436 = vst [vmem:[#allocation6 + $0x20] sm:$0xff] %v3609_v27 }
 0x111   : > { %v4128_v29 = vpop.f32.mrf.mxu0  ;;  %v4130_v30 = vpop.f32.mrf.mxu1 }
 0x112   : > { %6083 = vst [vmem:[#allocation8_spill] sm:$0xff] %v4130_v30  ;;  %v3578_v31 = vpack.c.bf16 %v4128_v29, %v4122_v26  ;;  %v3610_v33 = vpack.c.bf16 %v4130_v30, %v4126_v28  ;;  %v1632_v30 = vmul.f32 %v4074_v2, %v4074_v2 }
 0x113   : > { %v4134_v32 = vpop.f32.mrf.mxu0  ;;  %v4138_v34 = vpop.f32.mrf.mxu1 }
 0x114   : > { %6084 = vst [vmem:[#allocation9_spill] sm:$0xff] %v4138_v34  ;;  %1405 = vst [vmem:[#allocation6 + $0x48] sm:$0xff] %v3578_v31 }
 0x115   : > { %v4140_v35 = vpop.f32.mrf.mxu0  ;;  %1437 = vst [vmem:[#allocation6 + $0x128] sm:$0xff] %v3610_v33  ;;  %v4142_v36 = vpop.f32.mrf.mxu1 }
 0x116   : > { %6085 = vst [vmem:[#allocation10_spill] sm:$0xff] %v4142_v36  ;;  %v3579_v37 = vpack.c.bf16 %v4140_v35, %v4134_v32  ;;  %v3611_v39 = vpack.c.bf16 %v4142_v36, %v4138_v34 }
 0x117   : > { %v4146_v38 = vpop.f32.mrf.mxu0  ;;  %v4150_v40 = vpop.f32.mrf.mxu1 }
 0x118   : > { %6086 = vst [vmem:[#allocation11_spill] sm:$0xff] %v4150_v40  ;;  %1406 = vst [vmem:[#allocation6 + $0x180] sm:$0xff] %v3579_v37 }
 0x119   : > { %v4152_v41 = vpop.f32.mrf.mxu0  ;;  %1438 = vst [vmem:[#allocation6 + $0x1a0] sm:$0xff] %v3611_v39  ;;  %v4154_v42 = vpop.f32.mrf.mxu1 }
 0x11a   : > { %6087 = vst [vmem:[#allocation12_spill] sm:$0xff] %v4154_v42  ;;  %v3580_v43 = vpack.c.bf16 %v4152_v41, %v4146_v38  ;;  %v3612_v45 = vpack.c.bf16 %v4154_v42, %v4150_v40  ;;  %v1532_v40 = vadd.f32 %v4056_v57, %v4044_v51 }
 0x11b   : > { %v4158_v44 = vpop.f32.mrf.mxu0  ;;  %v4162_v46 = vpop.f32.mrf.mxu1 }
 0x11c   : > { %6088 = vst [vmem:[#allocation13_spill] sm:$0xff] %v4162_v46  ;;  %1407 = vst [vmem:[#allocation6 + $0x110] sm:$0xff] %v3580_v43 }
 0x11d   : > { %v4164_v47 = vpop.f32.mrf.mxu0  ;;  %1439 = vst [vmem:[#allocation6 + $0x1f0] sm:$0xff] %v3612_v45  ;;  %v4166_v48 = vpop.f32.mrf.mxu1 }
 0x11e   : > { %6089 = vst [vmem:[#allocation14_spill] sm:$0xff] %v4166_v48  ;;  %v3581_v53 = vpack.c.bf16 %v4164_v47, %v4158_v44  ;;  %v3613_v59 = vpack.c.bf16 %v4166_v48, %v4162_v46  ;;  %v1463_v48 = vadd.f32 %v4052_v55, %v4040_v49 }
 0x11f   : > { %v4170_v54 = vpop.f32.mrf.mxu0  ;;  %v4174_v61 = vpop.f32.mrf.mxu1 }
 0x120   : > { %6090 = vst [vmem:[#allocation15_spill] sm:$0xff] %v4174_v61  ;;  %1408 = vst [vmem:[#allocation6 + $0x118] sm:$0xff] %v3581_v53 }
 0x121   : > { %v4176_v1 = vpop.f32.mrf.mxu0  ;;  %1440 = vst [vmem:[#allocation6 + $0xe8] sm:$0xff] %v3613_v59  ;;  %v4178_v3 = vpop.f32.mrf.mxu1 }
 0x122   : > { %6091 = vst [vmem:[#allocation16_spill] sm:$0xff] %v4178_v3  ;;  %v3582_v7 = vpack.c.bf16 %v4176_v1, %v4170_v54  ;;  %v3614_v13 = vpack.c.bf16 %v4178_v3, %v4174_v61 }
 0x123   : > { %v4182_v9 = vpop.f32.mrf.mxu0  ;;  %v4186_v15 = vpop.f32.mrf.mxu1 }
 0x124   : > { %6092 = vst [vmem:[#allocation17_spill] sm:$0xff] %v4186_v15  ;;  %1409 = vst [vmem:[#allocation6 + $0x98] sm:$0xff] %v3582_v7 }
 0x125   : > { %v4188_v19 = vpop.f32.mrf.mxu0  ;;  %1441 = vst [vmem:[#allocation6 + $0x78] sm:$0xff] %v3614_v13  ;;  %v4190_v21 = vpop.f32.mrf.mxu1 }
 0x126   : > { %6093 = vst [vmem:[#allocation18_spill] sm:$0xff] %v4190_v21  ;;  %v3583_v25 = vpack.c.bf16 %v4188_v19, %v4182_v9  ;;  %v3615_v31 = vpack.c.bf16 %v4190_v21, %v4186_v15  ;;  %v1626_v15 = vmul.f32 %v4040_v49, %v4040_v49  ;;  %v1464_v49 = vadd.f32 %v1463_v48, %v4062_v60 }
 0x127   : > { %v4194_v27 = vpop.f32.mrf.mxu0  ;;  %v4198_v33 = vpop.f32.mrf.mxu1  ;;  %v1635_v48 = vmul.f32 %v4092_v11, %v4092_v11 }
 0x128   : > { %6094 = vst [vmem:[#allocation19_spill] sm:$0xff] %v4198_v33  ;;  %1410 = vst [vmem:[#allocation6 + $0x120] sm:$0xff] %v3583_v25 }
 0x129   : > { %v4200_v37 = vpop.f32.mrf.mxu0  ;;  %1442 = vst [vmem:[#allocation6 + $0x70] sm:$0xff] %v3615_v31  ;;  %v4202_v39 = vpop.f32.mrf.mxu1 }
 0x12a   : > { %6095 = vst [vmem:[#allocation20_spill] sm:$0xff] %v4202_v39  ;;  %v3584_v43 = vpack.c.bf16 %v4200_v37, %v4194_v27  ;;  %v3616_v53 = vpack.c.bf16 %v4202_v39, %v4198_v33  ;;  %v1628_v39 = vmul.f32 %v4052_v55, %v4052_v55  ;;  %v1633_v55 = vmul.f32 %v4080_v5, %v4080_v5 }
 0x12b   : > { %v4206_v45 = vpop.f32.mrf.mxu0  ;;  %v4210_v59 = vpop.f32.mrf.mxu1 }
 0x12c   : > { %6096 = vst [vmem:[#allocation21_spill] sm:$0xff] %v4210_v59  ;;  %1411 = vst [vmem:[#allocation6 + $0x150] sm:$0xff] %v3584_v43  ;;  %v1629_v43 = vmul.f32 %v4056_v57, %v4056_v57  ;;  %v1754_v36 = vadd.f32 %v1628_v39, %v1626_v15  ;;  %v1533_v15 = vadd.f32 %v1532_v40, %v4068_v63 }
 0x12d   : > { %v4212_v7 = vpop.f32.mrf.mxu0  ;;  %1443 = vst [vmem:[#allocation6 + $0x90] sm:$0xff] %v3616_v53  ;;  %v4214_v13 = vpop.f32.mrf.mxu1 }
 0x12e   : > { %6097 = vst [vmem:[#allocation22_spill] sm:$0xff] %v4214_v13  ;;  %v3585_v25 = vpack.c.bf16 %v4212_v7, %v4206_v45  ;;  %v3617_v21 = vpack.c.bf16 %v4214_v13, %v4210_v59  ;;  %v1630_v13 = vmul.f32 %v4062_v60, %v4062_v60  ;;  %v1465_v60 = vadd.f32 %v1464_v49, %v4074_v2 }
 0x12f   : > { %v4218_v31 = vpop.f32.mrf.mxu0  ;;  %v4222_v3 = vpop.f32.mrf.mxu1  ;;  %v1534_v40 = vadd.f32 %v1533_v15, %v4080_v5  ;;  %v1638_v5 = vmul.f32 %v4110_v20, %v4110_v20 }
 0x130   : > { %6098 = vst [vmem:[#allocation23_spill] sm:$0xff] %v4222_v3  ;;  %1412 = vst [vmem:[#allocation6 + $0x108] sm:$0xff] %v3585_v25  ;;  %v1627_v25 = vmul.f32 %v4044_v51, %v4044_v51  ;;  %v1634_v51 = vmul.f32 %v4086_v8, %v4086_v8  ;;  %v1466_v2 = vadd.f32 %v1465_v60, %v4086_v8 }
 0x131   : > { %v4228_v53 = vpop.f32.mrf.mxu0  ;;  %1444 = vst [vmem:[#allocation6 + $0x1d8] sm:$0xff] %v3617_v21  ;;  %v4230_v33 = vpop.f32.mrf.mxu1  ;;  %v1631_v21 = vmul.f32 %v4068_v63, %v4068_v63 }
 0x132   : > { %6099 = vst [vmem:[#allocation24_spill] sm:$0xff] %v4230_v33  ;;  %v3586_v59 = vpack.c.bf16 %v4228_v53, %v4218_v31  ;;  %v3618_v42 = vpack.c.bf16 %v4230_v33, %v4222_v3  ;;  %v1823_v34 = vadd.f32 %v1629_v43, %v1627_v25  ;;  %v1755_v3 = vadd.f32 %v1754_v36, %v1630_v13 }
 0x133   : > { %v4244_v61 = vpop.f32.mrf.mxu0  ;;  %v4248_v46 = vpop.f32.mrf.mxu1  ;;  %v1636_v13 = vmul.f32 %v4098_v14, %v4098_v14  ;;  %v1637_v43 = vmul.f32 %v4104_v17, %v4104_v17  ;;  %v1467_v8 = vadd.f32 %v1466_v2, %v4098_v14  ;;  %v1640_v14 = vmul.f32 %v4122_v26, %v4122_v26 }
 0x134   : > { %1413 = vst [vmem:[#allocation6 + $0x60] sm:$0xff] %v3586_v59  ;;  %1445 = vst [vmem:[#allocation6 + $0xd0] sm:$0xff] %v3618_v42  ;;  %v1824_v39 = vadd.f32 %v1823_v34, %v1631_v21  ;;  %v1756_v63 = vadd.f32 %v1755_v3, %v1632_v30  ;;  %v1535_v30 = vadd.f32 %v1534_v40, %v4092_v11 }
 0x135   : > { %v4257_v24 = vpop.f32.mrf.mxu0  ;;  %v4259_v33 = vpop.f32.mrf.mxu1  ;;  %v1639_v11 = vmul.f32 %v4116_v23, %v4116_v23 }
 0x136   : > { %v3587_v57 = vpack.c.bf16 %v4257_v24, %v4244_v61  ;;  %v3619_v42 = vpack.c.bf16 %v4259_v33, %v4248_v46  ;;  %v1825_v34 = vadd.f32 %v1824_v39, %v1633_v55  ;;  %v1757_v49 = vadd.f32 %v1756_v63, %v1634_v51 }
 0x137   : > { %v4269_v59 = vpop.f32.mrf.mxu0  ;;  %v4273_v36 = vpop.f32.mrf.mxu1  ;;  %v1536_v51 = vadd.f32 %v1535_v30, %v4104_v17  ;;  %v1468_v63 = vadd.f32 %v1467_v8, %v4110_v20  ;;  %v1641_v17 = vmul.f32 %v4128_v29, %v4128_v29  ;;  %v1642_v20 = vmul.f32 %v4134_v32, %v4134_v32 }
 0x138   : > { %1414 = vst [vmem:[#allocation6 + $0xe0] sm:$0xff] %v3587_v57  ;;  %1446 = vst [vmem:[#allocation6 + $0xb8] sm:$0xff] %v3619_v42  ;;  %v1826_v55 = vadd.f32 %v1825_v34, %v1635_v48  ;;  %v1758_v60 = vadd.f32 %v1757_v49, %v1636_v13  ;;  %v6047_v34 = vlaneseq  ;;  %v1643_v8 = vmul.f32 %v4140_v35, %v4140_v35 }
 0x139   : > { %v4281_v25 = vpop.f32.mrf.mxu0  ;;  %v4283_v21 = vpop.f32.mrf.mxu1  ;;  %v1537_v13 = vadd.f32 %v1536_v51, %v4116_v23 }
 0x13a   : > { %v3588_v3 = vpack.c.bf16 %v4281_v25, %v4269_v59  ;;  %v3620_v57 = vpack.c.bf16 %v4283_v21, %v4273_v36  ;;  %v1827_v42 = vadd.f32 %v1826_v55, %v1637_v43  ;;  %v1759_v2 = vadd.f32 %v1758_v60, %v1638_v5 }
 0x13b   : > { %v4291_v15 = vpop.f32.mrf.mxu0  ;;  %v4295_v39 = vpop.f32.mrf.mxu1  ;;  %vm4321_vm0 = vcmp.lt.s32.totalorder %v6047_v34, 256  ;;  %v6100_v5 = vmov 0  ;;  %v1469_v55 = vadd.f32 %v1468_v63, %v4122_v26  ;;  %v1538_v51 = vadd.f32 %v1537_v13, %v4128_v29 }
 0x13c   : > { %1415 = vst [vmem:[#allocation6 + $0x188] sm:$0xff] %v3588_v3  ;;  %1447 = vst [vmem:[#allocation6 + $0x88] sm:$0xff] %v3620_v57  ;;  %v6101_v5 = vsel %vm4321_vm0, 4294967295, %v6100_v5  ;;  %v1828_v23 = vadd.f32 %v1827_v42, %v1639_v11  ;;  %v3810_v57 = vmov 0.0   ;;  %v1760_v60 = vadd.f32 %v1759_v2, %v1640_v14 }
 0x13d   : > { %v4303_v48 = vpop.f32.mrf.mxu0  ;;  %v4305_v40 = vpop.f32.mrf.mxu1  ;;  %6102 = vst [vmem:[#allocation25_spill] sm:$0xff] %v6101_v5  ;;  %304 = vst.msk [vmem:[#allocation2] sm:$0x3] %vm4321_vm0, %v3810_v57  ;;  %v1644_v34 = vmul.f32 %v4146_v38, %v4146_v38  ;;  %v1470_v63 = vadd.f32 %v1469_v55, %v4134_v32  ;;  %v1539_v29 = vadd.f32 %v1538_v51, %v4140_v35 }
 0x13e   : > { %v3589_v43 = vpack.c.bf16 %v4303_v48, %v4291_v15  ;;  %v3621_v30 = vpack.c.bf16 %v4305_v40, %v4295_v39  ;;  %305 = vst.msk [vmem:[#allocation3] sm:$0x3] %vm4321_vm0, %v3810_v57  ;;  %v1829_v42 = vadd.f32 %v1828_v23, %v1641_v17  ;;  %v1761_v14 = vadd.f32 %v1760_v60, %v1642_v20 }
 0x13f   : > { %v4314_v49 = vpop.f32.mrf.mxu0  ;;  %v4318_v3 = vpop.f32.mrf.mxu1  ;;  %v1646_v2 = vmul.f32 %v4158_v44, %v4158_v44  ;;  %v1471_v23 = vadd.f32 %v1470_v63, %v4146_v38  ;;  %v1647_v55 = vmul.f32 %v4164_v47, %v4164_v47  ;;  %v1540_v35 = vadd.f32 %v1539_v29, %v4152_v41 }
 0x140   : > { %1416 = vst [vmem:[#allocation6 + $0x138] sm:$0xff] %v3589_v43  ;;  %1448 = vst [vmem:[#allocation6 + $0xa8] sm:$0xff] %v3621_v30  ;;  %v1645_v43 = vmul.f32 %v4152_v41, %v4152_v41  ;;  %v1830_v32 = vadd.f32 %v1829_v42, %v1643_v8  ;;  %v1762_v20 = vadd.f32 %v1761_v14, %v1644_v34 }
 0x141   : > { %v4335_v11 = vpop.f32.mrf.mxu0  ;;  %v4337_v26 = vpop.f32.mrf.mxu1  ;;  %v1648_v60 = vmul.f32 %v4170_v54, %v4170_v54  ;;  %v1472_v8 = vadd.f32 %v1471_v23, %v4158_v44  ;;  %v1649_v38 = vmul.f32 %v4176_v1, %v4176_v1  ;;  %v1541_v41 = vadd.f32 %v1540_v35, %v4164_v47 }
 0x142   : > { %6103 = vst [vmem:[#allocation26_spill] sm:$0xff] %v4337_v26  ;;  %v3590_v57 = vpack.c.bf16 %v4335_v11, %v4314_v49  ;;  %v3622_v30 = vpack.c.bf16 %v4337_v26, %v4318_v3  ;;  %v1831_v26 = vadd.f32 %v1830_v32, %v1645_v43  ;;  %v1763_v34 = vadd.f32 %v1762_v20, %v1646_v2 }
 0x143   : > { %v4347_v13 = vpop.f32.mrf.mxu0  ;;  %v4351_v17 = vpop.f32.mrf.mxu1  ;;  %v1650_v63 = vmul.f32 %v4182_v9, %v4182_v9  ;;  %v1473_v29 = vadd.f32 %v1472_v8, %v4170_v54  ;;  %v1542_v47 = vadd.f32 %v1541_v41, %v4176_v1  ;;  %v1652_v32 = vmul.f32 %v4194_v27, %v4194_v27 }
 0x144   : > { %1417 = vst [vmem:[#allocation6 + $0x140] sm:$0xff] %v3590_v57  ;;  %1449 = vst [vmem:[#allocation6 + $0x1c8] sm:$0xff] %v3622_v30  ;;  %v1832_v44 = vadd.f32 %v1831_v26, %v1647_v55  ;;  %v1651_v30 = vmul.f32 %v4188_v19, %v4188_v19  ;;  %v1764_v2 = vadd.f32 %v1763_v34, %v1648_v60 }
 0x145   : > { %v4359_v51 = vpop.f32.mrf.mxu0  ;;  %v4361_v5 = vpop.f32.mrf.mxu1  ;;  %v1474_v26 = vadd.f32 %v1473_v29, %v4182_v9  ;;  %v1653_v54 = vmul.f32 %v4200_v37, %v4200_v37  ;;  %v1543_v1 = vadd.f32 %v1542_v47, %v4188_v19  ;;  %v1654_v8 = vmul.f32 %v4206_v45, %v4206_v45 }
 0x146   : > { %v3591_v42 = vpack.c.bf16 %v4359_v51, %v4347_v13  ;;  %v3623_v14 = vpack.c.bf16 %v4361_v5, %v4351_v17  ;;  %v1833_v35 = vadd.f32 %v1832_v44, %v1649_v38  ;;  %v1765_v60 = vadd.f32 %v1764_v2, %v1650_v63 }
 0x147   : > { %v4371_v57 = vpop.f32.mrf.mxu0  ;;  %v4375_v43 = vpop.f32.mrf.mxu1  ;;  %v1475_v41 = vadd.f32 %v1474_v26, %v4194_v27  ;;  %v1544_v19 = vadd.f32 %v1543_v1, %v4200_v37  ;;  %v1656_v44 = vmul.f32 %v4218_v31, %v4218_v31  ;;  %v1657_v27 = vmul.f32 %v4228_v53, %v4228_v53 }
 0x148   : > { %1418 = vst [vmem:[#allocation6 + $0x80] sm:$0xff] %v3591_v42  ;;  %1450 = vst [vmem:[#allocation6 + $0x170] sm:$0xff] %v3623_v14  ;;  %v1834_v9 = vadd.f32 %v1833_v35, %v1651_v30  ;;  %v1655_v14 = vmul.f32 %v4212_v7, %v4212_v7  ;;  %v1766_v63 = vadd.f32 %v1765_v60, %v1652_v32 }
 0x149   : > { %v4383_v23 = vpop.f32.mrf.mxu0  ;;  %v4385_v20 = vpop.f32.mrf.mxu1  ;;  %v1476_v30 = vadd.f32 %v1475_v41, %v4206_v45  ;;  %v1545_v37 = vadd.f32 %v1544_v19, %v4212_v7  ;;  %v1658_v26 = vmul.f32 %v4244_v61, %v4244_v61 }
 0x14a   : > { %v3592_v55 = vpack.c.bf16 %v4383_v23, %v4371_v57  ;;  %v3624_v34 = vpack.c.bf16 %v4385_v20, %v4375_v43  ;;  %v1835_v47 = vadd.f32 %v1834_v9, %v1653_v54  ;;  %v1767_v32 = vadd.f32 %v1766_v63, %v1654_v8 }
 0x14b   : > { %v4395_v42 = vpop.f32.mrf.mxu0  ;;  %v4399_v38 = vpop.f32.mrf.mxu1  ;;  %v1477_v1 = vadd.f32 %v1476_v30, %v4218_v31  ;;  %v1546_v7 = vadd.f32 %v1545_v37, %v4228_v53  ;;  %v1660_v9 = vmul.f32 %v4269_v59, %v4269_v59  ;;  %v1661_v31 = vmul.f32 %v4281_v25, %v4281_v25 }
 0x14c   : > { %1419 = vst [vmem:[#allocation6 + $0x1a8] sm:$0xff] %v3592_v55  ;;  %1451 = vst [vmem:[#allocation6 + $0x178] sm:$0xff] %v3624_v34  ;;  %v1836_v45 = vadd.f32 %v1835_v47, %v1655_v14  ;;  %v1659_v34 = vmul.f32 %v4257_v24, %v4257_v24  ;;  %v1768_v8 = vadd.f32 %v1767_v32, %v1656_v44 }
 0x14d   : > { %v4407_v29 = vpop.f32.mrf.mxu0  ;;  %v4409_v2 = vpop.f32.mrf.mxu1  ;;  %v1478_v14 = vadd.f32 %v1477_v1, %v4244_v61  ;;  %v1662_v53 = vmul.f32 %v4291_v15, %v4291_v15 }
 0x14e   : > { %v3593_v35 = vpack.c.bf16 %v4407_v29, %v4395_v42  ;;  %v3625_v60 = vpack.c.bf16 %v4409_v2, %v4399_v38  ;;  %v1837_v19 = vadd.f32 %v1836_v45, %v1657_v27  ;;  %v1769_v44 = vadd.f32 %v1768_v8, %v1658_v26 }
 0x14f   : > { %v4419_v55 = vpop.f32.mrf.mxu0  ;;  %v4423_v54 = vpop.f32.mrf.mxu1  ;;  %v1547_v27 = vadd.f32 %v1546_v7, %v4257_v24  ;;  %v1479_v37 = vadd.f32 %v1478_v14, %v4269_v59  ;;  %v1663_v26 = vmul.f32 %v4303_v48, %v4303_v48  ;;  %v1664_v45 = vmul.f32 %v4314_v49, %v4314_v49 }
 0x150   : > { %6104 = vst [vmem:[#allocation27_spill] sm:$0xff] %v4423_v54  ;;  %1420 = vst [vmem:[#allocation6 + $0x1b8] sm:$0xff] %v3593_v35  ;;  %v1838_v61 = vadd.f32 %v1837_v19, %v1659_v34  ;;  %v1665_v7 = vmul.f32 %v4335_v11, %v4335_v11 }
 0x151   : > { %v4431_v41 = vpop.f32.mrf.mxu0  ;;  %1452 = vst [vmem:[#allocation6 + $0x68] sm:$0xff] %v3625_v60  ;;  %v4433_v63 = vpop.f32.mrf.mxu1  ;;  %v1770_v60 = vadd.f32 %v1769_v44, %v1660_v9  ;;  %v1480_v24 = vadd.f32 %v1479_v37, %v4291_v15  ;;  %v1666_v9 = vmul.f32 %v4347_v13, %v4347_v13 }
 0x152   : > { %6105 = vst [vmem:[#allocation28_spill] sm:$0xff] %v4433_v63  ;;  %v3594_v47 = vpack.c.bf16 %v4431_v41, %v4419_v55  ;;  %v3626_v35 = vpack.c.bf16 %v4433_v63, %v4423_v54  ;;  %v1548_v63 = vadd.f32 %v1547_v27, %v4281_v25  ;;  %v1839_v54 = vadd.f32 %v1838_v61, %v1661_v31 }
 0x153   : > { %v4442_v30 = vpop.f32.mrf.mxu0  ;;  %v4446_v32 = vpop.f32.mrf.mxu1  ;;  %v1771_v34 = vadd.f32 %v1770_v60, %v1662_v53  ;;  %v1481_v15 = vadd.f32 %v1480_v24, %v4314_v49  ;;  %v1667_v53 = vmul.f32 %v4359_v51, %v4359_v51 }
 0x154   : > { %1421 = vst [vmem:[#allocation6 + $0x28] sm:$0xff] %v3594_v47  ;;  %1453 = vst [vmem:[#allocation6 + $0x190] sm:$0xff] %v3626_v35  ;;  %v1549_v25 = vadd.f32 %v1548_v63, %v4303_v48  ;;  %v1840_v31 = vadd.f32 %v1839_v54, %v1663_v26  ;;  %v1668_v35 = vmul.f32 %v4371_v57, %v4371_v57 }
 0x155   : > { %v4454_v1 = vpop.f32.mrf.mxu0  ;;  %v4456_v8 = vpop.f32.mrf.mxu1  ;;  %v1772_v44 = vadd.f32 %v1771_v34, %v1664_v45  ;;  %v1482_v60 = vadd.f32 %v1481_v15, %v4347_v13  ;;  %v1670_v54 = vmul.f32 %v4395_v42, %v4395_v42 }
 0x156   : > { %v3595_v59 = vpack.c.bf16 %v4454_v1, %v4442_v30  ;;  %v3627_v14 = vpack.c.bf16 %v4456_v8, %v4446_v32  ;;  %v1550_v37 = vadd.f32 %v1549_v25, %v4335_v11  ;;  %v1841_v63 = vadd.f32 %v1840_v31, %v1665_v7 }
 0x157   : > { %v816_v19 = vpop.f32.mrf.mxu0  ;;  %v4468_v47 = vpop.f32.mrf.mxu1  ;;  %v1773_v49 = vadd.f32 %v1772_v44, %v1666_v9  ;;  %v1483_v34 = vadd.f32 %v1482_v60, %v4371_v57  ;;  %v1669_v11 = vmul.f32 %v4383_v23, %v4383_v23  ;;  %v1672_v9 = vmul.f32 %v4419_v55, %v4419_v55 }
 0x158   : > { %1422 = vst [vmem:[#allocation6 + $0x1e8] sm:$0xff] %v3595_v59  ;;  %1454 = vst [vmem:[#allocation6 + $0x198] sm:$0xff] %v3627_v14  ;;  %v1551_v59 = vadd.f32 %v1550_v37, %v4359_v51  ;;  %v1842_v13 = vadd.f32 %v1841_v63, %v1667_v53  ;;  %v1671_v51 = vmul.f32 %v4407_v29, %v4407_v29 }
 0x159   : > { %v818_v27 = vpop.f32.mrf.mxu0  ;;  %v4476_v61 = vpop.f32.mrf.mxu1  ;;  %v1774_v7 = vadd.f32 %v1773_v49, %v1668_v35  ;;  %v1484_v31 = vadd.f32 %v1483_v34, %v4395_v42  ;;  %v1674_v53 = vmul.f32 %v4442_v30, %v4442_v30  ;;  %v1673_v49 = vmul.f32 %v4431_v41, %v4431_v41 }
 0x15a   : > { %6106 = vst [vmem:[#allocation29_spill] sm:$0xff] %v4476_v61  ;;  %v3596_v48 = vpack.c.bf16 %v818_v27, %v816_v19  ;;  %v3628_v45 = vpack.c.bf16 %v4476_v61, %v4468_v47  ;;  %v1552_v15 = vadd.f32 %v1551_v59, %v4383_v23 }
 0x15b   : > { %v822_v26 = vpop.f32.mrf.mxu0  ;;  %v4484_v24 = vpop.f32.mrf.mxu1  ;;  %v1775_v44 = vadd.f32 %v1774_v7, %v1670_v54  ;;  %v1485_v23 = vadd.f32 %v1484_v31, %v4419_v55  ;;  %v1676_v54 = vmul.f32 %v816_v19, %v816_v19 }
 0x15c   : > { %6107 = vst [vmem:[#allocation30_spill] sm:$0xff] %v4484_v24  ;;  %1423 = vst [vmem:[#allocation6 + $0xf8] sm:$0xff] %v3596_v48  ;;  %v1843_v48 = vadd.f32 %v1842_v13, %v1669_v11  ;;  %v1553_v63 = vadd.f32 %v1552_v15, %v4407_v29  ;;  %v1675_v29 = vmul.f32 %v4454_v1, %v4454_v1 }
 0x15d   : > { %v824_v14 = vpop.f32.mrf.mxu0  ;;  %1455 = vst [vmem:[#allocation6 + $0x38] sm:$0xff] %v3628_v45  ;;  %v4492_v25 = vpop.f32.mrf.mxu1  ;;  %v1776_v42 = vadd.f32 %v1775_v44, %v1672_v9  ;;  %v1678_v55 = vmul.f32 %v822_v26, %v822_v26 }
 0x15e   : > { %6108 = vst [vmem:[#allocation31_spill] sm:$0xff] %v4492_v25  ;;  %v3597_v57 = vpack.c.bf16 %v824_v14, %v822_v26  ;;  %v3629_v37 = vpack.c.bf16 %v4492_v25, %v4484_v24  ;;  %v1844_v34 = vadd.f32 %v1843_v48, %v1671_v51  ;;  %v1554_v7 = vadd.f32 %v1553_v63, %v4431_v41 }
 0x15f   : > { %v826_v35 = vpop.f32.mrf.mxu0  ;;  %v4502_v60 = vpop.f32.mrf.mxu1  ;;  %v1486_v25 = vadd.f32 %v1485_v23, %v4442_v30  ;;  %v1777_v13 = vadd.f32 %v1776_v42, %v1674_v53 }
 0x160   : > { %6109 = vst [vmem:[#allocation32_spill] sm:$0xff] %v4502_v60  ;;  %1424 = vst [vmem:[#allocation6 + $0x160] sm:$0xff] %v3597_v57  ;;  %v1555_v57 = vadd.f32 %v1554_v7, %v4454_v1  ;;  %v1845_v51 = vadd.f32 %v1844_v34, %v1673_v49  ;;  %v1680_v30 = vmul.f32 %v826_v35, %v826_v35 }
 0x161   : > { %v828_v45 = vpop.f32.mrf.mxu0  ;;  %1456 = vst [vmem:[#allocation6 + $0xc0] sm:$0xff] %v3629_v37  ;;  %v4508_v59 = vpop.f32.mrf.mxu1  ;;  %v1487_v44 = vadd.f32 %v1486_v25, %v816_v19  ;;  %v1778_v41 = vadd.f32 %v1777_v13, %v1676_v54  ;;  %v1677_v37 = vmul.f32 %v818_v27, %v818_v27 }
 0x162   : > { %6110 = vst [vmem:[#allocation33_spill] sm:$0xff] %v4508_v59  ;;  %v3598_v11 = vpack.c.bf16 %v828_v45, %v826_v35  ;;  %v3630_v15 = vpack.c.bf16 %v4508_v59, %v4502_v60  ;;  %v1556_v63 = vadd.f32 %v1555_v57, %v818_v27  ;;  %v1846_v24 = vadd.f32 %v1845_v51, %v1675_v29 }
 0x163   : > { %v832_v9 = vpop.f32.mrf.mxu0  ;;  %v4516_v31 = vpop.f32.mrf.mxu1  ;;  %v1488_v23 = vadd.f32 %v1487_v44, %v822_v26  ;;  %v1779_v61 = vadd.f32 %v1778_v41, %v1678_v55  ;;  %v1679_v59 = vmul.f32 %v824_v14, %v824_v14 }
 0x164   : > { %1425 = vst [vmem:[#allocation6 + $0x30] sm:$0xff] %v3598_v11  ;;  %1457 = vst [vmem:[#allocation6 + $0x1c0] sm:$0xff] %v3630_v15  ;;  %v1557_v25 = vadd.f32 %v1556_v63, %v824_v14  ;;  %v1682_v54 = vmul.f32 %v832_v9, %v832_v9  ;;  %v1847_v34 = vadd.f32 %v1846_v24, %v1677_v37 }
 0x165   : > { %v834_v48 = vpop.f32.mrf.mxu0  ;;  %v4519_v53 = vpop.f32.mrf.mxu1  ;;  %v1489_v49 = vadd.f32 %v1488_v23, %v826_v35  ;;  %v1780_v7 = vadd.f32 %v1779_v61, %v1680_v30  ;;  %v1681_v11 = vmul.f32 %v828_v45, %v828_v45 }
 0x166   : > { %v3599_v42 = vpack.c.bf16 %v834_v48, %v832_v9  ;;  %v3631_v1 = vpack.c.bf16 %v4519_v53, %v4516_v31  ;;  %v1558_v26 = vadd.f32 %v1557_v25, %v828_v45  ;;  %v1848_v57 = vadd.f32 %v1847_v34, %v1679_v59 }
 0x167   : > { %v836_v60 = vpop.f32.mrf.mxu0  ;;  %v4523_v19 = vpop.f32.mrf.mxu1  ;;  %v1490_v29 = vadd.f32 %v1489_v49, %v832_v9  ;;  %v1683_v44 = vmul.f32 %v834_v48, %v834_v48  ;;  %v1781_v41 = vadd.f32 %v1780_v7, %v1682_v54 }
 0x168   : > { %1426 = vst [vmem:[#allocation6 + $0x1e0] sm:$0xff] %v3599_v42  ;;  %1458 = vst [vmem:[#allocation6 + $0x158] sm:$0xff] %v3631_v1  ;;  %v1684_v55 = vmul.f32 %v836_v60, %v836_v60  ;;  %v1559_v24 = vadd.f32 %v1558_v26, %v834_v48  ;;  %v1849_v30 = vadd.f32 %v1848_v57, %v1681_v11 }
 0x169   : > { %v838_v13 = vpop.f32.mrf.mxu0  ;;  %v4525_v27 = vpop.f32.mrf.mxu1  ;;  %v1491_v61 = vadd.f32 %v1490_v29, %v836_v60  ;;  %v1690_v29 = vmul.f32 %v4042_v50, %v4042_v50 }
 0x16a   : > { %v3600_v15 = vpack.c.bf16 %v838_v13, %v836_v60  ;;  %v3632_v14 = vpack.c.bf16 %v4525_v27, %v4523_v19  ;;  %v1685_v63 = vmul.f32 %v838_v13, %v838_v13  ;;  %v1782_v9 = vadd.f32 %v1781_v41, %v1684_v55 }
 0x16b   : > { %v842_v51 = vpop.f32.mrf.mxu0  ;;  %v4529_v35 = vpop.f32.mrf.mxu1  ;;  %v1560_v59 = vadd.f32 %v1559_v24, %v838_v13  ;;  %v1850_v25 = vadd.f32 %v1849_v30, %v1683_v44 }
 0x16c   : > { %1427 = vst [vmem:[#allocation6] sm:$0xff] %v3600_v15  ;;  %v1686_v37 = vmul.f32 %v842_v51, %v842_v51  ;;  %1459 = vst [vmem:[#allocation6 + $0x10] sm:$0xff] %v3632_v14  ;;  %v1492_v42 = vadd.f32 %v1491_v61, %v842_v51 }
 0x16d   : > { %v844_v23 = vpop.f32.mrf.mxu0  ;;  %v4531_v45 = vpop.f32.mrf.mxu1  ;;  %v1851_v55 = vadd.f32 %v1850_v25, %v1685_v63 }
 0x16e   : > { %v3601_v1 = vpack.c.bf16 %v844_v23, %v842_v51  ;;  %v1687_v49 = vmul.f32 %v844_v23, %v844_v23  ;;  %v3633_v54 = vpack.c.bf16 %v4531_v45, %v4529_v35  ;;  %v1783_v60 = vadd.f32 %v1782_v9, %v1686_v37 }
 0x16f   : > { %v846_v34 = vpop.f32.mrf.mxu0  ;;  %v4535_v48 = vpop.f32.mrf.mxu1  ;;  %v1561_v7 = vadd.f32 %v1560_v59, %v844_v23  ;;  %v1692_v37 = vmul.f32 %v4054_v56, %v4054_v56  ;;  %v1694_v59 = vmul.f32 %v4066_v62, %v4066_v62 }
 0x170   : > { %1428 = vst [vmem:[#allocation6 + $0xf0] sm:$0xff] %v3601_v1  ;;  %v1493_v11 = vadd.f32 %v1492_v42, %v846_v34  ;;  %v1688_v26 = vmul.f32 %v846_v34, %v846_v34  ;;  %1460 = vst [vmem:[#allocation6 + $0x58] sm:$0xff] %v3633_v54  ;;  %v1852_v41 = vadd.f32 %v1851_v55, %v1687_v49 }
 0x171   : > { %v848_v13 = vpop.f32.mrf.mxu0  ;;  %v4539_v15 = vpop.f32.mrf.mxu1  ;;  %v1697_v55 = vmul.f32 %v4082_v6, %v4082_v6 }
 0x172   : > { %v1494_v57 = vadd.f32 %v1493_v11, %v4042_v50  ;;  %v1784_v44 = vadd.f32 %v1783_v60, %v1688_v26  ;;  %v3602_v51 = vpack.c.bf16 %v848_v13, %v846_v34  ;;  %v1562_v14 = vadd.f32 %v1561_v7, %v848_v13 }
 0x173   : > { %v1689_v24 = vmul.f32 %v848_v13, %v848_v13  ;;  %v3634_v61 = vpack.c.bf16 %v4539_v15, %v4535_v48  ;;  %v1691_v50 = vmul.f32 %v4046_v52, %v4046_v52  ;;  %v1696_v34 = vmul.f32 %v4078_v4, %v4078_v4 }
 0x174   : > { %v1495_v30 = vadd.f32 %v1494_v57, %v4054_v56  ;;  %v1785_v63 = vadd.f32 %v1784_v44, %v1690_v29  ;;  %1429 = vst [vmem:[#allocation6 + $0x8] sm:$0xff] %v3602_v51  ;;  %v1563_v23 = vadd.f32 %v1562_v14, %v4046_v52  ;;  %v1693_v56 = vmul.f32 %v4058_v58, %v4058_v58 }
 0x175   : > { %v1853_v9 = vadd.f32 %v1852_v41, %v1689_v24  ;;  %1461 = vst [vmem:[#allocation6 + $0xa0] sm:$0xff] %v3634_v61  ;;  %v1695_v7 = vmul.f32 %v4070_v0, %v4070_v0  ;;  %v1699_v51 = vmul.f32 %v4094_v12, %v4094_v12  ;;  %v1701_v61 = vmul.f32 %v4106_v18, %v4106_v18 }
 0x176   : > { %v1496_v42 = vadd.f32 %v1495_v30, %v4066_v62  ;;  %v1786_v1 = vadd.f32 %v1785_v63, %v1692_v37  ;;  %v1564_v25 = vadd.f32 %v1563_v23, %v4058_v58  ;;  %v1698_v62 = vmul.f32 %v4090_v10, %v4090_v10 }
 0x177   : > { %v1854_v49 = vadd.f32 %v1853_v9, %v1691_v50 }
 0x178   : > { %v1497_v54 = vadd.f32 %v1496_v42, %v4078_v4  ;;  %v1787_v52 = vadd.f32 %v1786_v1, %v1694_v59  ;;  %v1565_v60 = vadd.f32 %v1564_v25, %v4070_v0  ;;  %v1700_v4 = vmul.f32 %v4102_v16, %v4102_v16  ;;  %v6113_v1 = vld [vmem:[#allocation8_spill] sm:$0xff] }
 0x179   : > { %v1855_v11 = vadd.f32 %v1854_v49, %v1693_v56  ;;  %v1705_v56 = vmul.f32 %v6113_v1, %v6113_v1 }
 0x17a   : > { %v1498_v26 = vadd.f32 %v1497_v54, %v4090_v10  ;;  %v1788_v29 = vadd.f32 %v1787_v52, %v1696_v34  ;;  %v1566_v58 = vadd.f32 %v1565_v60, %v4082_v6  ;;  %v1702_v10 = vmul.f32 %v4114_v22, %v4114_v22  ;;  %v6115_v54 = vld [vmem:[#allocation10_spill] sm:$0xff] }
 0x17b   : > { %v1856_v13 = vadd.f32 %v1855_v11, %v1695_v7  ;;  %v1707_v11 = vmul.f32 %v6115_v54, %v6115_v54 }
 0x17c   : > { %v1499_v57 = vadd.f32 %v1498_v26, %v4102_v16  ;;  %v1789_v44 = vadd.f32 %v1788_v29, %v1698_v62  ;;  %v1567_v0 = vadd.f32 %v1566_v58, %v4094_v12  ;;  %v1704_v16 = vmul.f32 %v4126_v28, %v4126_v28  ;;  %v6111_v12 = vld [vmem:[#allocation7_spill] sm:$0xff]  ;;  %v6116_v26 = vld [vmem:[#allocation13_spill] sm:$0xff] }
 0x17d   : > { %v1857_v14 = vadd.f32 %v1856_v13, %v1697_v55  ;;  %v1703_v50 = vmul.f32 %v6111_v12, %v6111_v12  ;;  %v1710_v29 = vmul.f32 %v6116_v26, %v6116_v26  ;;  %v6117_v13 = vld [vmem:[#allocation12_spill] sm:$0xff] }
 0x17e   : > { %v1500_v41 = vadd.f32 %v1499_v57, %v4114_v22  ;;  %v1790_v24 = vadd.f32 %v1789_v44, %v1700_v4  ;;  %v1568_v6 = vadd.f32 %v1567_v0, %v4106_v18  ;;  %v6112_v22 = vld [vmem:[#allocation9_spill] sm:$0xff]  ;;  %v1709_v57 = vmul.f32 %v6117_v13, %v6117_v13  ;;  %v6118_v0 = vld [vmem:[#allocation15_spill] sm:$0xff] }
 0x17f   : > { %v1858_v37 = vadd.f32 %v1857_v14, %v1699_v51  ;;  %v1706_v59 = vmul.f32 %v6112_v22, %v6112_v22  ;;  %v1712_v51 = vmul.f32 %v6118_v0, %v6118_v0 }
 0x180   : > { %v1501_v30 = vadd.f32 %v1500_v41, %v4126_v28  ;;  %v1791_v63 = vadd.f32 %v1790_v24, %v1702_v10  ;;  %v1569_v23 = vadd.f32 %v1568_v6, %v6111_v12  ;;  %v6114_v28 = vld [vmem:[#allocation11_spill] sm:$0xff]  ;;  %v6119_v41 = vld [vmem:[#allocation14_spill] sm:$0xff]  ;;  %v6121_v12 = vld [vmem:[#allocation16_spill] sm:$0xff] }
 0x181   : > { %v1859_v9 = vadd.f32 %v1858_v37, %v1701_v61  ;;  %v1708_v34 = vmul.f32 %v6114_v28, %v6114_v28  ;;  %v1711_v6 = vmul.f32 %v6119_v41, %v6119_v41  ;;  %v6120_v37 = vld [vmem:[#allocation17_spill] sm:$0xff] }
 0x182   : > { %v1792_v42 = vadd.f32 %v1791_v63, %v1704_v16  ;;  %v1570_v25 = vadd.f32 %v1569_v23, %v6113_v1  ;;  %v1502_v18 = vadd.f32 %v1501_v30, %v6112_v22  ;;  %v1714_v16 = vmul.f32 %v6120_v37, %v6120_v37  ;;  %v6122_v22 = vld [vmem:[#allocation19_spill] sm:$0xff] }
 0x183   : > { %v1860_v49 = vadd.f32 %v1859_v9, %v1703_v50  ;;  %v1713_v50 = vmul.f32 %v6121_v12, %v6121_v12 }
 0x184   : > { %v1571_v52 = vadd.f32 %v1570_v25, %v6115_v54  ;;  %v1503_v60 = vadd.f32 %v1502_v18, %v6114_v28  ;;  %v1793_v7 = vadd.f32 %v1792_v42, %v1706_v59  ;;  %v1716_v59 = vmul.f32 %v6122_v22, %v6122_v22  ;;  %v6123_v25 = vld [vmem:[#allocation18_spill] sm:$0xff]  ;;  %v6124_v28 = vld [vmem:[#allocation21_spill] sm:$0xff] }
 0x185   : > { %v1861_v62 = vadd.f32 %v1860_v49, %v1705_v56  ;;  %v1715_v56 = vmul.f32 %v6123_v25, %v6123_v25 }
 0x186   : > { %v1504_v58 = vadd.f32 %v1503_v60, %v6116_v26  ;;  %v1794_v55 = vadd.f32 %v1793_v7, %v1708_v34  ;;  %v1572_v4 = vadd.f32 %v1571_v52, %v6117_v13  ;;  %v1718_v34 = vmul.f32 %v6124_v28, %v6124_v28  ;;  %v6125_v60 = vld [vmem:[#allocation20_spill] sm:$0xff]  ;;  %v6126_v26 = vld [vmem:[#allocation23_spill] sm:$0xff]  ;;  %v6127_v13 = vld [vmem:[#allocation22_spill] sm:$0xff] }
 0x187   : > { %v1862_v44 = vadd.f32 %v1861_v62, %v1707_v11  ;;  %v1717_v11 = vmul.f32 %v6125_v60, %v6125_v60 }
 0x188   : > { %v1505_v14 = vadd.f32 %v1504_v58, %v6118_v0  ;;  %v1795_v10 = vadd.f32 %v1794_v55, %v1710_v29  ;;  %v1573_v24 = vadd.f32 %v1572_v4, %v6119_v41  ;;  %v1720_v29 = vmul.f32 %v6126_v26, %v6126_v26 }
 0x189   : > { %v1863_v61 = vadd.f32 %v1862_v44, %v1709_v57  ;;  %v1719_v57 = vmul.f32 %v6127_v13, %v6127_v13  ;;  %v1722_v0 = vmul.f32 %v4248_v46, %v4248_v46 }
 0x18a   : > { %v1506_v30 = vadd.f32 %v1505_v14, %v6120_v37  ;;  %v1796_v63 = vadd.f32 %v1795_v10, %v1712_v51  ;;  %v1574_v23 = vadd.f32 %v1573_v24, %v6121_v12  ;;  %v6128_v10 = vld [vmem:[#allocation24_spill] sm:$0xff]  ;;  %v1724_v37 = vmul.f32 %v4273_v36, %v4273_v36 }
 0x18b   : > { %v1864_v9 = vadd.f32 %v1863_v61, %v1711_v6  ;;  %v1721_v24 = vmul.f32 %v6128_v10, %v6128_v10 }
 0x18c   : > { %v1507_v42 = vadd.f32 %v1506_v30, %v6122_v22  ;;  %v1797_v1 = vadd.f32 %v1796_v63, %v1714_v16  ;;  %v1575_v18 = vadd.f32 %v1574_v23, %v6123_v25  ;;  %v1723_v63 = vmul.f32 %v4259_v33, %v4259_v33 }
 0x18d   : > { %v1865_v49 = vadd.f32 %v1864_v9, %v1713_v50  ;;  %v1726_v9 = vmul.f32 %v4295_v39, %v4295_v39  ;;  %v1725_v22 = vmul.f32 %v4283_v21, %v4283_v21 }
 0x18e   : > { %v1508_v54 = vadd.f32 %v1507_v42, %v6124_v28  ;;  %v1798_v52 = vadd.f32 %v1797_v1, %v1716_v59  ;;  %v1576_v7 = vadd.f32 %v1575_v18, %v6125_v60  ;;  %v1727_v18 = vmul.f32 %v4305_v40, %v4305_v40 }
 0x18f   : > { %v1866_v62 = vadd.f32 %v1865_v49, %v1715_v56  ;;  %v6129_v49 = vld [vmem:[#allocation26_spill] sm:$0xff] }
 0x190   : > { %v1509_v58 = vadd.f32 %v1508_v54, %v6126_v26  ;;  %v1799_v55 = vadd.f32 %v1798_v52, %v1718_v34  ;;  %v1577_v4 = vadd.f32 %v1576_v7, %v6127_v13  ;;  %v1729_v54 = vmul.f32 %v6129_v49, %v6129_v49 }
 0x191   : > { %v1867_v44 = vadd.f32 %v1866_v62, %v1717_v11  ;;  %v1731_v11 = vmul.f32 %v4361_v5, %v4361_v5 }
 0x192   : > { %v1510_v51 = vadd.f32 %v1509_v58, %v4248_v46  ;;  %v1800_v14 = vadd.f32 %v1799_v55, %v1720_v29  ;;  %v1578_v41 = vadd.f32 %v1577_v4, %v6128_v10  ;;  %v1734_v29 = vmul.f32 %v4399_v38, %v4399_v38 }
 0x193   : > { %v1868_v6 = vadd.f32 %v1867_v44, %v1719_v57  ;;  %v1733_v55 = vmul.f32 %v4385_v20, %v4385_v20 }
 0x194   : > { %v1511_v61 = vadd.f32 %v1510_v51, %v4273_v36  ;;  %v1801_v16 = vadd.f32 %v1800_v14, %v1722_v0  ;;  %v1579_v30 = vadd.f32 %v1578_v41, %v4259_v33  ;;  %v1728_v33 = vmul.f32 %v4318_v3, %v4318_v3  ;;  %v6131_v14 = vld [vmem:[#allocation28_spill] sm:$0xff] }
 0x195   : > { %v1869_v12 = vadd.f32 %v1868_v6, %v1721_v24  ;;  %v1735_v0 = vmul.f32 %v4409_v2, %v4409_v2  ;;  %v1737_v24 = vmul.f32 %v6131_v14, %v6131_v14 }
 0x196   : > { %v1802_v46 = vadd.f32 %v1801_v16, %v1724_v37  ;;  %v1580_v23 = vadd.f32 %v1579_v30, %v4283_v21  ;;  %v1512_v50 = vadd.f32 %v1511_v61, %v4295_v39  ;;  %v1730_v21 = vmul.f32 %v4351_v17, %v4351_v17 }
 0x197   : > { %v1870_v59 = vadd.f32 %v1869_v12, %v1723_v63  ;;  %v1739_v30 = vmul.f32 %v4456_v8, %v4456_v8  ;;  %v6132_v12 = vld [vmem:[#allocation29_spill] sm:$0xff] }
 0x198   : > { %v1803_v36 = vadd.f32 %v1802_v46, %v1726_v9  ;;  %v1581_v42 = vadd.f32 %v1580_v23, %v4305_v40  ;;  %v1513_v1 = vadd.f32 %v1512_v50, %v4318_v3  ;;  %v1732_v40 = vmul.f32 %v4375_v43, %v4375_v43 }
 0x199   : > { %v1871_v25 = vadd.f32 %v1870_v59, %v1725_v22  ;;  %v1741_v22 = vmul.f32 %v6132_v12, %v6132_v12 }
 0x19a   : > { %v1804_v56 = vadd.f32 %v1803_v36, %v1728_v33  ;;  %v1582_v28 = vadd.f32 %v1581_v42, %v6129_v49  ;;  %v1514_v39 = vadd.f32 %v1513_v1, %v4351_v17  ;;  %v6134_v36 = vld [vmem:[#allocation31_spill] sm:$0xff] }
 0x19b   : > { %v1872_v34 = vadd.f32 %v1871_v25, %v1727_v18  ;;  %v1743_v25 = vmul.f32 %v6134_v36, %v6134_v36 }
 0x19c   : > { %v1805_v52 = vadd.f32 %v1804_v56, %v1730_v21  ;;  %v1583_v60 = vadd.f32 %v1582_v28, %v4361_v5  ;;  %v1515_v3 = vadd.f32 %v1514_v39, %v4375_v43  ;;  %v6130_v43 = vld [vmem:[#allocation27_spill] sm:$0xff]  ;;  %v6136_v56 = vld [vmem:[#allocation33_spill] sm:$0xff]  ;;  %v1746_v39 = vmul.f32 %v4516_v31, %v4516_v31 }
 0x19d   : > { %v1873_v7 = vadd.f32 %v1872_v34, %v1729_v54  ;;  %v1736_v5 = vmul.f32 %v6130_v43, %v6130_v43  ;;  %v1745_v34 = vmul.f32 %v6136_v56, %v6136_v56 }
 0x19e   : > { %v1806_v62 = vadd.f32 %v1805_v52, %v1732_v40  ;;  %v1584_v26 = vadd.f32 %v1583_v60, %v4385_v20  ;;  %v1516_v17 = vadd.f32 %v1515_v3, %v4399_v38  ;;  %v1738_v20 = vmul.f32 %v4446_v32, %v4446_v32 }
 0x19f   : > { %v1874_v58 = vadd.f32 %v1873_v7, %v1731_v11  ;;  %v1748_v3 = vmul.f32 %v4523_v19, %v4523_v19  ;;  %v1747_v7 = vmul.f32 %v4519_v53, %v4519_v53 }
 0x1a0   : > { %v1807_v13 = vadd.f32 %v1806_v62, %v1734_v29  ;;  %v1585_v4 = vadd.f32 %v1584_v26, %v4409_v2  ;;  %v1517_v57 = vadd.f32 %v1516_v17, %v6130_v43  ;;  %v1740_v2 = vmul.f32 %v4468_v47, %v4468_v47 }
 0x1a1   : > { %v1875_v44 = vadd.f32 %v1874_v58, %v1733_v55  ;;  %v1750_v26 = vmul.f32 %v4529_v35, %v4529_v35  ;;  %v1749_v29 = vmul.f32 %v4525_v27, %v4525_v27 }
 0x1a2   : > { %v1808_v51 = vadd.f32 %v1807_v13, %v1736_v5  ;;  %v1586_v10 = vadd.f32 %v1585_v4, %v6131_v14  ;;  %v1518_v38 = vadd.f32 %v1517_v57, %v4446_v32  ;;  %v6133_v32 = vld [vmem:[#allocation30_spill] sm:$0xff]  ;;  %v1751_v4 = vmul.f32 %v4531_v45, %v4531_v45 }
 0x1a3   : > { %v1876_v41 = vadd.f32 %v1875_v44, %v1735_v0  ;;  %v1742_v50 = vmul.f32 %v6133_v32, %v6133_v32 }
 0x1a4   : > { %v1809_v6 = vadd.f32 %v1808_v51, %v1738_v20  ;;  %v1587_v61 = vadd.f32 %v1586_v10, %v4456_v8  ;;  %v1519_v37 = vadd.f32 %v1518_v38, %v4468_v47  ;;  %v6135_v47 = vld [vmem:[#allocation32_spill] sm:$0xff] }
 0x1a5   : > { %v1877_v16 = vadd.f32 %v1876_v41, %v1737_v24  ;;  %v1744_v8 = vmul.f32 %v6135_v47, %v6135_v47 }
 0x1a6   : > { %v1810_v63 = vadd.f32 %v1809_v6, %v1740_v2  ;;  %v1588_v46 = vadd.f32 %v1587_v61, %v6132_v12  ;;  %v1520_v23 = vadd.f32 %v1519_v37, %v6133_v32  ;;  %v6137_v37 = vlaneseq }
 0x1a7   : > { %v1878_v9 = vadd.f32 %v1877_v16, %v1739_v30 }
 0x1a8   : > { %v1811_v59 = vadd.f32 %v1810_v63, %v1742_v50  ;;  %v1589_v42 = vadd.f32 %v1588_v46, %v6134_v36  ;;  %v1521_v1 = vadd.f32 %v1520_v23, %v6135_v47  ;;  %v1608_v2 = vshrl.u32 %v6137_v37, 7 }
 0x1a9   : > { %v1879_v33 = vadd.f32 %v1878_v9, %v1741_v22 }
 0x1aa   : > { %v1812_v18 = vadd.f32 %v1811_v59, %v1744_v8  ;;  %v1590_v49 = vadd.f32 %v1589_v42, %v6136_v56  ;;  %v1522_v28 = vadd.f32 %v1521_v1, %v4516_v31 }
 0x1ab   : > { %v1880_v21 = vadd.f32 %v1879_v33, %v1743_v25  ;;  %v1462_v33 = vld [vmem:[#allocation2] sm:$0x3] }
 0x1ac   : > { %v1813_v54 = vadd.f32 %v1812_v18, %v1746_v39  ;;  %v1591_v52 = vadd.f32 %v1590_v49, %v4519_v53  ;;  %v1523_v60 = vadd.f32 %v1522_v28, %v4523_v19  ;;  %v1752_v53 = vmul.f32 %v4535_v48, %v4535_v48  ;;  %v1625_v28 = vld [vmem:[#allocation3] sm:$0x3] }
 0x1ad   : > { %v1881_v40 = vadd.f32 %v1880_v21, %v1745_v34 }
 0x1ae   : > { %v1814_v11 = vadd.f32 %v1813_v54, %v1748_v3  ;;  %v1592_v62 = vadd.f32 %v1591_v52, %v4525_v27  ;;  %v1524_v31 = vadd.f32 %v1523_v60, %v4529_v35  ;;  %v1753_v27 = vmul.f32 %v4539_v15, %v4539_v15 }
 0x1af   : > { %v1882_v17 = vadd.f32 %v1881_v40, %v1747_v7 }
 0x1b0   : > { %v1815_v58 = vadd.f32 %v1814_v11, %v1750_v26  ;;  %v1593_v55 = vadd.f32 %v1592_v62, %v4531_v45  ;;  %v1525_v19 = vadd.f32 %v1524_v31, %v4535_v48  ;;  %v3811_v48 = vmov 1966171168  }
 0x1b1   : > { %v1883_v13 = vadd.f32 %v1882_v17, %v1749_v29  ;;  %v1605_v41 = vunpack.c.l.s4 %v3811_v48 }
 0x1b2   : > { %v1526_v43 = vrot.slane %v1525_v19, 4  ;;  %v1816_v57 = vadd.f32 %v1815_v58, %v1752_v53  ;;  %v1594_v35 = vadd.f32 %v1593_v55, %v4539_v15 }
 0x1b3   : > { %v1884_v5 = vadd.f32 %v1883_v13, %v1751_v4  ;;  %v1606_v15 = vunpack.c.0.s8 %v1605_v41 }
 0x1b4   : > { %v1527_v44 = vadd.f32 %v1526_v43, %v1525_v19  ;;  %v1817_v0 = vrot.slane %v1816_v57, 4  ;;  %v1595_v51 = vrot.slane %v1594_v35, 4 }
 0x1b5   : > { %v1885_v14 = vadd.f32 %v1884_v5, %v1753_v27  ;;  %v1609_v59 = vsub.s32 %v1606_v15, %v1608_v2 }
 0x1b6   : > { %v1528_v10 = vrot.slane %v1527_v44, 2  ;;  %v1818_v38 = vadd.f32 %v1817_v0, %v1816_v57  ;;  %v1596_v20 = vadd.f32 %v1595_v51, %v1594_v35 }
 0x1b7   : > { %v1886_v24 = vrot.slane %v1885_v14, 4 }
 0x1b8   : > { %v1529_v6 = vadd.f32 %v1528_v10, %v1527_v44  ;;  %v1819_v45 = vrot.slane %v1818_v38, 2  ;;  %v1597_v61 = vrot.slane %v1596_v20, 2 }
 0x1b9   : > { %v1887_v16 = vadd.f32 %v1886_v24, %v1885_v14 }
 0x1ba   : > { %v1530_v30 = vrot.slane %v1529_v6, 1  ;;  %v1820_v63 = vadd.f32 %v1819_v45, %v1818_v38  ;;  %v1598_v12 = vadd.f32 %v1597_v61, %v1596_v20 }
 0x1bb   : > { %v1888_v46 = vrot.slane %v1887_v16, 2 }
 0x1bc   : > { %v1599_v32 = vrot.slane %v1598_v12, 1  ;;  %v1821_v23 = vrot.slane %v1820_v63, 1  ;;  %v1531_v9 = vadd.f32 %v1530_v30, %v1529_v6 }
 0x1bd   : > { %v1889_v50 = vadd.f32 %v1888_v46, %v1887_v16 }
 0x1be   : > { %v1600_v22 = vadd.f32 %v1599_v32, %v1598_v12  ;;  %v1822_v47 = vadd.f32 %v1821_v23, %v1820_v63 }
 0x1bf   : > { %v1890_v36 = vrot.slane %v1889_v50, 1 }
 0x1c0   : > { %v1603_v42 = vcombine.low %v1531_v9, %v1600_v22 }
 0x1c1   : > { %v1891_v1 = vadd.f32 %v1890_v36, %v1889_v50 }
 0x1c2   : > { %v1610_v8 = vrot.slane %v1603_v42, %v1609_v59 }
 0x1c3   : > { %v1894_v25 = vcombine.low %v1822_v47, %v1891_v1 }
 0x1c4   : > { %v1617_v18 = vrot.slane %v1610_v8, %v1609_v59 }
 0x1c5   : > { %v1901_v56 = vrot.slane %v1894_v25, %v1609_v59 }
 0x1c6   : > { %v1619_v49 = vadd.f32 %v1617_v18, %v1462_v33 }
 0x1c7   : > { %v1908_v39 = vrot.slane %v1901_v56, %v1609_v59 }
 0x1c8   : > { %1624 = vst.msk [vmem:[#allocation2] sm:$0x3] %vm4321_vm0, %v1619_v49 }
 0x1c9   : > { %v1910_v34 = vadd.f32 %v1908_v39, %v1625_v28 }
 0x1cb   : > { %1911 = vst.msk [vmem:[#allocation3] sm:$0x3] %vm4321_vm0, %v1910_v34 }
 0x1cc PF: > { %p3549_p5 = scmp.ne.s32.totalorder %s3799_s18, 1 }
 0x1ce   : > { %1915 = sbr.rel (%p3549_p5) target bundleno = 899 (0x383), region = 52 }
 0x1d3   : > { %v3767_v54 = vld [vmem:[%s6009_s4 + $0x38] sm:$0xff]   ;;  %v3812_v52 = vmov 0   ;;  %v3768_v60 = vld [vmem:[%s6009_s4 + $0x30] sm:$0xff]   ;;  %v3769_v3 = vld [vmem:[%s6009_s4 + $0x28] sm:$0xff]   ;;  %v1931_v4 = vlaneseq }
 0x1d4   : > { %2992 = vmatprep.subr.bf16.mxu0 %v3812_v52  ;;  %3651 = vmatprep.subr.bf16.mxu1 %v3812_v52  ;;  %v3770_v40 = vld [vmem:[%s6009_s4 + $0x20] sm:$0xff]   ;;  %v3771_v7 = vld [vmem:[%s6009_s4 + $0x18] sm:$0xff]   ;;  %v3772_v17 = vld [vmem:[%s6009_s4 + $0x10] sm:$0xff]  }
 0x1d5   : > { %2993 = vmatpush1.bf16.msra.mxu0 %v3767_v54  ;;  %3667 = vmatpush1.bf16.msra.mxu1 %v3767_v54  ;;  %v1920_v11 = vld [vmem:[#allocation2] sm:$0x3]  ;;  %v1922_v62 = vld [vmem:[#allocation3] sm:$0x3]  ;;  %v3773_v55 = vld [vmem:[%s6009_s4 + $0x8] sm:$0xff]   ;;  %v4783_v43 = vshrl.u32 %v1931_v4, 7 }
 0x1d6   : > { %2994 = vmatprep.subr.bf16.mxu0 %v3812_v52  ;;  %3652 = vmatprep.subr.bf16.mxu1 %v3812_v52  ;;  %v4764_v31 = vmul.f32 0.0022222223, %v1920_v11  ;;  %v1923_v26 = vmul.f32 0.0022222223, %v1922_v62  ;;  %v3774_v13 = vld [vmem:[%s6009_s4] sm:$0xff]   ;;  %v3775_v57 = vld [vmem:[%s6009_s4 + $0x78] sm:$0xff]  }
 0x1d7   : > { %v4790_v35 = vld [vmem:[#allocation6 + $0xb0] sm:$0xff]  ;;  %v4794_v27 = vld [vmem:[#allocation6 + $0x148] sm:$0xff]  ;;  %vm4798_vm1 = vcmp.lt.s32.totalorder %v1931_v4, 256  ;;  %v2140_v51 = vsub.s32 0, %v4783_v43  ;;  %v4803_v14 = vld [vmem:[#allocation6 + $0xd8] sm:$0xff]  ;;  %v2144_v24 = vsub.s32 1, %v4783_v43 }
 0x1d8   : > { %v1924_v29 = vmul.f32 %v4764_v31, %v4764_v31  ;;  %v4792_v5 = vld [vmem:[#allocation6 + $0x1b0] sm:$0xff]  ;;  %v4805_v10 = vld [vmem:[#allocation6 + $0x18] sm:$0xff]  ;;  %v3776_v38 = vld [vmem:[%s6009_s4 + $0x70] sm:$0xff]   ;;  %v2008_v20 = vunpack.c.l.bf16 %v4790_v35  ;;  %v2009_v48 = vunpack.c.h.bf16 %v4790_v35  ;;  %v2072_v37 = vunpack.c.l.bf16 %v4794_v27 }
 0x1d9   : > { %2995 = vmatpush1.bf16.msra.mxu0 %v3768_v60  ;;  %3668 = vmatpush1.bf16.msra.mxu1 %v3768_v60  ;;  %v4796_v44 = vld [vmem:[#allocation6 + $0x1d0] sm:$0xff]  ;;  %v2010_v41 = vunpack.c.l.bf16 %v4792_v5  ;;  %v4814_v6 = vld [vmem:[#allocation6 + $0x100] sm:$0xff]  ;;  %v4816_v45 = vld [vmem:[#allocation6 + $0xc8] sm:$0xff]  ;;  %v2011_v61 = vunpack.c.h.bf16 %v4792_v5  ;;  %v2073_v2 = vunpack.c.h.bf16 %v4794_v27  ;;  %v2013_v15 = vunpack.c.h.bf16 %v4803_v14 }
 0x1da   : > { %2996 = vmatprep.subr.bf16.mxu0 %v3812_v52  ;;  %3653 = vmatprep.subr.bf16.mxu1 %v3812_v52  ;;  %v1925_v58 = vsub.f32 %v1923_v26, %v1924_v29  ;;  %v2074_v16 = vunpack.c.l.bf16 %v4796_v44  ;;  %v4824_v30 = vld [vmem:[#allocation6 + $0x50] sm:$0xff]  ;;  %v4826_v63 = vld [vmem:[#allocation6 + $0x168] sm:$0xff]  ;;  %v2075_v12 = vunpack.c.h.bf16 %v4796_v44  ;;  %v2015_v46 = vunpack.c.h.bf16 %v4805_v10  ;;  %v4832_v23 = vld [vmem:[#allocation6 + $0x40] sm:$0xff] }
 0x1db   : > { %v4834_v50 = vld [vmem:[#allocation6 + $0x1f8] sm:$0xff]  ;;  %v3777_v9 = vld [vmem:[%s6009_s4 + $0x68] sm:$0xff]   ;;  %v2077_v22 = vunpack.c.h.bf16 %v4814_v6  ;;  %v2079_v59 = vunpack.c.h.bf16 %v4816_v45  ;;  %v4843_v47 = vld [vmem:[#allocation6 + $0x130] sm:$0xff] }
 0x1dc   : > { %v1926_v19 = vmax.f32 %v1925_v58, 0.0  ;;  %v4845_v1 = vld [vmem:[#allocation6 + $0x48] sm:$0xff]  ;;  %v1929_v8 = vld [vmem:[%s6007_s2] ss:$2 sm:$0x3]  ;;  %v4854_v49 = vld [vmem:[#allocation6 + $0x20] sm:$0xff] }
 0x1dd   : > { %2997 = vmatpush1.bf16.msra.mxu0 %v3769_v3  ;;  %3669 = vmatpush1.bf16.msra.mxu1 %v3769_v3  ;;  %v4856_v28 = vld [vmem:[#allocation6 + $0x128] sm:$0xff]  ;;  %v4864_v60 = vld [vmem:[#allocation6 + $0x180] sm:$0xff]  ;;  %v4866_v3 = vld [vmem:[#allocation6 + $0x110] sm:$0xff] }
 0x1de   : > { %2998 = vmatprep.subr.bf16.mxu0 %v3812_v52  ;;  %3654 = vmatprep.subr.bf16.mxu1 %v3812_v52  ;;  %v1927_v53 = vadd.f32 1e-05, %v1926_v19  ;;  %v3778_v4 = vld [vmem:[%s6009_s4 + $0x60] sm:$0xff]   ;;  %v4909_v54 = vld [vmem:[#allocation6 + $0x120] sm:$0xff]  ;;  %v4918_v58 = vld [vmem:[#allocation6 + $0x90] sm:$0xff] }
 0x1df   : > { %v4891_v26 = vld [vmem:[#allocation6 + $0x98] sm:$0xff]  ;;  %v4941_v11 = vld [vmem:[#allocation6 + $0xd0] sm:$0xff]  ;;  %v4958_v25 = vld [vmem:[#allocation6 + $0xe0] sm:$0xff] }
 0x1e0   : > { %3783 = vrsqrt.f32 %v1927_v53  ;;  %v4877_v53 = vld [vmem:[#allocation6 + $0x1f0] sm:$0xff]  ;;  %v4903_v19 = vld [vmem:[#allocation6 + $0x78] sm:$0xff]  ;;  %6143 = vst [vmem:[#allocation36_spill] sm:$0xff] %v4941_v11  ;;  %6144 = vst [vmem:[#allocation37_spill] sm:$0xff] %v4958_v25 }
 0x1e1   : > { %2999 = vmatpush1.bf16.msra.mxu0 %v3770_v40  ;;  %3670 = vmatpush1.bf16.msra.mxu1 %v3770_v40  ;;  %v4960_v62 = vld [vmem:[#allocation6 + $0x188] sm:$0xff]  ;;  %v4974_v34 = vld [vmem:[#allocation6 + $0xb8] sm:$0xff]  ;;  %v3781_v42 = vld [vmem:[%s6009_s4 + $0x48] sm:$0xff]  }
 0x1e2   : > { %3000 = vmatprep.subr.bf16.mxu0 %v3812_v52  ;;  %3655 = vmatprep.subr.bf16.mxu1 %v3812_v52  ;;  %6145 = vst [vmem:[#allocation38_spill] sm:$0xff] %v4960_v62  ;;  %6146 = vst [vmem:[#allocation39_spill] sm:$0xff] %v4974_v34  ;;  %v4976_v39 = vld [vmem:[#allocation6 + $0x88] sm:$0xff]  ;;  %v2417_v5 = vld [vmem:[%s6006_s1 + $0x8] sm:$0xff] }
 0x1e3   : > { %6147 = vst [vmem:[#allocation40_spill] sm:$0xff] %v4976_v39  ;;  %v2481_v43 = vld [vmem:[%s6006_s1 + $0x208] sm:$0xff]  ;;  %v2480_v36 = vld [vmem:[%s6006_s1 + $0x200] sm:$0xff] }
 0x1e5   : > { %3001 = vmatpush1.bf16.msra.mxu0 %v3771_v7  ;;  %3671 = vmatpush1.bf16.msra.mxu1 %v3771_v7  ;;  %v3779_v7 = vld [vmem:[%s6009_s4 + $0x58] sm:$0xff]  }
 0x1e6   : > { %3002 = vmatprep.subr.bf16.mxu0 %v3812_v52  ;;  %3656 = vmatprep.subr.bf16.mxu1 %v3812_v52 }
 0x1e9   : > { %3003 = vmatpush1.bf16.msra.mxu0 %v3772_v17  ;;  %3672 = vmatpush1.bf16.msra.mxu1 %v3772_v17  ;;  %v4872_v17 = vld [vmem:[#allocation6 + $0x1a0] sm:$0xff] }
 0x1ea   : > { %3004 = vmatprep.subr.bf16.mxu0 %v3812_v52  ;;  %3657 = vmatprep.subr.bf16.mxu1 %v3812_v52 }
 0x1ed   : > { %3005 = vmatpush1.bf16.msra.mxu0 %v3773_v55  ;;  %3673 = vmatpush1.bf16.msra.mxu1 %v3773_v55  ;;  %v3784_v40 = vpop.eup %3783  ;;  %v4929_v55 = vld [vmem:[#allocation6 + $0x60] sm:$0xff] }
 0x1ee   : > { %3006 = vmatprep.subr.bf16.mxu0 %v3812_v52  ;;  %3658 = vmatprep.subr.bf16.mxu1 %v3812_v52  ;;  %v1930_v29 = vmul.f32 %v3784_v40, %v1929_v8  ;;  %v4901_v40 = vld [vmem:[#allocation6 + $0xe8] sm:$0xff]  ;;  %6141 = vst [vmem:[#allocation34_spill] sm:$0xff] %v4929_v55 }
 0x1ef   : > { %v4927_v8 = vld [vmem:[#allocation6 + $0x108] sm:$0xff] }
 0x1f0   : > { %1935 = vst.msk [vmem:[#allocation4] sm:$0x3] %vm4798_vm1, %v1930_v29 }
 0x1f1   : > { %3007 = vmatpush1.bf16.msra.mxu0 %v3774_v13  ;;  %3674 = vmatpush1.bf16.msra.mxu1 %v3774_v13  ;;  %v4879_v13 = vld [vmem:[#allocation6 + $0x118] sm:$0xff] }
 0x1f2   : > { %3008 = vmatprep.subr.bf16.mxu0 %v3812_v52  ;;  %3659 = vmatprep.subr.bf16.mxu1 %v3812_v52 }
 0x1f5   : > { %3009 = vmatpush2.bf16.msra.mxu0 %v3775_v57  ;;  %3675 = vmatpush2.bf16.msra.mxu1 %v3775_v57  ;;  %v3550_v57 = vld [vmem:[%s6007_s2 + $0x1] ss:$2 sm:$0x3] }
 0x1f6   : > { %3010 = vmatprep.subr.bf16.mxu0 %v3812_v52  ;;  %3660 = vmatprep.subr.bf16.mxu1 %v3812_v52 }
 0x1f7   : > { %v2136_v56 = vld [vmem:[#allocation4] sm:$0x3] }
 0x1f9   : > { %3011 = vmatpush2.bf16.msra.mxu0 %v3776_v38  ;;  %3676 = vmatpush2.bf16.msra.mxu1 %v3776_v38 }
 0x1fa   : > { %3012 = vmatprep.subr.bf16.mxu0 %v3812_v52  ;;  %3661 = vmatprep.subr.bf16.mxu1 %v3812_v52 }
 0x1fd   : > { %3013 = vmatpush2.bf16.msra.mxu0 %v3777_v9  ;;  %3677 = vmatpush2.bf16.msra.mxu1 %v3777_v9  ;;  %v1938_v9 = vmul.f32 %v1930_v29, %v4764_v31  ;;  %v4911_v31 = vld [vmem:[#allocation6 + $0x150] sm:$0xff] }
 0x1fe   : > { %3014 = vmatprep.subr.bf16.mxu0 %v3812_v52  ;;  %3662 = vmatprep.subr.bf16.mxu1 %v3812_v52  ;;  %v4913_v29 = vld [vmem:[#allocation6 + $0x70] sm:$0xff] }
 0x1ff   : > { %v1939_v38 = vsub.f32 %v3550_v57, %v1938_v9  ;;  %v4939_v9 = vld [vmem:[#allocation6 + $0x1d8] sm:$0xff] }
 0x200   : > { %6142 = vst [vmem:[#allocation35_spill] sm:$0xff] %v4939_v9 }
 0x201   : > { %3015 = vmatpush2.bf16.msra.mxu0 %v3778_v4  ;;  %3678 = vmatpush2.bf16.msra.mxu1 %v3778_v4  ;;  %1940 = vst.msk [vmem:[#allocation5] sm:$0x3] %vm4798_vm1, %v1939_v38  ;;  %v3780_v38 = vld [vmem:[%s6009_s4 + $0x50] sm:$0xff]   ;;  %v4970_v4 = vrot.slane %v2136_v56, %v2144_v24 }
 0x202   : > { %3016 = vmatprep.subr.bf16.mxu0 %v3812_v52  ;;  %3663 = vmatprep.subr.bf16.mxu1 %v3812_v52 }
 0x203   : > { %v2151_v18 = vmul.f32 %v4970_v4, %v2011_v61  ;;  %v2213_v0 = vmul.f32 %v4970_v4, %v2073_v2  ;;  %v2215_v57 = vmul.f32 %v4970_v4, %v2075_v12  ;;  %v2155_v44 = vmul.f32 %v4970_v4, %v2015_v46  ;;  %v2483_v46 = vld [vmem:[%s6006_s1 + $0x218] sm:$0xff] }
 0x205   : > { %3017 = vmatpush2.bf16.msra.mxu0 %v3779_v7  ;;  %3679 = vmatpush2.bf16.msra.mxu1 %v3779_v7  ;;  %v4966_v7 = vrot.slane %v2136_v56, %v2140_v51  ;;  %v2149_v56 = vmul.f32 %v4970_v4, %v2009_v48 }
 0x206   : > { %3018 = vmatprep.subr.bf16.mxu0 %v3812_v52  ;;  %3664 = vmatprep.subr.bf16.mxu1 %v3812_v52 }
 0x207   : > { %v2148_v48 = vmul.f32 %v4966_v7, %v2008_v20  ;;  %v2150_v61 = vmul.f32 %v4966_v7, %v2010_v41  ;;  %v2212_v2 = vmul.f32 %v4966_v7, %v2072_v37  ;;  %v2214_v27 = vmul.f32 %v4966_v7, %v2074_v16  ;;  %v5024_v41 = vld [vmem:[#allocation6 + $0x138] sm:$0xff] }
 0x208   : > { %v2276_v33 = vld [vmem:[#allocation5] sm:$0x3]  ;;  %6148 = vst [vmem:[#allocation41_spill] sm:$0xff] %v5024_v41  ;;  %v2217_v37 = vmul.f32 %v4970_v4, %v2077_v22  ;;  %v2219_v16 = vmul.f32 %v4970_v4, %v2079_v59  ;;  %v2418_v59 = vld [vmem:[%s6006_s1 + $0x10] sm:$0xff] }
 0x209   : > { %3019 = vmatpush2.bf16.msra.mxu0 %v3780_v38  ;;  %3680 = vmatpush2.bf16.msra.mxu1 %v3780_v38  ;;  %v5011_v38 = vrot.slane %v2276_v33, %v2140_v51  ;;  %v5015_v35 = vrot.slane %v2276_v33, %v2144_v24  ;;  %v2419_v51 = vld [vmem:[%s6006_s1 + $0x18] sm:$0xff]  ;;  %v2153_v24 = vmul.f32 %v4970_v4, %v2013_v15  ;;  %v5044_v33 = vld [vmem:[#allocation6 + $0x140] sm:$0xff]  ;;  %v2416_v22 = vld [vmem:[%s6006_s1] sm:$0xff] }
 0x20a   : > { %3020 = vmatprep.subr.bf16.mxu0 %v3812_v52  ;;  %3665 = vmatprep.subr.bf16.mxu1 %v3812_v52 }
 0x20b   : > { %v2289_v20 = vadd.f32 %v5015_v35, %v2149_v56  ;;  %v2291_v12 = vadd.f32 %v5015_v35, %v2151_v18  ;;  %v2353_v15 = vadd.f32 %v5015_v35, %v2213_v0  ;;  %v2355_v21 = vadd.f32 %v5015_v35, %v2215_v57  ;;  %v3782_v18 = vld [vmem:[%s6009_s4 + $0x40] sm:$0xff]  }
 0x20c   : > { %v2288_v57 = vadd.f32 %v5011_v38, %v2148_v48  ;;  %v2290_v0 = vadd.f32 %v5011_v38, %v2150_v61  ;;  %v2352_v56 = vadd.f32 %v5011_v38, %v2212_v2  ;;  %v2482_v48 = vld [vmem:[%s6006_s1 + $0x210] sm:$0xff]  ;;  %v2047_v61 = vunpack.c.h.bf16 %v5044_v33 }
 0x20d   : > { %3021 = vmatpush2.bf16.msra.mxu0 %v3781_v42  ;;  %3681 = vmatpush2.bf16.msra.mxu1 %v3781_v42  ;;  %v2545_v42 = vadd.f32 %v2417_v5, %v2289_v20  ;;  %v2547_v39 = vadd.f32 %v2419_v51, %v2291_v12  ;;  %v2609_v34 = vadd.f32 %v2481_v43, %v2353_v15  ;;  %v2421_v51 = vld [vmem:[%s6006_s1 + $0x28] sm:$0xff] }
 0x20e   : > { %3022 = vmatprep.subr.bf16.mxu0 %v3812_v52  ;;  %3666 = vmatprep.subr.bf16.mxu1 %v3812_v52  ;;  %v2611_v2 = vadd.f32 %v2483_v46, %v2355_v21  ;;  %v2544_v62 = vadd.f32 %v2416_v22, %v2288_v57  ;;  %v2546_v25 = vadd.f32 %v2418_v59, %v2290_v0  ;;  %v2423_v21 = vld [vmem:[%s6006_s1 + $0x38] sm:$0xff]  ;;  %v2420_v57 = vld [vmem:[%s6006_s1 + $0x20] sm:$0xff] }
 0x20f   : > { %v2354_v11 = vadd.f32 %v5011_v38, %v2214_v27  ;;  %v2673_v9 = vmax.f32 %v2545_v42, 0.0  ;;  %v2675_v32 = vmax.f32 %v2547_v39, 0.0  ;;  %v2737_v41 = vmax.f32 %v2609_v34, 0.0  ;;  %v2485_v34 = vld [vmem:[%s6006_s1 + $0x228] sm:$0xff] }
 0x210   : > { %v2608_v55 = vadd.f32 %v2480_v36, %v2352_v56  ;;  %v2739_v52 = vmax.f32 %v2611_v2, 0.0  ;;  %v2672_v12 = vmax.f32 %v2544_v62, 0.0  ;;  %v2674_v5 = vmax.f32 %v2546_v25, 0.0  ;;  %v5087_v25 = vld [vmem:[#allocation6 + $0xa8] sm:$0xff] }
 0x211   : > { %3023 = vmatpush2.bf16.msra.mxu0 %v3782_v18  ;;  %3682 = vmatpush2.bf16.msra.mxu1 %v3782_v18  ;;  %v2610_v20 = vadd.f32 %v2482_v48, %v2354_v11  ;;  %v2801_v43 = vpack.c.bf16 %v2675_v32, %v2673_v9  ;;  %v2293_v39 = vadd.f32 %v5015_v35, %v2153_v24  ;;  %v2487_v32 = vld [vmem:[%s6006_s1 + $0x238] sm:$0xff]  ;;  %v6150_v18 = vunpack.c.l.bf16 %v4805_v10  ;;  %v2422_v48 = vld [vmem:[%s6006_s1 + $0x30] sm:$0xff] }
 0x212   : > { %v2736_v27 = vmax.f32 %v2608_v55, 0.0  ;;  %v2295_v36 = vadd.f32 %v5015_v35, %v2155_v44  ;;  %v2833_v11 = vpack.c.bf16 %v2739_v52, %v2737_v41  ;;  %v2800_v62 = vpack.c.bf16 %v2674_v5, %v2672_v12 }
 0x213   : > { %v2738_v15 = vmax.f32 %v2610_v20, 0.0  ;;  %v2357_v46 = vadd.f32 %v5015_v35, %v2217_v37  ;;  %3024 = vmatprep.mubr.bf16.mxu0 %v2801_v43  ;;  %v2549_v55 = vadd.f32 %v2421_v51, %v2293_v39  ;;  %v2359_v24 = vadd.f32 %v5015_v35, %v2219_v16  ;;  %v2486_v39 = vld [vmem:[%s6006_s1 + $0x230] sm:$0xff] }
 0x214   : > { %v2551_v9 = vadd.f32 %v2423_v21, %v2295_v36  ;;  %v6149_v44 = vunpack.c.l.bf16 %v4803_v14  ;;  %3152 = vmatprep.mubr.bf16.mxu1 %v2833_v11  ;;  %3025 = vmatmul.mubr.bf16.vlgmr.msra.gmra.mxu0 %v2800_v62  ;;  %v2154_v37 = vmul.f32 %v4966_v7, %v6150_v18  ;;  %v2109_v0 = vunpack.c.h.bf16 %v5087_v25 }
 0x215   : > { %v2832_v41 = vpack.c.bf16 %v2738_v15, %v2736_v27  ;;  %v2613_v59 = vadd.f32 %v2485_v34, %v2357_v46  ;;  %v2677_v56 = vmax.f32 %v2549_v55, 0.0  ;;  %v2615_v42 = vadd.f32 %v2487_v32, %v2359_v24  ;;  %v2484_v27 = vld [vmem:[%s6006_s1 + $0x220] sm:$0xff]  ;;  %v2425_v46 = vld [vmem:[%s6006_s1 + $0x48] sm:$0xff]  ;;  %v2427_v24 = vld [vmem:[%s6006_s1 + $0x58] sm:$0xff] }
 0x216   : > { %v2152_v22 = vmul.f32 %v4966_v7, %v6149_v44  ;;  %v2679_v16 = vmax.f32 %v2551_v9, 0.0  ;;  %v2294_v10 = vadd.f32 %v5011_v38, %v2154_v37  ;;  %v6151_v52 = vunpack.c.l.bf16 %v4814_v6 }
 0x217   : > { %3153 = vmatmul.mubr.bf16.vlgmr.msra.gmra.mxu1 %v2832_v41  ;;  %v2741_v2 = vmax.f32 %v2613_v59, 0.0  ;;  %v6152_v5 = vunpack.c.l.bf16 %v4816_v45  ;;  %v2743_v21 = vmax.f32 %v2615_v42, 0.0  ;;  %v6153_v36 = vunpack.c.h.bf16 %v4824_v30 }
 0x218   : > { %v2292_v14 = vadd.f32 %v5011_v38, %v2152_v22  ;;  %v2216_v12 = vmul.f32 %v4966_v7, %v6151_v52  ;;  %v2803_v51 = vpack.c.bf16 %v2679_v16, %v2677_v56  ;;  %v2550_v34 = vadd.f32 %v2422_v48, %v2294_v10 }
 0x219   : > { %v2218_v20 = vmul.f32 %v4966_v7, %v6152_v5  ;;  %v2157_v6 = vmul.f32 %v4970_v4, %v6153_v36  ;;  %v6154_v62 = vunpack.c.h.bf16 %v4826_v63  ;;  %v2835_v32 = vpack.c.bf16 %v2743_v21, %v2741_v2 }
 0x21a   : > { %v2548_v43 = vadd.f32 %v2420_v57, %v2292_v14  ;;  %v2356_v45 = vadd.f32 %v5011_v38, %v2216_v12  ;;  %3032 = vmatprep.mubr.bf16.mxu0 %v2803_v51  ;;  %v6155_v44 = vunpack.c.h.bf16 %v4832_v23  ;;  %v2678_v41 = vmax.f32 %v2550_v34, 0.0  ;;  %v2489_v57 = vld [vmem:[%s6006_s1 + $0x248] sm:$0xff] }
 0x21b   : > { %v2358_v11 = vadd.f32 %v5011_v38, %v2218_v20  ;;  %v2159_v15 = vmul.f32 %v4970_v4, %v6154_v62  ;;  %v2297_v9 = vadd.f32 %v5015_v35, %v2157_v6  ;;  %3160 = vmatprep.mubr.bf16.mxu1 %v2835_v32  ;;  %v6156_v16 = vunpack.c.h.bf16 %v4834_v50  ;;  %v2491_v20 = vld [vmem:[%s6006_s1 + $0x258] sm:$0xff] }
 0x21c   : > { %v2676_v55 = vmax.f32 %v2548_v43, 0.0  ;;  %v2221_v22 = vmul.f32 %v4970_v4, %v6155_v44  ;;  %v2612_v59 = vadd.f32 %v2484_v27, %v2356_v45  ;;  %v6157_v48 = vunpack.c.l.bf16 %v4824_v30  ;;  %v2424_v30 = vld [vmem:[%s6006_s1 + $0x40] sm:$0xff]  ;;  %v2426_v45 = vld [vmem:[%s6006_s1 + $0x50] sm:$0xff] }
 0x21d   : > { %v2614_v18 = vadd.f32 %v2486_v39, %v2358_v11  ;;  %v2299_v37 = vadd.f32 %v5015_v35, %v2159_v15  ;;  %v2553_v56 = vadd.f32 %v2425_v46, %v2297_v9  ;;  %v2223_v42 = vmul.f32 %v4970_v4, %v6156_v16  ;;  %v2488_v9 = vld [vmem:[%s6006_s1 + $0x240] sm:$0xff]  ;;  %v2429_v16 = vld [vmem:[%s6006_s1 + $0x68] sm:$0xff] }
 0x21e   : > { %v2361_v14 = vadd.f32 %v5015_v35, %v2221_v22  ;;  %v2156_v2 = vmul.f32 %v4966_v7, %v6157_v48  ;;  %v2802_v10 = vpack.c.bf16 %v2678_v41, %v2676_v55  ;;  %v2740_v52 = vmax.f32 %v2612_v59, 0.0 }
 0x21f   : > { %v2742_v12 = vmax.f32 %v2614_v18, 0.0  ;;  %v2555_v5 = vadd.f32 %v2427_v24, %v2299_v37  ;;  %v2681_v51 = vmax.f32 %v2553_v56, 0.0  ;;  %v2363_v21 = vadd.f32 %v5015_v35, %v2223_v42 }
 0x220   : > { %v2617_v43 = vadd.f32 %v2489_v57, %v2361_v14  ;;  %v6158_v27 = vunpack.c.l.bf16 %v4826_v63  ;;  %3033 = vmatmul.mubr.bf16.gmra.mxu0 %v2802_v10  ;;  %v2296_v34 = vadd.f32 %v5011_v38, %v2156_v2  ;;  %v6159_v11 = vunpack.c.l.bf16 %v4832_v23  ;;  %v2490_v23 = vld [vmem:[%s6006_s1 + $0x250] sm:$0xff]  ;;  %v2431_v2 = vld [vmem:[%s6006_s1 + $0x78] sm:$0xff] }
 0x221   : > { %v2834_v36 = vpack.c.bf16 %v2742_v12, %v2740_v52  ;;  %v2683_v6 = vmax.f32 %v2555_v5, 0.0  ;;  %v2619_v63 = vadd.f32 %v2491_v20, %v2363_v21  ;;  %v6160_v32 = vunpack.c.l.bf16 %v4834_v50  ;;  %v2493_v21 = vld [vmem:[%s6006_s1 + $0x268] sm:$0xff] }
 0x222   : > { %v2158_v39 = vmul.f32 %v4966_v7, %v6158_v27  ;;  %v2220_v62 = vmul.f32 %v4966_v7, %v6159_v11  ;;  %v2745_v15 = vmax.f32 %v2617_v43, 0.0  ;;  %v2552_v44 = vadd.f32 %v2424_v30, %v2296_v34  ;;  %v2495_v11 = vld [vmem:[%s6006_s1 + $0x278] sm:$0xff] }
 0x223   : > { %v2222_v55 = vmul.f32 %v4966_v7, %v6160_v32  ;;  %3161 = vmatmul.mubr.bf16.gmra.mxu1 %v2834_v36  ;;  %v2805_v24 = vpack.c.bf16 %v2683_v6, %v2681_v51  ;;  %v6161_v41 = vunpack.c.h.bf16 %v4843_v47  ;;  %v2747_v50 = vmax.f32 %v2619_v63, 0.0 }
 0x224   : > { %v2298_v46 = vadd.f32 %v5011_v38, %v2158_v39  ;;  %v2360_v22 = vadd.f32 %v5011_v38, %v2220_v62  ;;  %v6162_v57 = vunpack.c.h.bf16 %v4845_v1  ;;  %v2680_v42 = vmax.f32 %v2552_v44, 0.0 }
 0x225   : > { %v2161_v59 = vmul.f32 %v4970_v4, %v6161_v41  ;;  %v2362_v37 = vadd.f32 %v5011_v38, %v2222_v55  ;;  %3040 = vmatprep.mubr.bf16.mxu0 %v2805_v24  ;;  %v6163_v10 = vunpack.c.h.bf16 %v4854_v49  ;;  %v2837_v12 = vpack.c.bf16 %v2747_v50, %v2745_v15  ;;  %v2428_v24 = vld [vmem:[%s6006_s1 + $0x60] sm:$0xff] }
 0x226   : > { %v2554_v18 = vadd.f32 %v2426_v45, %v2298_v46  ;;  %v2163_v56 = vmul.f32 %v4970_v4, %v6162_v57  ;;  %v2616_v14 = vadd.f32 %v2488_v9, %v2360_v22  ;;  %v6164_v39 = vunpack.c.h.bf16 %v4856_v28 }
 0x227   : > { %v2301_v48 = vadd.f32 %v5015_v35, %v2161_v59  ;;  %v2225_v52 = vmul.f32 %v4970_v4, %v6163_v10  ;;  %v2618_v20 = vadd.f32 %v2490_v23, %v2362_v37  ;;  %3168 = vmatprep.mubr.bf16.mxu1 %v2837_v12  ;;  %v6165_v62 = vunpack.c.l.bf16 %v4843_v47  ;;  %v2430_v47 = vld [vmem:[%s6006_s1 + $0x70] sm:$0xff] }
 0x228   : > { %v2682_v5 = vmax.f32 %v2554_v18, 0.0  ;;  %v2303_v51 = vadd.f32 %v5015_v35, %v2163_v56  ;;  %v2744_v43 = vmax.f32 %v2616_v14, 0.0  ;;  %v2227_v30 = vmul.f32 %v4970_v4, %v6164_v39  ;;  %v2492_v56 = vld [vmem:[%s6006_s1 + $0x260] sm:$0xff] }
 0x229   : > { %v2557_v27 = vadd.f32 %v2429_v16, %v2301_v48  ;;  %v2365_v36 = vadd.f32 %v5015_v35, %v2225_v52  ;;  %v2746_v34 = vmax.f32 %v2618_v20, 0.0  ;;  %v2160_v63 = vmul.f32 %v4966_v7, %v6165_v62  ;;  %v2433_v20 = vld [vmem:[%s6006_s1 + $0x88] sm:$0xff] }
 0x22a   : > { %v2804_v6 = vpack.c.bf16 %v2682_v5, %v2680_v42  ;;  %v2559_v45 = vadd.f32 %v2431_v2, %v2303_v51  ;;  %v2367_v46 = vadd.f32 %v5015_v35, %v2227_v30  ;;  %v6166_v55 = vunpack.c.l.bf16 %v4845_v1 }
 0x22b   : > { %v2685_v15 = vmax.f32 %v2557_v27, 0.0  ;;  %v2621_v32 = vadd.f32 %v2493_v21, %v2365_v36  ;;  %v2836_v44 = vpack.c.bf16 %v2746_v34, %v2744_v43  ;;  %v2300_v23 = vadd.f32 %v5011_v38, %v2160_v63  ;;  %v2435_v27 = vld [vmem:[%s6006_s1 + $0x98] sm:$0xff] }
 0x22c   : > { %v2162_v9 = vmul.f32 %v4966_v7, %v6166_v55  ;;  %3041 = vmatmul.mubr.bf16.gmra.mxu0 %v2804_v6  ;;  %v2687_v22 = vmax.f32 %v2559_v45, 0.0  ;;  %v6167_v41 = vunpack.c.l.bf16 %v4854_v49  ;;  %v2623_v1 = vadd.f32 %v2495_v11, %v2367_v46  ;;  %v2494_v49 = vld [vmem:[%s6006_s1 + $0x270] sm:$0xff]  ;;  %v2497_v11 = vld [vmem:[%s6006_s1 + $0x288] sm:$0xff] }
 0x22d   : > { %v2749_v50 = vmax.f32 %v2621_v32, 0.0  ;;  %v6168_v37 = vunpack.c.l.bf16 %v4856_v28  ;;  %3169 = vmatmul.mubr.bf16.gmra.mxu1 %v2836_v44  ;;  %v2556_v42 = vadd.f32 %v2428_v24, %v2300_v23  ;;  %v6169_v48 = vunpack.c.h.bf16 %v4864_v60  ;;  %v2499_v44 = vld [vmem:[%s6006_s1 + $0x298] sm:$0xff] }
 0x22e   : > { %v2224_v59 = vmul.f32 %v4966_v7, %v6167_v41  ;;  %v2302_v18 = vadd.f32 %v5011_v38, %v2162_v9  ;;  %v2807_v16 = vpack.c.bf16 %v2687_v22, %v2685_v15  ;;  %v2751_v28 = vmax.f32 %v2623_v1, 0.0 }
 0x22f   : > { %v2226_v57 = vmul.f32 %v4966_v7, %v6168_v37  ;;  %v2165_v2 = vmul.f32 %v4970_v4, %v6169_v48  ;;  %v6170_v12 = vunpack.c.h.bf16 %v4866_v3  ;;  %v2684_v51 = vmax.f32 %v2556_v42, 0.0 }
 0x230   : > { %v2364_v14 = vadd.f32 %v5011_v38, %v2224_v59  ;;  %v2558_v10 = vadd.f32 %v2430_v47, %v2302_v18  ;;  %3048 = vmatprep.mubr.bf16.mxu0 %v2807_v16  ;;  %v6171_v39 = vunpack.c.h.bf16 %v4872_v17  ;;  %v2839_v36 = vpack.c.bf16 %v2751_v28, %v2749_v50  ;;  %v2432_v18 = vld [vmem:[%s6006_s1 + $0x80] sm:$0xff] }
 0x231   : > { %v2366_v52 = vadd.f32 %v5011_v38, %v2226_v57  ;;  %v2167_v5 = vmul.f32 %v4970_v4, %v6170_v12  ;;  %v2305_v43 = vadd.f32 %v5015_v35, %v2165_v2  ;;  %v6172_v15 = vunpack.c.h.bf16 %v4877_v53  ;;  %v2496_v28 = vld [vmem:[%s6006_s1 + $0x280] sm:$0xff] }
 0x232   : > { %v2620_v21 = vadd.f32 %v2492_v56, %v2364_v14  ;;  %v2229_v30 = vmul.f32 %v4970_v4, %v6171_v39  ;;  %v2686_v6 = vmax.f32 %v2558_v10, 0.0  ;;  %3176 = vmatprep.mubr.bf16.mxu1 %v2839_v36  ;;  %v6173_v22 = vunpack.c.l.bf16 %v4864_v60  ;;  %v2434_v60 = vld [vmem:[%s6006_s1 + $0x90] sm:$0xff]  ;;  %v2437_v39 = vld [vmem:[%s6006_s1 + $0xa8] sm:$0xff] }
 0x233   : > { %v2622_v34 = vadd.f32 %v2494_v49, %v2366_v52  ;;  %v2307_v45 = vadd.f32 %v5015_v35, %v2167_v5  ;;  %v2561_v63 = vadd.f32 %v2433_v20, %v2305_v43  ;;  %v2231_v46 = vmul.f32 %v4970_v4, %v6172_v15 }
 0x234   : > { %v2748_v62 = vmax.f32 %v2620_v21, 0.0  ;;  %v2369_v32 = vadd.f32 %v5015_v35, %v2229_v30  ;;  %v2806_v55 = vpack.c.bf16 %v2686_v6, %v2684_v51  ;;  %v2164_v23 = vmul.f32 %v4966_v7, %v6173_v22 }
 0x235   : > { %v2750_v9 = vmax.f32 %v2622_v34, 0.0  ;;  %v2563_v24 = vadd.f32 %v2435_v27, %v2307_v45  ;;  %v2689_v47 = vmax.f32 %v2561_v63, 0.0  ;;  %v2371_v41 = vadd.f32 %v5015_v35, %v2231_v46  ;;  %v2439_v34 = vld [vmem:[%s6006_s1 + $0xb8] sm:$0xff] }
 0x236   : > { %v2625_v59 = vadd.f32 %v2497_v11, %v2369_v32  ;;  %v6174_v1 = vunpack.c.l.bf16 %v4866_v3  ;;  %3049 = vmatmul.mubr.bf16.gmra.mxu0 %v2806_v55  ;;  %v2304_v56 = vadd.f32 %v5011_v38, %v2164_v23  ;;  %v6175_v16 = vunpack.c.l.bf16 %v4872_v17  ;;  %v2498_v17 = vld [vmem:[%s6006_s1 + $0x290] sm:$0xff]  ;;  %v2501_v32 = vld [vmem:[%s6006_s1 + $0x2a8] sm:$0xff] }
 0x237   : > { %v2838_v37 = vpack.c.bf16 %v2750_v9, %v2748_v62  ;;  %v2691_v57 = vmax.f32 %v2563_v24, 0.0  ;;  %v2627_v3 = vadd.f32 %v2499_v44, %v2371_v41  ;;  %v6176_v48 = vunpack.c.l.bf16 %v4877_v53 }
 0x238   : > { %v2166_v50 = vmul.f32 %v4966_v7, %v6174_v1  ;;  %v2228_v42 = vmul.f32 %v4966_v7, %v6175_v16  ;;  %v2753_v14 = vmax.f32 %v2625_v59, 0.0  ;;  %v2560_v52 = vadd.f32 %v2432_v18, %v2304_v56  ;;  %v2503_v59 = vld [vmem:[%s6006_s1 + $0x2b8] sm:$0xff]  ;;  %v2436_v16 = vld [vmem:[%s6006_s1 + $0xa0] sm:$0xff] }
 0x239   : > { %v2230_v2 = vmul.f32 %v4966_v7, %v6176_v48  ;;  %3177 = vmatmul.mubr.bf16.gmra.mxu1 %v2838_v37  ;;  %v2809_v10 = vpack.c.bf16 %v2691_v57, %v2689_v47  ;;  %v6177_v5 = vunpack.c.h.bf16 %v4879_v13  ;;  %v2755_v53 = vmax.f32 %v2627_v3, 0.0 }
 0x23a   : > { %v2306_v49 = vadd.f32 %v5011_v38, %v2166_v50  ;;  %v2368_v12 = vadd.f32 %v5011_v38, %v2228_v42  ;;  %v6178_v43 = vunpack.c.h.bf16 %v4891_v26  ;;  %v2688_v30 = vmax.f32 %v2560_v52, 0.0 }
 0x23b   : > { %v2169_v20 = vmul.f32 %v4970_v4, %v6177_v5  ;;  %v2370_v21 = vadd.f32 %v5011_v38, %v2230_v2  ;;  %3056 = vmatprep.mubr.bf16.mxu0 %v2809_v10  ;;  %v6179_v45 = vunpack.c.h.bf16 %v4901_v40  ;;  %v2841_v62 = vpack.c.bf16 %v2755_v53, %v2753_v14 }
 0x23c   : > { %v2562_v51 = vadd.f32 %v2434_v60, %v2306_v49  ;;  %v2171_v27 = vmul.f32 %v4970_v4, %v6178_v43  ;;  %v2624_v36 = vadd.f32 %v2496_v28, %v2368_v12  ;;  %v6180_v24 = vunpack.c.h.bf16 %v4903_v19  ;;  %v2500_v12 = vld [vmem:[%s6006_s1 + $0x2a0] sm:$0xff] }
 0x23d   : > { %v2309_v6 = vadd.f32 %v5015_v35, %v2169_v20  ;;  %v2233_v11 = vmul.f32 %v4970_v4, %v6179_v45  ;;  %v2626_v15 = vadd.f32 %v2498_v17, %v2370_v21  ;;  %3184 = vmatprep.mubr.bf16.mxu1 %v2841_v62  ;;  %v6181_v1 = vunpack.c.l.bf16 %v4879_v13  ;;  %v2438_v13 = vld [vmem:[%s6006_s1 + $0xb0] sm:$0xff]  ;;  %v2443_v45 = vld [vmem:[%s6006_s1 + $0xd8] sm:$0xff] }
 0x23e   : > { %v2690_v63 = vmax.f32 %v2562_v51, 0.0  ;;  %v2311_v46 = vadd.f32 %v5015_v35, %v2171_v27  ;;  %v2752_v55 = vmax.f32 %v2624_v36, 0.0  ;;  %v2235_v44 = vmul.f32 %v4970_v4, %v6180_v24 }
 0x23f   : > { %v2565_v9 = vadd.f32 %v2437_v39, %v2309_v6  ;;  %v2373_v22 = vadd.f32 %v5015_v35, %v2233_v11  ;;  %v2754_v47 = vmax.f32 %v2626_v15, 0.0  ;;  %v2168_v50 = vmul.f32 %v4966_v7, %v6181_v1  ;;  %v2507_v1 = vld [vmem:[%s6006_s1 + $0x2d8] sm:$0xff] }
 0x240   : > { %v2808_v23 = vpack.c.bf16 %v2690_v63, %v2688_v30  ;;  %v2567_v41 = vadd.f32 %v2439_v34, %v2311_v46  ;;  %v2375_v37 = vadd.f32 %v5015_v35, %v2235_v44  ;;  %v6182_v56 = vunpack.c.l.bf16 %v4891_v26  ;;  %v2441_v30 = vld [vmem:[%s6006_s1 + $0xc8] sm:$0xff] }
 0x241   : > { %v2693_v18 = vmax.f32 %v2565_v9, 0.0  ;;  %v2629_v57 = vadd.f32 %v2501_v32, %v2373_v22  ;;  %v2840_v42 = vpack.c.bf16 %v2754_v47, %v2752_v55  ;;  %v2308_v14 = vadd.f32 %v5011_v38, %v2168_v50  ;;  %v2505_v55 = vld [vmem:[%s6006_s1 + $0x2c8] sm:$0xff] }
 0x242   : > { %v2170_v60 = vmul.f32 %v4966_v7, %v6182_v56  ;;  %3057 = vmatmul.mubr.bf16.gmra.mxu0 %v2808_v23  ;;  %v2695_v3 = vmax.f32 %v2567_v41, 0.0  ;;  %v6183_v49 = vunpack.c.l.bf16 %v4901_v40  ;;  %v2631_v26 = vadd.f32 %v2503_v59, %v2375_v37  ;;  %v2502_v40 = vld [vmem:[%s6006_s1 + $0x2b0] sm:$0xff] }
 0x243   : > { %v2757_v2 = vmax.f32 %v2629_v57, 0.0  ;;  %v6184_v10 = vunpack.c.l.bf16 %v4903_v19  ;;  %3185 = vmatmul.mubr.bf16.gmra.mxu1 %v2840_v42  ;;  %v2564_v5 = vadd.f32 %v2436_v16, %v2308_v14  ;;  %v6185_v53 = vunpack.c.h.bf16 %v4909_v54  ;;  %v2440_v42 = vld [vmem:[%s6006_s1 + $0xc0] sm:$0xff] }
 0x244   : > { %v2232_v48 = vmul.f32 %v4966_v7, %v6183_v49  ;;  %v2310_v28 = vadd.f32 %v5011_v38, %v2170_v60  ;;  %v2811_v17 = vpack.c.bf16 %v2695_v3, %v2693_v18  ;;  %v2759_v19 = vmax.f32 %v2631_v26, 0.0 }
 0x245   : > { %v2234_v52 = vmul.f32 %v4966_v7, %v6184_v10  ;;  %v2173_v51 = vmul.f32 %v4970_v4, %v6185_v53  ;;  %v6186_v27 = vunpack.c.h.bf16 %v4911_v31  ;;  %v2692_v36 = vmax.f32 %v2564_v5, 0.0 }
 0x246   : > { %v2372_v20 = vadd.f32 %v5011_v38, %v2232_v48  ;;  %v2566_v21 = vadd.f32 %v2438_v13, %v2310_v28  ;;  %3064 = vmatprep.mubr.bf16.mxu0 %v2811_v17  ;;  %v6187_v11 = vunpack.c.h.bf16 %v4913_v29  ;;  %v2843_v63 = vpack.c.bf16 %v2759_v19, %v2757_v2  ;;  %v6194_v19 = vld [vmem:[#allocation34_spill] sm:$0xff] }
 0x247   : > { %v2374_v43 = vadd.f32 %v5011_v38, %v2234_v52  ;;  %v2175_v39 = vmul.f32 %v4970_v4, %v6186_v27  ;;  %v2313_v34 = vadd.f32 %v5015_v35, %v2173_v51  ;;  %v6188_v44 = vunpack.c.h.bf16 %v4918_v58  ;;  %v2504_v52 = vld [vmem:[%s6006_s1 + $0x2c0] sm:$0xff]  ;;  %v2445_v27 = vld [vmem:[%s6006_s1 + $0xe8] sm:$0xff] }
 0x248   : > { %v2628_v6 = vadd.f32 %v2500_v12, %v2372_v20  ;;  %v2237_v62 = vmul.f32 %v4970_v4, %v6187_v11  ;;  %v2694_v15 = vmax.f32 %v2566_v21, 0.0  ;;  %3192 = vmatprep.mubr.bf16.mxu1 %v2843_v63  ;;  %v6189_v50 = vunpack.c.l.bf16 %v4909_v54  ;;  %v2442_v54 = vld [vmem:[%s6006_s1 + $0xd0] sm:$0xff] }
 0x249   : > { %v2630_v46 = vadd.f32 %v2502_v40, %v2374_v43  ;;  %v2315_v32 = vadd.f32 %v5015_v35, %v2175_v39  ;;  %v2569_v24 = vadd.f32 %v2441_v30, %v2313_v34  ;;  %v2239_v22 = vmul.f32 %v4970_v4, %v6188_v44  ;;  %v6196_v34 = vld [vmem:[#allocation35_spill] sm:$0xff] }
 0x24a   : > { %v2756_v9 = vmax.f32 %v2628_v6, 0.0  ;;  %v2377_v23 = vadd.f32 %v5015_v35, %v2237_v62  ;;  %v2810_v47 = vpack.c.bf16 %v2694_v15, %v2692_v36  ;;  %v2172_v18 = vmul.f32 %v4966_v7, %v6189_v50  ;;  %v2447_v6 = vld [vmem:[%s6006_s1 + $0xf8] sm:$0xff] }
 0x24b   : > { %v2758_v41 = vmax.f32 %v2630_v46, 0.0  ;;  %v2571_v59 = vadd.f32 %v2443_v45, %v2315_v32  ;;  %v2697_v37 = vmax.f32 %v2569_v24, 0.0  ;;  %v2379_v57 = vadd.f32 %v5015_v35, %v2239_v22  ;;  %v2509_v32 = vld [vmem:[%s6006_s1 + $0x2e8] sm:$0xff]  ;;  %v6198_v24 = vld [vmem:[#allocation36_spill] sm:$0xff] }
 0x24c   : > { %v2633_v56 = vadd.f32 %v2505_v55, %v2377_v23  ;;  %v6190_v60 = vunpack.c.l.bf16 %v4911_v31  ;;  %3065 = vmatmul.mubr.bf16.gmra.mxu0 %v2810_v47  ;;  %v2312_v13 = vadd.f32 %v5011_v38, %v2172_v18  ;;  %v6191_v49 = vunpack.c.l.bf16 %v4913_v29  ;;  %v2506_v29 = vld [vmem:[%s6006_s1 + $0x2d0] sm:$0xff] }
 0x24d   : > { %v2842_v3 = vpack.c.bf16 %v2758_v41, %v2756_v9  ;;  %v2699_v14 = vmax.f32 %v2571_v59, 0.0  ;;  %v2635_v31 = vadd.f32 %v2507_v1, %v2379_v57  ;;  %v6192_v28 = vunpack.c.l.bf16 %v4918_v58  ;;  %v2511_v1 = vld [vmem:[%s6006_s1 + $0x2f8] sm:$0xff] }
 0x24e   : > { %v2174_v16 = vmul.f32 %v4966_v7, %v6190_v60  ;;  %v2236_v48 = vmul.f32 %v4966_v7, %v6191_v49  ;;  %v2761_v26 = vmax.f32 %v2633_v56, 0.0  ;;  %v2568_v17 = vadd.f32 %v2440_v42, %v2312_v13  ;;  %v2444_v42 = vld [vmem:[%s6006_s1 + $0xe0] sm:$0xff] }
 0x24f   : > { %v2238_v10 = vmul.f32 %v4966_v7, %v6192_v28  ;;  %3193 = vmatmul.mubr.bf16.gmra.mxu1 %v2842_v3  ;;  %v2813_v12 = vpack.c.bf16 %v2699_v14, %v2697_v37  ;;  %v6193_v20 = vunpack.c.h.bf16 %v4927_v8  ;;  %v2763_v58 = vmax.f32 %v2635_v31, 0.0 }
 0x250   : > { %v2314_v2 = vadd.f32 %v5011_v38, %v2174_v16  ;;  %v2376_v5 = vadd.f32 %v5011_v38, %v2236_v48  ;;  %v6195_v21 = vunpack.c.h.bf16 %v6194_v19  ;;  %v2696_v39 = vmax.f32 %v2568_v17, 0.0 }
 0x251   : > { %v2177_v40 = vmul.f32 %v4970_v4, %v6193_v20  ;;  %v2378_v51 = vadd.f32 %v5011_v38, %v2238_v10  ;;  %3072 = vmatprep.mubr.bf16.mxu0 %v2813_v12  ;;  %v6197_v45 = vunpack.c.h.bf16 %v6196_v34  ;;  %v2845_v62 = vpack.c.bf16 %v2763_v58, %v2761_v26  ;;  %v2508_v10 = vld [vmem:[%s6006_s1 + $0x2e0] sm:$0xff] }
 0x252   : > { %v2570_v53 = vadd.f32 %v2442_v54, %v2314_v2  ;;  %v2179_v43 = vmul.f32 %v4970_v4, %v6195_v21  ;;  %v2632_v30 = vadd.f32 %v2504_v52, %v2376_v5  ;;  %v6199_v44 = vunpack.c.h.bf16 %v6198_v24  ;;  %v2510_v5 = vld [vmem:[%s6006_s1 + $0x2f0] sm:$0xff] }
 0x253   : > { %v2317_v36 = vadd.f32 %v5015_v35, %v2177_v40  ;;  %v2241_v11 = vmul.f32 %v4970_v4, %v6197_v45  ;;  %v2634_v15 = vadd.f32 %v2506_v29, %v2378_v51  ;;  %3200 = vmatprep.mubr.bf16.mxu1 %v2845_v62  ;;  %v6200_v50 = vunpack.c.l.bf16 %v4927_v8  ;;  %v2446_v8 = vld [vmem:[%s6006_s1 + $0xf0] sm:$0xff]  ;;  %v6204_v29 = vld [vmem:[#allocation37_spill] sm:$0xff] }
 0x254   : > { %v2698_v63 = vmax.f32 %v2570_v53, 0.0  ;;  %v2319_v46 = vadd.f32 %v5015_v35, %v2179_v43  ;;  %v2760_v55 = vmax.f32 %v2632_v30, 0.0  ;;  %v2243_v22 = vmul.f32 %v4970_v4, %v6199_v44 }
 0x255   : > { %v2573_v9 = vadd.f32 %v2445_v27, %v2317_v36  ;;  %v2381_v23 = vadd.f32 %v5015_v35, %v2241_v11  ;;  %v2762_v41 = vmax.f32 %v2634_v15, 0.0  ;;  %v2176_v18 = vmul.f32 %v4966_v7, %v6200_v50  ;;  %v2449_v27 = vld [vmem:[%s6006_s1 + $0x108] sm:$0xff] }
 0x256   : > { %v2812_v47 = vpack.c.bf16 %v2698_v63, %v2696_v39  ;;  %v2575_v59 = vadd.f32 %v2447_v6, %v2319_v46  ;;  %v2383_v57 = vadd.f32 %v5015_v35, %v2243_v22  ;;  %v6201_v60 = vunpack.c.l.bf16 %v6194_v19  ;;  %v6206_v19 = vld [vmem:[#allocation38_spill] sm:$0xff]  ;;  %v2451_v6 = vld [vmem:[%s6006_s1 + $0x118] sm:$0xff] }
 0x257   : > { %v2701_v37 = vmax.f32 %v2573_v9, 0.0  ;;  %v2637_v56 = vadd.f32 %v2509_v32, %v2381_v23  ;;  %v2844_v3 = vpack.c.bf16 %v2762_v41, %v2760_v55  ;;  %v2316_v13 = vadd.f32 %v5011_v38, %v2176_v18  ;;  %v2513_v32 = vld [vmem:[%s6006_s1 + $0x308] sm:$0xff] }
 0x258   : > { %v2178_v16 = vmul.f32 %v4966_v7, %v6201_v60  ;;  %3073 = vmatmul.mubr.bf16.gmra.mxu0 %v2812_v47  ;;  %v2703_v14 = vmax.f32 %v2575_v59, 0.0  ;;  %v6202_v54 = vunpack.c.l.bf16 %v6196_v34  ;;  %v2639_v48 = vadd.f32 %v2511_v1, %v2383_v57  ;;  %v6208_v34 = vld [vmem:[#allocation39_spill] sm:$0xff]  ;;  %v2515_v1 = vld [vmem:[%s6006_s1 + $0x318] sm:$0xff] }
 0x259   : > { %v2765_v31 = vmax.f32 %v2637_v56, 0.0  ;;  %v6203_v2 = vunpack.c.l.bf16 %v6198_v24  ;;  %3201 = vmatmul.mubr.bf16.gmra.mxu1 %v2844_v3  ;;  %v2572_v12 = vadd.f32 %v2444_v42, %v2316_v13  ;;  %v6205_v20 = vunpack.c.h.bf16 %v6204_v29  ;;  %v6210_v24 = vld [vmem:[#allocation40_spill] sm:$0xff]  ;;  %v2448_v42 = vld [vmem:[%s6006_s1 + $0x100] sm:$0xff] }
 0x25a   : > { %v2240_v49 = vmul.f32 %v4966_v7, %v6202_v54  ;;  %v2318_v26 = vadd.f32 %v5011_v38, %v2178_v16  ;;  %v2815_v52 = vpack.c.bf16 %v2703_v14, %v2701_v37  ;;  %v2767_v58 = vmax.f32 %v2639_v48, 0.0 }
 0x25b   : > { %v2242_v28 = vmul.f32 %v4966_v7, %v6203_v2  ;;  %v2181_v40 = vmul.f32 %v4970_v4, %v6205_v20  ;;  %v6207_v21 = vunpack.c.h.bf16 %v6206_v19  ;;  %v2700_v39 = vmax.f32 %v2572_v12, 0.0  ;;  %v6216_v20 = vld [vmem:[#allocation41_spill] sm:$0xff] }
 0x25c   : > { %v2380_v17 = vadd.f32 %v5011_v38, %v2240_v49  ;;  %v2574_v53 = vadd.f32 %v2446_v8, %v2318_v26  ;;  %3080 = vmatprep.mubr.bf16.mxu0 %v2815_v52  ;;  %v6209_v45 = vunpack.c.h.bf16 %v6208_v34  ;;  %v2847_v62 = vpack.c.bf16 %v2767_v58, %v2765_v31  ;;  %v2450_v8 = vld [vmem:[%s6006_s1 + $0x110] sm:$0xff] }
 0x25d   : > { %v2382_v51 = vadd.f32 %v5011_v38, %v2242_v28  ;;  %v2183_v43 = vmul.f32 %v4970_v4, %v6207_v21  ;;  %v2321_v36 = vadd.f32 %v5015_v35, %v2181_v40  ;;  %v6211_v44 = vunpack.c.h.bf16 %v6210_v24  ;;  %v1995_v52 = vld [vmem:[#allocation6 + $0x1c8] sm:$0xff] }
 0x25e   : > { %v2636_v30 = vadd.f32 %v2508_v10, %v2380_v17  ;;  %v2245_v11 = vmul.f32 %v4970_v4, %v6209_v45  ;;  %v2702_v63 = vmax.f32 %v2574_v53, 0.0  ;;  %3208 = vmatprep.mubr.bf16.mxu1 %v2847_v62  ;;  %v6212_v50 = vunpack.c.l.bf16 %v6204_v29  ;;  %v2512_v10 = vld [vmem:[%s6006_s1 + $0x300] sm:$0xff]  ;;  %v2514_v29 = vld [vmem:[%s6006_s1 + $0x310] sm:$0xff] }
 0x25f   : > { %v2638_v15 = vadd.f32 %v2510_v5, %v2382_v51  ;;  %v2323_v46 = vadd.f32 %v5015_v35, %v2183_v43  ;;  %v2577_v9 = vadd.f32 %v2449_v27, %v2321_v36  ;;  %v2247_v22 = vmul.f32 %v4970_v4, %v6211_v44  ;;  %v2453_v43 = vld [vmem:[%s6006_s1 + $0x128] sm:$0xff]  ;;  %v2455_v36 = vld [vmem:[%s6006_s1 + $0x138] sm:$0xff] }
 0x260   : > { %v2764_v55 = vmax.f32 %v2636_v30, 0.0  ;;  %v2385_v23 = vadd.f32 %v5015_v35, %v2245_v11  ;;  %v2814_v47 = vpack.c.bf16 %v2702_v63, %v2700_v39  ;;  %v2180_v18 = vmul.f32 %v4966_v7, %v6212_v50  ;;  %v2519_v44 = vld [vmem:[%s6006_s1 + $0x338] sm:$0xff] }
 0x261   : > { %v2766_v41 = vmax.f32 %v2638_v15, 0.0  ;;  %v2579_v59 = vadd.f32 %v2451_v6, %v2323_v46  ;;  %v2705_v37 = vmax.f32 %v2577_v9, 0.0  ;;  %v2387_v57 = vadd.f32 %v5015_v35, %v2247_v22 }
 0x262   : > { %v2641_v56 = vadd.f32 %v2513_v32, %v2385_v23  ;;  %v6213_v60 = vunpack.c.l.bf16 %v6206_v19  ;;  %3081 = vmatmul.mubr.bf16.gmra.mxu0 %v2814_v47  ;;  %v2320_v13 = vadd.f32 %v5011_v38, %v2180_v18  ;;  %v6214_v54 = vunpack.c.l.bf16 %v6208_v34 }
 0x263   : > { %v2846_v3 = vpack.c.bf16 %v2766_v41, %v2764_v55  ;;  %v2707_v14 = vmax.f32 %v2579_v59, 0.0  ;;  %v2643_v48 = vadd.f32 %v2515_v1, %v2387_v57  ;;  %v6215_v2 = vunpack.c.l.bf16 %v6210_v24  ;;  %v2517_v24 = vld [vmem:[%s6006_s1 + $0x328] sm:$0xff] }
 0x264   : > { %v2182_v16 = vmul.f32 %v4966_v7, %v6213_v60  ;;  %v2244_v49 = vmul.f32 %v4966_v7, %v6214_v54  ;;  %v2769_v31 = vmax.f32 %v2641_v56, 0.0  ;;  %v2576_v17 = vadd.f32 %v2448_v42, %v2320_v13  ;;  %v1964_v59 = vld [vmem:[#allocation6 + $0x80] sm:$0xff]  ;;  %v2454_v13 = vld [vmem:[%s6006_s1 + $0x130] sm:$0xff]  ;;  %v1996_v54 = vld [vmem:[#allocation6 + $0x170] sm:$0xff] }
 0x265   : > { %v2246_v28 = vmul.f32 %v4966_v7, %v6215_v2  ;;  %3209 = vmatmul.mubr.bf16.gmra.mxu1 %v2846_v3  ;;  %v2817_v12 = vpack.c.bf16 %v2707_v14, %v2705_v37  ;;  %v6217_v40 = vunpack.c.h.bf16 %v6216_v20  ;;  %v2771_v53 = vmax.f32 %v2643_v48, 0.0  ;;  %v1965_v3 = vld [vmem:[#allocation6 + $0x1a8] sm:$0xff]  ;;  %v2516_v2 = vld [vmem:[%s6006_s1 + $0x320] sm:$0xff] }
 0x266   : > { %v2322_v26 = vadd.f32 %v5011_v38, %v2182_v16  ;;  %v2384_v5 = vadd.f32 %v5011_v38, %v2244_v49  ;;  %v2187_v21 = vmul.f32 %v4970_v4, %v2047_v61  ;;  %v2704_v27 = vmax.f32 %v2576_v17, 0.0  ;;  %v2452_v16 = vld [vmem:[%s6006_s1 + $0x120] sm:$0xff] }
 0x267   : > { %v2185_v58 = vmul.f32 %v4970_v4, %v6217_v40  ;;  %v2386_v19 = vadd.f32 %v5011_v38, %v2246_v28  ;;  %3088 = vmatprep.mubr.bf16.mxu0 %v2817_v12  ;;  %v2111_v6 = vunpack.c.h.bf16 %v1995_v52  ;;  %v2849_v34 = vpack.c.bf16 %v2771_v53, %v2769_v31 }
 0x268   : > { %v2578_v51 = vadd.f32 %v2450_v8, %v2322_v26  ;;  %v2640_v39 = vadd.f32 %v2512_v10, %v2384_v5  ;;  %v2327_v62 = vadd.f32 %v5015_v35, %v2187_v21  ;;  %v2249_v15 = vmul.f32 %v4970_v4, %v2109_v0  ;;  %v1997_v5 = vld [vmem:[#allocation6 + $0x178] sm:$0xff] }
 0x269   : > { %v2325_v30 = vadd.f32 %v5015_v35, %v2185_v58  ;;  %v2642_v11 = vadd.f32 %v2514_v29, %v2386_v19  ;;  %v2251_v46 = vmul.f32 %v4970_v4, %v2111_v6  ;;  %3216 = vmatprep.mubr.bf16.mxu1 %v2849_v34  ;;  %v2044_v22 = vunpack.c.l.bf16 %v6216_v20  ;;  %v2457_v58 = vld [vmem:[%s6006_s1 + $0x148] sm:$0xff] }
 0x26a   : > { %v2706_v45 = vmax.f32 %v2578_v51, 0.0  ;;  %v2768_v61 = vmax.f32 %v2640_v39, 0.0  ;;  %v2583_v9 = vadd.f32 %v2455_v36, %v2327_v62  ;;  %v2389_v47 = vadd.f32 %v5015_v35, %v2249_v15  ;;  %v2521_v62 = vld [vmem:[%s6006_s1 + $0x348] sm:$0xff] }
 0x26b   : > { %v2581_v63 = vadd.f32 %v2453_v43, %v2325_v30  ;;  %v2770_v55 = vmax.f32 %v2642_v11, 0.0  ;;  %v2391_v0 = vadd.f32 %v5015_v35, %v2251_v46  ;;  %v2046_v41 = vunpack.c.l.bf16 %v5044_v33  ;;  %v2459_v30 = vld [vmem:[%s6006_s1 + $0x158] sm:$0xff] }
 0x26c   : > { %v2816_v32 = vpack.c.bf16 %v2706_v45, %v2704_v27  ;;  %v2711_v50 = vmax.f32 %v2583_v9, 0.0  ;;  %v2184_v18 = vmul.f32 %v4966_v7, %v2044_v22  ;;  %v2108_v37 = vunpack.c.l.bf16 %v5087_v25 }
 0x26d   : > { %v2709_v23 = vmax.f32 %v2581_v63, 0.0  ;;  %v2848_v1 = vpack.c.bf16 %v2770_v55, %v2768_v61  ;;  %v2645_v57 = vadd.f32 %v2517_v24, %v2389_v47  ;;  %v2647_v56 = vadd.f32 %v2519_v44, %v2391_v0  ;;  %v2523_v24 = vld [vmem:[%s6006_s1 + $0x358] sm:$0xff] }
 0x26e   : > { %3089 = vmatmul.mubr.bf16.gmra.mxu0 %v2816_v32  ;;  %v2186_v60 = vmul.f32 %v4966_v7, %v2046_v41  ;;  %v2110_v42 = vunpack.c.l.bf16 %v1995_v52  ;;  %v2324_v14 = vadd.f32 %v5011_v38, %v2184_v18  ;;  %v2248_v25 = vmul.f32 %v4966_v7, %v2108_v37  ;;  %v2518_v52 = vld [vmem:[%s6006_s1 + $0x330] sm:$0xff] }
 0x26f   : > { %3217 = vmatmul.mubr.bf16.gmra.mxu1 %v2848_v1  ;;  %v2819_v33 = vpack.c.bf16 %v2711_v50, %v2709_v23  ;;  %v2049_v8 = vunpack.c.h.bf16 %v1964_v59  ;;  %v2773_v49 = vmax.f32 %v2645_v57, 0.0  ;;  %v2775_v48 = vmax.f32 %v2647_v56, 0.0  ;;  %v1966_v23 = vld [vmem:[#allocation6 + $0x1b8] sm:$0xff]  ;;  %v1967_v56 = vld [vmem:[#allocation6 + $0x28] sm:$0xff] }
 0x270   : > { %v2326_v31 = vadd.f32 %v5011_v38, %v2186_v60  ;;  %v2250_v26 = vmul.f32 %v4966_v7, %v2110_v42  ;;  %v2580_v28 = vadd.f32 %v2452_v16, %v2324_v14  ;;  %v2388_v10 = vadd.f32 %v5011_v38, %v2248_v25  ;;  %v2458_v42 = vld [vmem:[%s6006_s1 + $0x150] sm:$0xff] }
 0x271   : > { %3096 = vmatprep.mubr.bf16.mxu0 %v2819_v33  ;;  %v2051_v12 = vunpack.c.h.bf16 %v1965_v3  ;;  %v2189_v17 = vmul.f32 %v4970_v4, %v2049_v8  ;;  %v2851_v29 = vpack.c.bf16 %v2775_v48, %v2773_v49  ;;  %v2113_v53 = vunpack.c.h.bf16 %v1996_v54  ;;  %v1998_v14 = vld [vmem:[#allocation6 + $0x68] sm:$0xff]  ;;  %v2520_v49 = vld [vmem:[%s6006_s1 + $0x340] sm:$0xff] }
 0x272   : > { %v2582_v20 = vadd.f32 %v2454_v13, %v2326_v31  ;;  %v2390_v40 = vadd.f32 %v5011_v38, %v2250_v26  ;;  %v2708_v51 = vmax.f32 %v2580_v28, 0.0  ;;  %v2644_v19 = vadd.f32 %v2516_v2, %v2388_v10  ;;  %v2522_v26 = vld [vmem:[%s6006_s1 + $0x350] sm:$0xff]  ;;  %v1999_v10 = vld [vmem:[#allocation6 + $0x190] sm:$0xff] }
 0x273   : > { %v2191_v21 = vmul.f32 %v4970_v4, %v2051_v12  ;;  %v2329_v43 = vadd.f32 %v5015_v35, %v2189_v17  ;;  %3224 = vmatprep.mubr.bf16.mxu1 %v2851_v29  ;;  %v2115_v36 = vunpack.c.h.bf16 %v1997_v5  ;;  %v2253_v6 = vmul.f32 %v4970_v4, %v2113_v53 }
 0x274   : > { %v2710_v27 = vmax.f32 %v2582_v20, 0.0  ;;  %v2646_v39 = vadd.f32 %v2518_v52, %v2390_v40  ;;  %v2772_v34 = vmax.f32 %v2644_v19, 0.0  ;;  %v2048_v61 = vunpack.c.l.bf16 %v1964_v59  ;;  %v2456_v59 = vld [vmem:[%s6006_s1 + $0x140] sm:$0xff] }
 0x275   : > { %v2331_v45 = vadd.f32 %v5015_v35, %v2191_v21  ;;  %v2585_v11 = vadd.f32 %v2457_v58, %v2329_v43  ;;  %v2255_v46 = vmul.f32 %v4970_v4, %v2115_v36  ;;  %v2393_v32 = vadd.f32 %v5015_v35, %v2253_v6  ;;  %v2463_v21 = vld [vmem:[%s6006_s1 + $0x178] sm:$0xff]  ;;  %v2525_v6 = vld [vmem:[%s6006_s1 + $0x368] sm:$0xff] }
 0x276   : > { %v2818_v63 = vpack.c.bf16 %v2710_v27, %v2708_v51  ;;  %v2774_v15 = vmax.f32 %v2646_v39, 0.0  ;;  %v2050_v44 = vunpack.c.l.bf16 %v1965_v3  ;;  %v2188_v22 = vmul.f32 %v4966_v7, %v2048_v61 }
 0x277   : > { %v2587_v55 = vadd.f32 %v2459_v30, %v2331_v45  ;;  %v2713_v9 = vmax.f32 %v2585_v11, 0.0  ;;  %v2395_v0 = vadd.f32 %v5015_v35, %v2255_v46  ;;  %v2649_v41 = vadd.f32 %v2521_v62, %v2393_v32  ;;  %v2527_v46 = vld [vmem:[%s6006_s1 + $0x378] sm:$0xff] }
 0x278   : > { %3097 = vmatmul.mubr.bf16.gmra.mxu0 %v2818_v63  ;;  %v2850_v47 = vpack.c.bf16 %v2774_v15, %v2772_v34  ;;  %v2112_v1 = vunpack.c.l.bf16 %v1996_v54  ;;  %v2190_v18 = vmul.f32 %v4966_v7, %v2050_v44  ;;  %v2328_v37 = vadd.f32 %v5011_v38, %v2188_v22 }
 0x279   : > { %v2715_v50 = vmax.f32 %v2587_v55, 0.0  ;;  %v2114_v57 = vunpack.c.l.bf16 %v1997_v5  ;;  %v2651_v60 = vadd.f32 %v2523_v24, %v2395_v0  ;;  %v2777_v16 = vmax.f32 %v2649_v41, 0.0  ;;  %v2461_v5 = vld [vmem:[%s6006_s1 + $0x168] sm:$0xff] }
 0x27a   : > { %3225 = vmatmul.mubr.bf16.gmra.mxu1 %v2850_v47  ;;  %v2252_v3 = vmul.f32 %v4966_v7, %v2112_v1  ;;  %v2053_v33 = vunpack.c.h.bf16 %v1966_v23  ;;  %v2330_v25 = vadd.f32 %v5011_v38, %v2190_v18  ;;  %v2584_v8 = vadd.f32 %v2456_v59, %v2328_v37 }
 0x27b   : > { %v2821_v13 = vpack.c.bf16 %v2715_v50, %v2713_v9  ;;  %v2254_v54 = vmul.f32 %v4966_v7, %v2114_v57  ;;  %v2779_v48 = vmax.f32 %v2651_v60, 0.0  ;;  %v2055_v2 = vunpack.c.h.bf16 %v1967_v56  ;;  %v1968_v9 = vld [vmem:[#allocation6 + $0x1e8] sm:$0xff]  ;;  %v1969_v50 = vld [vmem:[#allocation6 + $0xf8] sm:$0xff] }
 0x27c   : > { %v2392_v31 = vadd.f32 %v5011_v38, %v2252_v3  ;;  %v2193_v28 = vmul.f32 %v4970_v4, %v2053_v33  ;;  %v2586_v52 = vadd.f32 %v2458_v42, %v2330_v25  ;;  %v2712_v12 = vmax.f32 %v2584_v8, 0.0  ;;  %v2462_v57 = vld [vmem:[%s6006_s1 + $0x170] sm:$0xff] }
 0x27d   : > { %3104 = vmatprep.mubr.bf16.mxu0 %v2821_v13  ;;  %v2394_v17 = vadd.f32 %v5011_v38, %v2254_v54  ;;  %v2117_v29 = vunpack.c.h.bf16 %v1998_v14  ;;  %v2853_v20 = vpack.c.bf16 %v2779_v48, %v2777_v16  ;;  %v2195_v58 = vmul.f32 %v4970_v4, %v2055_v2  ;;  %v2000_v16 = vld [vmem:[#allocation6 + $0x198] sm:$0xff]  ;;  %v2526_v54 = vld [vmem:[%s6006_s1 + $0x370] sm:$0xff] }
 0x27e   : > { %v2648_v40 = vadd.f32 %v2520_v49, %v2392_v31  ;;  %v2333_v53 = vadd.f32 %v5015_v35, %v2193_v28  ;;  %v2714_v51 = vmax.f32 %v2586_v52, 0.0  ;;  %v2119_v43 = vunpack.c.h.bf16 %v1999_v10  ;;  %v2524_v13 = vld [vmem:[%s6006_s1 + $0x360] sm:$0xff] }
 0x27f   : > { %v2650_v19 = vadd.f32 %v2522_v26, %v2394_v17  ;;  %v2257_v27 = vmul.f32 %v4970_v4, %v2117_v29  ;;  %3232 = vmatprep.mubr.bf16.mxu1 %v2853_v20  ;;  %v2335_v30 = vadd.f32 %v5015_v35, %v2195_v58  ;;  %v2052_v34 = vunpack.c.l.bf16 %v1966_v23  ;;  %v2460_v23 = vld [vmem:[%s6006_s1 + $0x160] sm:$0xff]  ;;  %v2467_v58 = vld [vmem:[%s6006_s1 + $0x198] sm:$0xff] }
 0x280   : > { %v2776_v39 = vmax.f32 %v2648_v40, 0.0  ;;  %v2589_v36 = vadd.f32 %v2461_v5, %v2333_v53  ;;  %v2820_v45 = vpack.c.bf16 %v2714_v51, %v2712_v12  ;;  %v2259_v62 = vmul.f32 %v4970_v4, %v2119_v43  ;;  %v2001_v31 = vld [vmem:[#allocation6 + $0x38] sm:$0xff] }
 0x281   : > { %v2778_v11 = vmax.f32 %v2650_v19, 0.0  ;;  %v2397_v61 = vadd.f32 %v5015_v35, %v2257_v27  ;;  %v2591_v63 = vadd.f32 %v2463_v21, %v2335_v30  ;;  %v2054_v32 = vunpack.c.l.bf16 %v1967_v56  ;;  %v2529_v27 = vld [vmem:[%s6006_s1 + $0x388] sm:$0xff] }
 0x282   : > { %v2717_v15 = vmax.f32 %v2589_v36, 0.0  ;;  %v2192_v55 = vmul.f32 %v4966_v7, %v2052_v34  ;;  %3105 = vmatmul.mubr.bf16.gmra.mxu0 %v2820_v45  ;;  %v2399_v44 = vadd.f32 %v5015_v35, %v2259_v62  ;;  %v2116_v47 = vunpack.c.l.bf16 %v1998_v14  ;;  %v2531_v62 = vld [vmem:[%s6006_s1 + $0x398] sm:$0xff] }
 0x283   : > { %v2852_v24 = vpack.c.bf16 %v2778_v11, %v2776_v39  ;;  %v2653_v22 = vadd.f32 %v2525_v6, %v2397_v61  ;;  %v2719_v0 = vmax.f32 %v2591_v63, 0.0  ;;  %v2194_v41 = vmul.f32 %v4966_v7, %v2054_v32 }
 0x284   : > { %v2332_v59 = vadd.f32 %v5011_v38, %v2192_v55  ;;  %v2118_v1 = vunpack.c.l.bf16 %v1999_v10  ;;  %v2655_v18 = vadd.f32 %v2527_v46, %v2399_v44  ;;  %v2256_v56 = vmul.f32 %v4966_v7, %v2116_v47  ;;  %v2465_v10 = vld [vmem:[%s6006_s1 + $0x188] sm:$0xff] }
 0x285   : > { %3233 = vmatmul.mubr.bf16.gmra.mxu1 %v2852_v24  ;;  %v2781_v37 = vmax.f32 %v2653_v22, 0.0  ;;  %v2057_v60 = vunpack.c.h.bf16 %v1968_v9  ;;  %v2823_v42 = vpack.c.bf16 %v2719_v0, %v2717_v15  ;;  %v2334_v3 = vadd.f32 %v5011_v38, %v2194_v41  ;;  %v1970_v15 = vld [vmem:[#allocation6 + $0x160] sm:$0xff]  ;;  %v1971_v0 = vld [vmem:[#allocation6 + $0x30] sm:$0xff] }
 0x286   : > { %v2588_v33 = vadd.f32 %v2460_v23, %v2332_v59  ;;  %v2258_v14 = vmul.f32 %v4966_v7, %v2118_v1  ;;  %v2783_v25 = vmax.f32 %v2655_v18, 0.0  ;;  %v2396_v8 = vadd.f32 %v5011_v38, %v2256_v56  ;;  %v2466_v1 = vld [vmem:[%s6006_s1 + $0x190] sm:$0xff] }
 0x287   : > { %v2059_v49 = vunpack.c.h.bf16 %v1969_v50  ;;  %v2197_v48 = vmul.f32 %v4970_v4, %v2057_v60  ;;  %3112 = vmatprep.mubr.bf16.mxu0 %v2823_v42  ;;  %v2590_v26 = vadd.f32 %v2462_v57, %v2334_v3  ;;  %v2121_v52 = vunpack.c.h.bf16 %v2000_v16  ;;  %v2528_v42 = vld [vmem:[%s6006_s1 + $0x380] sm:$0xff] }
 0x288   : > { %v2716_v2 = vmax.f32 %v2588_v33, 0.0  ;;  %v2398_v28 = vadd.f32 %v5011_v38, %v2258_v14  ;;  %v2855_v12 = vpack.c.bf16 %v2783_v25, %v2781_v37  ;;  %v2652_v17 = vadd.f32 %v2524_v13, %v2396_v8  ;;  %v2002_v37 = vld [vmem:[#allocation6 + $0xc0] sm:$0xff]  ;;  %v2530_v14 = vld [vmem:[%s6006_s1 + $0x390] sm:$0xff] }
 0x289   : > { %v2199_v5 = vmul.f32 %v4970_v4, %v2059_v49  ;;  %v2337_v29 = vadd.f32 %v5015_v35, %v2197_v48  ;;  %v2718_v20 = vmax.f32 %v2590_v26, 0.0  ;;  %v2123_v53 = vunpack.c.h.bf16 %v2001_v31  ;;  %v2003_v8 = vld [vmem:[#allocation6 + $0x1c0] sm:$0xff] }
 0x28a   : > { %v2654_v40 = vadd.f32 %v2526_v54, %v2398_v28  ;;  %v2261_v51 = vmul.f32 %v4970_v4, %v2121_v52  ;;  %3240 = vmatprep.mubr.bf16.mxu1 %v2855_v12  ;;  %v2780_v19 = vmax.f32 %v2652_v17, 0.0  ;;  %v2056_v39 = vunpack.c.l.bf16 %v1968_v9  ;;  %v2464_v9 = vld [vmem:[%s6006_s1 + $0x180] sm:$0xff] }
 0x28b   : > { %v2339_v21 = vadd.f32 %v5015_v35, %v2199_v5  ;;  %v2593_v43 = vadd.f32 %v2465_v10, %v2337_v29  ;;  %v2822_v30 = vpack.c.bf16 %v2718_v20, %v2716_v2  ;;  %v2263_v6 = vmul.f32 %v4970_v4, %v2123_v53  ;;  %v2471_v5 = vld [vmem:[%s6006_s1 + $0x1b8] sm:$0xff] }
 0x28c   : > { %v2782_v36 = vmax.f32 %v2654_v40, 0.0  ;;  %v2401_v34 = vadd.f32 %v5015_v35, %v2261_v51  ;;  %v2058_v61 = vunpack.c.l.bf16 %v1969_v50  ;;  %v2196_v63 = vmul.f32 %v4966_v7, %v2056_v39  ;;  %v2533_v51 = vld [vmem:[%s6006_s1 + $0x3a8] sm:$0xff] }
 0x28d   : > { %v2595_v45 = vadd.f32 %v2467_v58, %v2339_v21  ;;  %v2721_v11 = vmax.f32 %v2593_v43, 0.0  ;;  %3113 = vmatmul.mubr.bf16.gmra.mxu0 %v2822_v30  ;;  %v2403_v32 = vadd.f32 %v5015_v35, %v2263_v6  ;;  %v2120_v24 = vunpack.c.l.bf16 %v2000_v16  ;;  %v2535_v6 = vld [vmem:[%s6006_s1 + $0x3b8] sm:$0xff] }
 0x28e   : > { %v2854_v46 = vpack.c.bf16 %v2782_v36, %v2780_v19  ;;  %v2657_v55 = vadd.f32 %v2529_v27, %v2401_v34  ;;  %v2198_v22 = vmul.f32 %v4966_v7, %v2058_v61  ;;  %v2336_v23 = vadd.f32 %v5011_v38, %v2196_v63 }
 0x28f   : > { %v2723_v44 = vmax.f32 %v2595_v45, 0.0  ;;  %v2122_v47 = vunpack.c.l.bf16 %v2001_v31  ;;  %v2659_v41 = vadd.f32 %v2531_v62, %v2403_v32  ;;  %v2260_v50 = vmul.f32 %v4966_v7, %v2120_v24  ;;  %v2469_v31 = vld [vmem:[%s6006_s1 + $0x1a8] sm:$0xff] }
 0x290   : > { %3241 = vmatmul.mubr.bf16.gmra.mxu1 %v2854_v46  ;;  %v2785_v59 = vmax.f32 %v2657_v55, 0.0  ;;  %v2061_v18 = vunpack.c.h.bf16 %v1970_v15  ;;  %v2338_v56 = vadd.f32 %v5011_v38, %v2198_v22  ;;  %v2592_v60 = vadd.f32 %v2464_v9, %v2336_v23 }
 0x291   : > { %v2825_v57 = vpack.c.bf16 %v2723_v44, %v2721_v11  ;;  %v2262_v16 = vmul.f32 %v4966_v7, %v2122_v47  ;;  %v2787_v3 = vmax.f32 %v2659_v41, 0.0  ;;  %v2400_v33 = vadd.f32 %v5011_v38, %v2260_v50  ;;  %v1972_v11 = vld [vmem:[#allocation6 + $0x1e0] sm:$0xff]  ;;  %v2470_v47 = vld [vmem:[%s6006_s1 + $0x1b0] sm:$0xff] }
 0x292   : > { %v2063_v13 = vunpack.c.h.bf16 %v1971_v0  ;;  %v2201_v25 = vmul.f32 %v4970_v4, %v2061_v18  ;;  %v2594_v54 = vadd.f32 %v2466_v1, %v2338_v56  ;;  %v2720_v49 = vmax.f32 %v2592_v60, 0.0  ;;  %v1973_v44 = vld [vmem:[#allocation6] sm:$0xff] }
 0x293   : > { %3120 = vmatprep.mubr.bf16.mxu0 %v2825_v57  ;;  %v2402_v48 = vadd.f32 %v5011_v38, %v2262_v16  ;;  %v2125_v26 = vunpack.c.h.bf16 %v2002_v37  ;;  %v2857_v2 = vpack.c.bf16 %v2787_v3, %v2785_v59  ;;  %v2656_v28 = vadd.f32 %v2528_v42, %v2400_v33  ;;  %v2004_v59 = vld [vmem:[#allocation6 + $0x158] sm:$0xff]  ;;  %v2534_v16 = vld [vmem:[%s6006_s1 + $0x3b0] sm:$0xff]  ;;  %v2005_v33 = vld [vmem:[#allocation6 + $0x10] sm:$0xff] }
 0x294   : > { %v2203_v10 = vmul.f32 %v4970_v4, %v2063_v13  ;;  %v2341_v52 = vadd.f32 %v5015_v35, %v2201_v25  ;;  %v2722_v12 = vmax.f32 %v2594_v54, 0.0  ;;  %v2127_v29 = vunpack.c.h.bf16 %v2003_v8  ;;  %v2532_v57 = vld [vmem:[%s6006_s1 + $0x3a0] sm:$0xff] }
 0x295   : > { %v2658_v17 = vadd.f32 %v2530_v14, %v2402_v48  ;;  %v2265_v20 = vmul.f32 %v4970_v4, %v2125_v26  ;;  %3248 = vmatprep.mubr.bf16.mxu1 %v2857_v2  ;;  %v2784_v40 = vmax.f32 %v2656_v28, 0.0  ;;  %v2060_v19 = vunpack.c.l.bf16 %v1970_v15  ;;  %v2468_v15 = vld [vmem:[%s6006_s1 + $0x1a0] sm:$0xff] }
 0x296   : > { %v2343_v58 = vadd.f32 %v5015_v35, %v2203_v10  ;;  %v2597_v53 = vadd.f32 %v2469_v31, %v2341_v52  ;;  %v2824_v21 = vpack.c.bf16 %v2722_v12, %v2720_v49  ;;  %v2267_v27 = vmul.f32 %v4970_v4, %v2127_v29  ;;  %v2475_v10 = vld [vmem:[%s6006_s1 + $0x1d8] sm:$0xff] }
 0x297   : > { %v2786_v43 = vmax.f32 %v2658_v17, 0.0  ;;  %v2405_v39 = vadd.f32 %v5015_v35, %v2265_v20  ;;  %v2062_v34 = vunpack.c.l.bf16 %v1971_v0  ;;  %v2200_v45 = vmul.f32 %v4966_v7, %v2060_v19  ;;  %v2537_v20 = vld [vmem:[%s6006_s1 + $0x3c8] sm:$0xff] }
 0x298   : > { %v2599_v30 = vadd.f32 %v2471_v5, %v2343_v58  ;;  %v2725_v36 = vmax.f32 %v2597_v53, 0.0  ;;  %3121 = vmatmul.mubr.bf16.gmra.mxu0 %v2824_v21  ;;  %v2407_v61 = vadd.f32 %v5015_v35, %v2267_v27  ;;  %v2124_v46 = vunpack.c.l.bf16 %v2002_v37  ;;  %v2539_v27 = vld [vmem:[%s6006_s1 + $0x3d8] sm:$0xff] }
 0x299   : > { %v2856_v62 = vpack.c.bf16 %v2786_v43, %v2784_v40  ;;  %v2661_v63 = vadd.f32 %v2533_v51, %v2405_v39  ;;  %v2202_v55 = vmul.f32 %v4966_v7, %v2062_v34  ;;  %v2340_v9 = vadd.f32 %v5011_v38, %v2200_v45 }
 0x29a   : > { %v2727_v32 = vmax.f32 %v2599_v30, 0.0  ;;  %v2126_v24 = vunpack.c.l.bf16 %v2003_v8  ;;  %v2663_v22 = vadd.f32 %v2535_v6, %v2407_v61  ;;  %v2264_v0 = vmul.f32 %v4966_v7, %v2124_v46  ;;  %v2473_v8 = vld [vmem:[%s6006_s1 + $0x1c8] sm:$0xff] }
 0x29b   : > { %3249 = vmatmul.mubr.bf16.gmra.mxu1 %v2856_v62  ;;  %v2789_v23 = vmax.f32 %v2661_v63, 0.0  ;;  %v2065_v41 = vunpack.c.h.bf16 %v1972_v11  ;;  %v2342_v50 = vadd.f32 %v5011_v38, %v2202_v55  ;;  %v2596_v18 = vadd.f32 %v2468_v15, %v2340_v9 }
 0x29c   : > { %v2827_v1 = vpack.c.bf16 %v2727_v32, %v2725_v36  ;;  %v2266_v37 = vmul.f32 %v4966_v7, %v2126_v24  ;;  %v2791_v56 = vmax.f32 %v2663_v22, 0.0  ;;  %v2404_v60 = vadd.f32 %v5011_v38, %v2264_v0  ;;  %v1974_v36 = vld [vmem:[#allocation6 + $0xf0] sm:$0xff]  ;;  %v1975_v32 = vld [vmem:[#allocation6 + $0x8] sm:$0xff] }
 0x29d   : > { %v2067_v42 = vunpack.c.h.bf16 %v1973_v44  ;;  %v2205_v3 = vmul.f32 %v4970_v4, %v2065_v41  ;;  %v2598_v14 = vadd.f32 %v2470_v47, %v2342_v50  ;;  %v2724_v13 = vmax.f32 %v2596_v18, 0.0  ;;  %v2474_v24 = vld [vmem:[%s6006_s1 + $0x1d0] sm:$0xff] }
 0x29e   : > { %3128 = vmatprep.mubr.bf16.mxu0 %v2827_v1  ;;  %v2406_v25 = vadd.f32 %v5011_v38, %v2266_v37  ;;  %v2129_v54 = vunpack.c.h.bf16 %v2004_v59  ;;  %v2859_v49 = vpack.c.bf16 %v2791_v56, %v2789_v23  ;;  %v2660_v48 = vadd.f32 %v2532_v57, %v2404_v60  ;;  %v2006_v23 = vld [vmem:[#allocation6 + $0x58] sm:$0xff]  ;;  %v2538_v37 = vld [vmem:[%s6006_s1 + $0x3d0] sm:$0xff]  ;;  %v2007_v60 = vld [vmem:[#allocation6 + $0xa0] sm:$0xff] }
 0x29f   : > { %v2207_v31 = vmul.f32 %v4970_v4, %v2067_v42  ;;  %v2345_v26 = vadd.f32 %v5015_v35, %v2205_v3  ;;  %v2726_v2 = vmax.f32 %v2598_v14, 0.0  ;;  %v2131_v52 = vunpack.c.h.bf16 %v2005_v33  ;;  %v2536_v1 = vld [vmem:[%s6006_s1 + $0x3c0] sm:$0xff] }
 0x2a0   : > { %v2662_v28 = vadd.f32 %v2534_v16, %v2406_v25  ;;  %v2269_v12 = vmul.f32 %v4970_v4, %v2129_v54  ;;  %3256 = vmatprep.mubr.bf16.mxu1 %v2859_v49  ;;  %v2788_v17 = vmax.f32 %v2660_v48, 0.0  ;;  %v2064_v40 = vunpack.c.l.bf16 %v1972_v11  ;;  %v2472_v11 = vld [vmem:[%s6006_s1 + $0x1c0] sm:$0xff] }
 0x2a1   : > { %v2347_v5 = vadd.f32 %v5015_v35, %v2207_v31  ;;  %v2601_v29 = vadd.f32 %v2473_v8, %v2345_v26  ;;  %v2826_v58 = vpack.c.bf16 %v2726_v2, %v2724_v13  ;;  %v2271_v51 = vmul.f32 %v4970_v4, %v2131_v52  ;;  %v2479_v31 = vld [vmem:[%s6006_s1 + $0x1f8] sm:$0xff] }
 0x2a2   : > { %v2790_v53 = vmax.f32 %v2662_v28, 0.0  ;;  %v2409_v19 = vadd.f32 %v5015_v35, %v2269_v12  ;;  %v2066_v39 = vunpack.c.l.bf16 %v1973_v44  ;;  %v2204_v30 = vmul.f32 %v4966_v7, %v2064_v40  ;;  %v2541_v12 = vld [vmem:[%s6006_s1 + $0x3e8] sm:$0xff] }
 0x2a3   : > { %v2603_v21 = vadd.f32 %v2475_v10, %v2347_v5  ;;  %v2729_v43 = vmax.f32 %v2601_v29, 0.0  ;;  %3129 = vmatmul.mubr.bf16.gmra.mxu0 %v2826_v58  ;;  %v2411_v34 = vadd.f32 %v5015_v35, %v2271_v51  ;;  %v2128_v62 = vunpack.c.l.bf16 %v2004_v59  ;;  %v2543_v51 = vld [vmem:[%s6006_s1 + $0x3f8] sm:$0xff] }
 0x2a4   : > { %v2858_v6 = vpack.c.bf16 %v2790_v53, %v2788_v17  ;;  %v2665_v45 = vadd.f32 %v2537_v20, %v2409_v19  ;;  %v2206_v63 = vmul.f32 %v4966_v7, %v2066_v39  ;;  %v2344_v15 = vadd.f32 %v5011_v38, %v2204_v30 }
 0x2a5   : > { %v2731_v61 = vmax.f32 %v2603_v21, 0.0  ;;  %v2130_v46 = vunpack.c.l.bf16 %v2005_v33  ;;  %v2667_v55 = vadd.f32 %v2539_v27, %v2411_v34  ;;  %v2268_v44 = vmul.f32 %v4966_v7, %v2128_v62  ;;  %v2477_v33 = vld [vmem:[%s6006_s1 + $0x1e8] sm:$0xff] }
 0x2a6   : > { %3257 = vmatmul.mubr.bf16.gmra.mxu1 %v2858_v6  ;;  %v2793_v9 = vmax.f32 %v2665_v45, 0.0  ;;  %v2069_v22 = vunpack.c.h.bf16 %v1974_v36  ;;  %v2346_v0 = vadd.f32 %v5011_v38, %v2206_v63  ;;  %v2600_v41 = vadd.f32 %v2472_v11, %v2344_v15 }
 0x2a7   : > { %v2829_v47 = vpack.c.bf16 %v2731_v61, %v2729_v43  ;;  %v2270_v59 = vmul.f32 %v4966_v7, %v2130_v46  ;;  %v2795_v50 = vmax.f32 %v2667_v55, 0.0  ;;  %v2408_v18 = vadd.f32 %v5011_v38, %v2268_v44  ;;  %v2478_v61 = vld [vmem:[%s6006_s1 + $0x1f0] sm:$0xff]  ;;  %v2540_v55 = vld [vmem:[%s6006_s1 + $0x3e0] sm:$0xff] }
 0x2a8   : > { %v2071_v57 = vunpack.c.h.bf16 %v1975_v32  ;;  %v2209_v56 = vmul.f32 %v4970_v4, %v2069_v22  ;;  %v2602_v16 = vadd.f32 %v2474_v24, %v2346_v0  ;;  %v2728_v42 = vmax.f32 %v2600_v41, 0.0  ;;  %v2542_v44 = vld [vmem:[%s6006_s1 + $0x3f0] sm:$0xff] }
 0x2a9   : > { %3136 = vmatprep.mubr.bf16.mxu0 %v2829_v47  ;;  %v2410_v3 = vadd.f32 %v5011_v38, %v2270_v59  ;;  %v2133_v14 = vunpack.c.h.bf16 %v2006_v23  ;;  %v2861_v13 = vpack.c.bf16 %v2795_v50, %v2793_v9  ;;  %v2664_v25 = vadd.f32 %v2536_v1, %v2408_v18 }
 0x2aa   : > { %v2211_v8 = vmul.f32 %v4970_v4, %v2071_v57  ;;  %v2349_v54 = vadd.f32 %v5015_v35, %v2209_v56  ;;  %v2730_v49 = vmax.f32 %v2602_v16, 0.0  ;;  %v2135_v26 = vunpack.c.h.bf16 %v2007_v60 }
 0x2ab   : > { %v2666_v48 = vadd.f32 %v2538_v37, %v2410_v3  ;;  %v2273_v2 = vmul.f32 %v4970_v4, %v2133_v14  ;;  %3264 = vmatprep.mubr.bf16.mxu1 %v2861_v13  ;;  %v2792_v28 = vmax.f32 %v2664_v25, 0.0  ;;  %v2068_v17 = vunpack.c.l.bf16 %v1974_v36 }
 0x2ac   : > { %v2351_v10 = vadd.f32 %v5015_v35, %v2211_v8  ;;  %v2605_v52 = vadd.f32 %v2477_v33, %v2349_v54  ;;  %v2828_v5 = vpack.c.bf16 %v2730_v49, %v2728_v42  ;;  %v2275_v20 = vmul.f32 %v4970_v4, %v2135_v26  ;;  %v2476_v4 = vld [vmem:[%s6006_s1 + $0x1e0] sm:$0xff] }
 0x2ad   : > { %v2794_v29 = vmax.f32 %v2666_v48, 0.0  ;;  %v2413_v40 = vadd.f32 %v5015_v35, %v2273_v2  ;;  %v2070_v19 = vunpack.c.l.bf16 %v1975_v32  ;;  %v2208_v21 = vmul.f32 %v4966_v7, %v2068_v17 }
 0x2ae   : > { %v2607_v58 = vadd.f32 %v2479_v31, %v2351_v10  ;;  %v2733_v53 = vmax.f32 %v2605_v52, 0.0  ;;  %3137 = vmatmul.mubr.bf16.gmra.mxu0 %v2828_v5  ;;  %v2415_v27 = vadd.f32 %v5015_v35, %v2275_v20  ;;  %v2132_v30 = vunpack.c.l.bf16 %v2006_v23 }
 0x2af   : > { %v2860_v43 = vpack.c.bf16 %v2794_v29, %v2792_v28  ;;  %v2669_v39 = vadd.f32 %v2541_v12, %v2413_v40  ;;  %v2210_v6 = vmul.f32 %v4966_v7, %v2070_v19  ;;  %v2348_v34 = vadd.f32 %v5011_v38, %v2208_v21 }
 0x2b0   : > { %v2735_v36 = vmax.f32 %v2607_v58, 0.0  ;;  %v2134_v45 = vunpack.c.l.bf16 %v2007_v60  ;;  %v2671_v11 = vadd.f32 %v2543_v51, %v2415_v27  ;;  %v2272_v35 = vmul.f32 %v4966_v7, %v2132_v30 }
 0x2b1   : > { %3265 = vmatmul.mubr.bf16.gmra.mxu1 %v2860_v43  ;;  %v2797_v62 = vmax.f32 %v2669_v39, 0.0  ;;  %v2350_v15 = vadd.f32 %v5011_v38, %v2210_v6  ;;  %v2604_v46 = vadd.f32 %v2476_v4, %v2348_v34 }
 0x2b2   : > { %v2831_v63 = vpack.c.bf16 %v2735_v36, %v2733_v53  ;;  %v2274_v32 = vmul.f32 %v4966_v7, %v2134_v45  ;;  %v2799_v9 = vmax.f32 %v2671_v11, 0.0  ;;  %v2412_v24 = vadd.f32 %v5011_v38, %v2272_v35 }
 0x2b3   : > { %v2606_v22 = vadd.f32 %v2478_v61, %v2350_v15  ;;  %v2732_v23 = vmax.f32 %v2604_v46, 0.0 }
 0x2b4   : > { %3144 = vmatprep.mubr.bf16.mxu0 %v2831_v63  ;;  %v2414_v47 = vadd.f32 %v5011_v38, %v2274_v32  ;;  %v2863_v0 = vpack.c.bf16 %v2799_v9, %v2797_v62  ;;  %v2668_v41 = vadd.f32 %v2540_v55, %v2412_v24 }
 0x2b5   : > { %v2734_v59 = vmax.f32 %v2606_v22, 0.0 }
 0x2b6   : > { %v2670_v7 = vadd.f32 %v2542_v44, %v2414_v47  ;;  %3272 = vmatprep.mubr.bf16.mxu1 %v2863_v0  ;;  %v2796_v1 = vmax.f32 %v2668_v41, 0.0 }
 0x2b7   : > { %v2830_v50 = vpack.c.bf16 %v2734_v59, %v2732_v23 }
 0x2b8   : > { %v2798_v18 = vmax.f32 %v2670_v7, 0.0 }
 0x2b9   : > { %3145 = vmatmul.mubr.bf16.gmra.mxu0 %v2830_v50 }
 0x2ba   : > { %v2862_v37 = vpack.c.bf16 %v2798_v18, %v2796_v1 }
 0x2bc   : > { %3273 = vmatmul.mubr.bf16.gmra.mxu1 %v2862_v37 }
 0x2d4   : > { %v3026_v57 = vpop.f32.mrf.mxu0 }
 0x2d5   : > { %3281 = vst [vmem:[%s6010_s5] sm:$0xff] %v3026_v57 }
 0x2d6   : > { %v3028_v60 = vpop.f32.mrf.mxu0 }
 0x2d7   : > { %v3154_v56 = vpop.f32.mrf.mxu1 }
 0x2d8   : > { %3313 = vst [vmem:[%s6010_s5 + $0x100] sm:$0xff] %v3154_v56  ;;  %v3029_v16 = vpop.f32.mrf.mxu0 }
 0x2d9   : > { %v3156_v38 = vpop.f32.mrf.mxu1  ;;  %3282 = vst [vmem:[%s6010_s5 + $0x8] sm:$0xff] %v3029_v16 }
 0x2da   : > { %v3031_v3 = vpop.f32.mrf.mxu0 }
 0x2db   : > { %v3157_v42 = vpop.f32.mrf.mxu1 }
 0x2dc   : > { %3314 = vst [vmem:[%s6010_s5 + $0x108] sm:$0xff] %v3157_v42 }
 0x2dd   : > { %v3159_v33 = vpop.f32.mrf.mxu1 }
 0x2e0   : > { %v3034_v14 = vpop.f32.mrf.mxu0 }
 0x2e1   : > { %3283 = vst [vmem:[%s6010_s5 + $0x10] sm:$0xff] %v3034_v14 }
 0x2e2   : > { %v3036_v25 = vpop.f32.mrf.mxu0 }
 0x2e3   : > { %v3162_v13 = vpop.f32.mrf.mxu1 }
 0x2e4   : > { %3315 = vst [vmem:[%s6010_s5 + $0x110] sm:$0xff] %v3162_v13  ;;  %v3037_v54 = vpop.f32.mrf.mxu0 }
 0x2e5   : > { %v3164_v8 = vpop.f32.mrf.mxu1  ;;  %3284 = vst [vmem:[%s6010_s5 + $0x18] sm:$0xff] %v3037_v54 }
 0x2e6   : > { %v3039_v48 = vpop.f32.mrf.mxu0 }
 0x2e7   : > { %v3165_v49 = vpop.f32.mrf.mxu1 }
 0x2e8   : > { %3316 = vst [vmem:[%s6010_s5 + $0x118] sm:$0xff] %v3165_v49 }
 0x2e9   : > { %v3167_v31 = vpop.f32.mrf.mxu1 }
 0x2ec   : > { %v3042_v26 = vpop.f32.mrf.mxu0 }
 0x2ed   : > { %3285 = vst [vmem:[%s6010_s5 + $0x20] sm:$0xff] %v3042_v26  ;;  %v3170_v2 = vpop.f32.mrf.mxu1 }
 0x2ee   : > { %v3044_v28 = vpop.f32.mrf.mxu0  ;;  %3317 = vst [vmem:[%s6010_s5 + $0x120] sm:$0xff] %v3170_v2 }
 0x2ef   : > { %v3172_v10 = vpop.f32.mrf.mxu1 }
 0x2f0   : > { %v3045_v52 = vpop.f32.mrf.mxu0 }
 0x2f1   : > { %3286 = vst [vmem:[%s6010_s5 + $0x28] sm:$0xff] %v3045_v52  ;;  %v3173_v12 = vpop.f32.mrf.mxu1 }
 0x2f2   : > { %v3047_v17 = vpop.f32.mrf.mxu0  ;;  %3318 = vst [vmem:[%s6010_s5 + $0x128] sm:$0xff] %v3173_v12 }
 0x2f3   : > { %v3175_v5 = vpop.f32.mrf.mxu1 }
 0x2f6   : > { %v3050_v29 = vpop.f32.mrf.mxu0 }
 0x2f7   : > { %3287 = vst [vmem:[%s6010_s5 + $0x30] sm:$0xff] %v3050_v29 }
 0x2f8   : > { %v3052_v40 = vpop.f32.mrf.mxu0 }
 0x2f9   : > { %v3178_v20 = vpop.f32.mrf.mxu1 }
 0x2fa   : > { %3319 = vst [vmem:[%s6010_s5 + $0x130] sm:$0xff] %v3178_v20  ;;  %v3053_v53 = vpop.f32.mrf.mxu0 }
 0x2fb   : > { %v3180_v58 = vpop.f32.mrf.mxu1  ;;  %3288 = vst [vmem:[%s6010_s5 + $0x38] sm:$0xff] %v3053_v53 }
 0x2fc   : > { %v3055_v19 = vpop.f32.mrf.mxu0 }
 0x2fd   : > { %v3181_v51 = vpop.f32.mrf.mxu1 }
 0x2fe   : > { %3320 = vst [vmem:[%s6010_s5 + $0x138] sm:$0xff] %v3181_v51 }
 0x2ff   : > { %v3183_v21 = vpop.f32.mrf.mxu1 }
 0x302   : > { %v3058_v43 = vpop.f32.mrf.mxu0 }
 0x303   : > { %3289 = vst [vmem:[%s6010_s5 + $0x40] sm:$0xff] %v3058_v43  ;;  %v3186_v27 = vpop.f32.mrf.mxu1 }
 0x304   : > { %v3060_v39 = vpop.f32.mrf.mxu0  ;;  %3321 = vst [vmem:[%s6010_s5 + $0x140] sm:$0xff] %v3186_v27 }
 0x305   : > { %v3188_v4 = vpop.f32.mrf.mxu1 }
 0x306   : > { %v3061_v30 = vpop.f32.mrf.mxu0 }
 0x307   : > { %3290 = vst [vmem:[%s6010_s5 + $0x48] sm:$0xff] %v3061_v30  ;;  %v3189_v36 = vpop.f32.mrf.mxu1 }
 0x308   : > { %v3063_v6 = vpop.f32.mrf.mxu0  ;;  %3322 = vst [vmem:[%s6010_s5 + $0x148] sm:$0xff] %v3189_v36 }
 0x309   : > { %v3191_v34 = vpop.f32.mrf.mxu1 }
 0x30c   : > { %v3066_v45 = vpop.f32.mrf.mxu0 }
 0x30d   : > { %3291 = vst [vmem:[%s6010_s5 + $0x50] sm:$0xff] %v3066_v45 }
 0x30e   : > { %v3068_v62 = vpop.f32.mrf.mxu0 }
 0x30f   : > { %v3194_v11 = vpop.f32.mrf.mxu1 }
 0x310   : > { %3323 = vst [vmem:[%s6010_s5 + $0x150] sm:$0xff] %v3194_v11  ;;  %v3069_v35 = vpop.f32.mrf.mxu0 }
 0x311   : > { %v3196_v61 = vpop.f32.mrf.mxu1  ;;  %3292 = vst [vmem:[%s6010_s5 + $0x58] sm:$0xff] %v3069_v35 }
 0x312   : > { %v3071_v15 = vpop.f32.mrf.mxu0 }
 0x313   : > { %v3197_v63 = vpop.f32.mrf.mxu1 }
 0x314   : > { %3324 = vst [vmem:[%s6010_s5 + $0x158] sm:$0xff] %v3197_v63 }
 0x315   : > { %v3199_v46 = vpop.f32.mrf.mxu1 }
 0x318   : > { %v3074_v32 = vpop.f32.mrf.mxu0 }
 0x319   : > { %3293 = vst [vmem:[%s6010_s5 + $0x60] sm:$0xff] %v3074_v32  ;;  %v3202_v55 = vpop.f32.mrf.mxu1 }
 0x31a   : > { %v3076_v9 = vpop.f32.mrf.mxu0  ;;  %3325 = vst [vmem:[%s6010_s5 + $0x160] sm:$0xff] %v3202_v55 }
 0x31b   : > { %v3204_v24 = vpop.f32.mrf.mxu1 }
 0x31c   : > { %v3077_v44 = vpop.f32.mrf.mxu0 }
 0x31d   : > { %3294 = vst [vmem:[%s6010_s5 + $0x68] sm:$0xff] %v3077_v44  ;;  %v3205_v22 = vpop.f32.mrf.mxu1 }
 0x31e   : > { %v3079_v23 = vpop.f32.mrf.mxu0  ;;  %3326 = vst [vmem:[%s6010_s5 + $0x168] sm:$0xff] %v3205_v22 }
 0x31f   : > { %v3207_v47 = vpop.f32.mrf.mxu1 }
 0x322   : > { %v3082_v0 = vpop.f32.mrf.mxu0 }
 0x323   : > { %3295 = vst [vmem:[%s6010_s5 + $0x70] sm:$0xff] %v3082_v0 }
 0x324   : > { %v3084_v59 = vpop.f32.mrf.mxu0 }
 0x325   : > { %v3210_v41 = vpop.f32.mrf.mxu1 }
 0x326   : > { %3327 = vst [vmem:[%s6010_s5 + $0x170] sm:$0xff] %v3210_v41  ;;  %v3085_v1 = vpop.f32.mrf.mxu0 }
 0x327   : > { %v3212_v7 = vpop.f32.mrf.mxu1  ;;  %3296 = vst [vmem:[%s6010_s5 + $0x78] sm:$0xff] %v3085_v1 }
 0x328   : > { %v3087_v18 = vpop.f32.mrf.mxu0 }
 0x329   : > { %v3213_v50 = vpop.f32.mrf.mxu1 }
 0x32a   : > { %3328 = vst [vmem:[%s6010_s5 + $0x178] sm:$0xff] %v3213_v50 }
 0x32b   : > { %v3215_v37 = vpop.f32.mrf.mxu1 }
 0x32e   : > { %v3090_v57 = vpop.f32.mrf.mxu0 }
 0x32f   : > { %3297 = vst [vmem:[%s6010_s5 + $0x80] sm:$0xff] %v3090_v57  ;;  %v3218_v56 = vpop.f32.mrf.mxu1 }
 0x330   : > { %v3092_v60 = vpop.f32.mrf.mxu0  ;;  %3329 = vst [vmem:[%s6010_s5 + $0x180] sm:$0xff] %v3218_v56 }
 0x331   : > { %v3220_v38 = vpop.f32.mrf.mxu1 }
 0x332   : > { %v3093_v16 = vpop.f32.mrf.mxu0 }
 0x333   : > { %3298 = vst [vmem:[%s6010_s5 + $0x88] sm:$0xff] %v3093_v16  ;;  %v3221_v42 = vpop.f32.mrf.mxu1 }
 0x334   : > { %v3095_v3 = vpop.f32.mrf.mxu0  ;;  %3330 = vst [vmem:[%s6010_s5 + $0x188] sm:$0xff] %v3221_v42 }
 0x335   : > { %v3223_v33 = vpop.f32.mrf.mxu1 }
 0x338   : > { %v3098_v14 = vpop.f32.mrf.mxu0 }
 0x339   : > { %3299 = vst [vmem:[%s6010_s5 + $0x90] sm:$0xff] %v3098_v14 }
 0x33a   : > { %v3226_v13 = vpop.f32.mrf.mxu1  ;;  %v3100_v25 = vpop.f32.mrf.mxu0 }
 0x33b   : > { %3331 = vst [vmem:[%s6010_s5 + $0x190] sm:$0xff] %v3226_v13 }
 0x33c   : > { %v3228_v8 = vpop.f32.mrf.mxu1  ;;  %v3101_v54 = vpop.f32.mrf.mxu0 }
 0x33d   : > { %3300 = vst [vmem:[%s6010_s5 + $0x98] sm:$0xff] %v3101_v54 }
 0x33e   : > { %v3229_v49 = vpop.f32.mrf.mxu1  ;;  %v3103_v48 = vpop.f32.mrf.mxu0 }
 0x33f   : > { %3332 = vst [vmem:[%s6010_s5 + $0x198] sm:$0xff] %v3229_v49 }
 0x340   : > { %v3231_v31 = vpop.f32.mrf.mxu1 }
 0x342   : > { %v3106_v26 = vpop.f32.mrf.mxu0 }
 0x343   : > { %3301 = vst [vmem:[%s6010_s5 + $0xa0] sm:$0xff] %v3106_v26 }
 0x344   : > { %v3108_v28 = vpop.f32.mrf.mxu0 }
 0x345   : > { %v3234_v2 = vpop.f32.mrf.mxu1 }
 0x346   : > { %3333 = vst [vmem:[%s6010_s5 + $0x1a0] sm:$0xff] %v3234_v2  ;;  %v3109_v52 = vpop.f32.mrf.mxu0 }
 0x347   : > { %v3236_v10 = vpop.f32.mrf.mxu1  ;;  %3302 = vst [vmem:[%s6010_s5 + $0xa8] sm:$0xff] %v3109_v52 }
 0x348   : > { %v3111_v17 = vpop.f32.mrf.mxu0 }
 0x349   : > { %v3237_v12 = vpop.f32.mrf.mxu1 }
 0x34a   : > { %3334 = vst [vmem:[%s6010_s5 + $0x1a8] sm:$0xff] %v3237_v12 }
 0x34b   : > { %v3239_v5 = vpop.f32.mrf.mxu1 }
 0x34d   : > { %v3114_v29 = vpop.f32.mrf.mxu0 }
 0x34e   : > { %3303 = vst [vmem:[%s6010_s5 + $0xb0] sm:$0xff] %v3114_v29 }
 0x34f   : > { %v3116_v40 = vpop.f32.mrf.mxu0 }
 0x350   : > { %v3242_v20 = vpop.f32.mrf.mxu1 }
 0x351   : > { %3335 = vst [vmem:[%s6010_s5 + $0x1b0] sm:$0xff] %v3242_v20  ;;  %v3117_v53 = vpop.f32.mrf.mxu0 }
 0x352   : > { %v3244_v58 = vpop.f32.mrf.mxu1  ;;  %3304 = vst [vmem:[%s6010_s5 + $0xb8] sm:$0xff] %v3117_v53 }
 0x353   : > { %v3119_v19 = vpop.f32.mrf.mxu0 }
 0x354   : > { %v3245_v51 = vpop.f32.mrf.mxu1 }
 0x355   : > { %3336 = vst [vmem:[%s6010_s5 + $0x1b8] sm:$0xff] %v3245_v51 }
 0x356   : > { %v3247_v21 = vpop.f32.mrf.mxu1 }
 0x358   : > { %v3122_v43 = vpop.f32.mrf.mxu0 }
 0x359   : > { %3305 = vst [vmem:[%s6010_s5 + $0xc0] sm:$0xff] %v3122_v43 }
 0x35a   : > { %v3124_v39 = vpop.f32.mrf.mxu0 }
 0x35b   : > { %v3250_v27 = vpop.f32.mrf.mxu1 }
 0x35c   : > { %3337 = vst [vmem:[%s6010_s5 + $0x1c0] sm:$0xff] %v3250_v27  ;;  %v3125_v30 = vpop.f32.mrf.mxu0 }
 0x35d   : > { %v3252_v4 = vpop.f32.mrf.mxu1  ;;  %3306 = vst [vmem:[%s6010_s5 + $0xc8] sm:$0xff] %v3125_v30 }
 0x35e   : > { %v3127_v6 = vpop.f32.mrf.mxu0 }
 0x35f   : > { %v3253_v36 = vpop.f32.mrf.mxu1 }
 0x360   : > { %3338 = vst [vmem:[%s6010_s5 + $0x1c8] sm:$0xff] %v3253_v36 }
 0x361   : > { %v3255_v34 = vpop.f32.mrf.mxu1 }
 0x363   : > { %v3130_v45 = vpop.f32.mrf.mxu0 }
 0x364   : > { %3307 = vst [vmem:[%s6010_s5 + $0xd0] sm:$0xff] %v3130_v45 }
 0x365   : > { %v3132_v62 = vpop.f32.mrf.mxu0 }
 0x366   : > { %v3258_v11 = vpop.f32.mrf.mxu1 }
 0x367   : > { %3339 = vst [vmem:[%s6010_s5 + $0x1d0] sm:$0xff] %v3258_v11  ;;  %v3133_v35 = vpop.f32.mrf.mxu0 }
 0x368   : > { %v3260_v61 = vpop.f32.mrf.mxu1  ;;  %3308 = vst [vmem:[%s6010_s5 + $0xd8] sm:$0xff] %v3133_v35 }
 0x369   : > { %v3135_v15 = vpop.f32.mrf.mxu0 }
 0x36a   : > { %v3261_v63 = vpop.f32.mrf.mxu1 }
 0x36b   : > { %3340 = vst [vmem:[%s6010_s5 + $0x1d8] sm:$0xff] %v3261_v63 }
 0x36c   : > { %v3263_v46 = vpop.f32.mrf.mxu1 }
 0x36e   : > { %v3138_v32 = vpop.f32.mrf.mxu0 }
 0x36f   : > { %3309 = vst [vmem:[%s6010_s5 + $0xe0] sm:$0xff] %v3138_v32 }
 0x370   : > { %v3140_v9 = vpop.f32.mrf.mxu0 }
 0x371   : > { %v3266_v55 = vpop.f32.mrf.mxu1 }
 0x372   : > { %3341 = vst [vmem:[%s6010_s5 + $0x1e0] sm:$0xff] %v3266_v55  ;;  %v3141_v44 = vpop.f32.mrf.mxu0 }
 0x373   : > { %v3268_v24 = vpop.f32.mrf.mxu1  ;;  %3310 = vst [vmem:[%s6010_s5 + $0xe8] sm:$0xff] %v3141_v44 }
 0x374   : > { %v3143_v23 = vpop.f32.mrf.mxu0 }
 0x375   : > { %v3269_v22 = vpop.f32.mrf.mxu1 }
 0x376   : > { %3342 = vst [vmem:[%s6010_s5 + $0x1e8] sm:$0xff] %v3269_v22 }
 0x377   : > { %v3271_v47 = vpop.f32.mrf.mxu1 }
 0x379   : > { %v3146_v0 = vpop.f32.mrf.mxu0 }
 0x37a   : > { %3311 = vst [vmem:[%s6010_s5 + $0xf0] sm:$0xff] %v3146_v0 }
 0x37b   : > { %v3148_v59 = vpop.f32.mrf.mxu0 }
 0x37c   : > { %v3274_v41 = vpop.f32.mrf.mxu1 }
 0x37d   : > { %3343 = vst [vmem:[%s6010_s5 + $0x1f0] sm:$0xff] %v3274_v41  ;;  %v3149_v1 = vpop.f32.mrf.mxu0 }
 0x37e   : > { %v3276_v7 = vpop.f32.mrf.mxu1  ;;  %3312 = vst [vmem:[%s6010_s5 + $0xf8] sm:$0xff] %v3149_v1 }
 0x37f   : > { %v3151_v18 = vpop.f32.mrf.mxu0 }
 0x380   : > { %v3277_v50 = vpop.f32.mrf.mxu1 }
 0x381   : > { %3344 = vst [vmem:[%s6010_s5 + $0x1f8] sm:$0xff] %v3277_v50 }
 0x382   : > { %v3279_v37 = vpop.f32.mrf.mxu1 }
 0x383 PF: > { %s15_s20 = sadd.s32 1, %s3807_s20   ;;  %s6218_s18 = smov %s3803_s19 }
 0x384   : > { %p12_p6 = scmp.ge.s32.totalorder %s15_s20, 4   ;;  %s6219_s19 = smov %s6221_s21 }
 0x386   :  { %14 = sbr.rel (!%p12_p6) target bundleno = 2 (0x2), region = 92 }

</bundles_post_ra>
